<compile_context>
chip_gen: v7x
topology: tpu7x:2x2x1
jax: 0.10.0
libtpu: 0.0.40
codegen_flags: <defaults>
</compile_context>

<pallas_src>
import functools
import math

import jax
import jax.numpy as jnp
from jax.experimental import pallas as pl
from jax.experimental.pallas import tpu as pltpu


def _round_up(x, m):
    return ((x + m - 1) // m) * m


# ---------------------------------------------------------------------------
# Fused Pallas kernel (built per static shape / layer count)
# ---------------------------------------------------------------------------
def _make_fused_kernel(T, Bt, D_in, H, num_layers):
    """Fused autoencoder kernel for fixed (static) shapes.

    Ref layout (per batch tile of Bt rows, time-major: row t*Bt + b == x[t, b]):
      x (T*Bt, D_in) f32
      encoder L*(w_ih[bf16], w_hh[f32], b[f32])
      decoder L*(w_ih[bf16], w_hh[f32], b[f32])
      fc_w (H, Dp) bf16 zero-padded, fc_b (1, Dp) f32 zero-padded
      out (T*Bt, Dp) f32   [lane-dense; wrapper slices off padding columns]
      scratch: gate_ref (T*Bt, 4H) f32, seq_ref (T*Bt, H) f32
    """
    G = 4 * H

    def kernel(*refs):
        x_ref = refs[0]
        w_refs = refs[1:1 + 6 * num_layers]
        fc_w_ref, fc_b_ref, out_ref, gate_ref, seq_ref = refs[1 + 6 * num_layers:]

        enc = [w_refs[3 * l:3 * l + 3] for l in range(num_layers)]
        dec = [w_refs[3 * (num_layers + l):3 * (num_layers + l) + 3]
               for l in range(num_layers)]

        def hoist_input_proj(inp_bf16, w_ih_ref, b_ref):
            # One batched (T*Bt, D) @ (D, 4H) bf16 matmul (f32 accumulation)
            # for all timesteps; result lands in VMEM scratch so the serial
            # recurrence only does cheap aligned row reads.
            proj = jnp.dot(inp_bf16, w_ih_ref[...],
                           preferred_element_type=jnp.float32)
            gate_ref[...] = proj + b_ref[...]

        def gates_from_scratch(t):
            off = pl.multiple_of(t * Bt, Bt)
            return gate_ref[pl.ds(off, Bt), :]

        def run_recurrence(w_hh_ref, gates_of):
            # Weight-stationary recurrent matmul: w_hh is loop-invariant, so
            # Mosaic keeps it pushed on the MXU across the unrolled time loop.
            w_hh = w_hh_ref[...]
            zeros = jnp.zeros((Bt, H), jnp.float32)

            def body(t, carry):
                h, c = carry
                gates = gates_of(t) + jnp.dot(
                    h, w_hh, preferred_element_type=jnp.float32)
                # Two full-vreg EUP passes over the (Bt, 4H)=(8,128) gate
                # block, then cheap lane slices (PyTorch gate order i,f,g,o).
                sig = jax.nn.sigmoid(gates)
                tah = jnp.tanh(gates)
                c = sig[:, H:2 * H] * c + sig[:, 0:H] * tah[:, 2 * H:3 * H]
                h = sig[:, 3 * H:4 * H] * jnp.tanh(c)
                off = pl.multiple_of(t * Bt, Bt)
                seq_ref[pl.ds(off, Bt), :] = h        # per-step vst to scratch
                return (h, c)

            # Small fixed T: fully unrolled but with visible loop structure.
            # For large T drop unroll (and T-chunk the hoisted projection via
            # pltpu.emit_pipeline) to bound instruction memory / VMEM.
            h, _ = jax.lax.fori_loop(0, T, body, (zeros, zeros), unroll=True)
            return h

        # ----------------------------- encoder -----------------------------
        h_last = None
        for l, (w_ih_ref, w_hh_ref, b_ref) in enumerate(enc):
            if l == 0:
                inp = x_ref[...].astype(jnp.bfloat16)
            else:
                inp = seq_ref[...].astype(jnp.bfloat16)
            hoist_input_proj(inp, w_ih_ref, b_ref)
            h_last = run_recurrence(w_hh_ref, gates_from_scratch)

        # ----------------------------- decoder -----------------------------
        # Decoder input is hidden[-1] repeated over T: never materialize the
        # repeat — its input projection is a single (Bt, H) @ (H, 4H) matmul,
        # constant over timesteps.
        for l, (w_ih_ref, w_hh_ref, b_ref) in enumerate(dec):
            if l == 0:
                proj_c = jnp.dot(h_last.astype(jnp.bfloat16), w_ih_ref[...],
                                 preferred_element_type=jnp.float32) + b_ref[...]
                run_recurrence(w_hh_ref, lambda t, p=proj_c: p)
            else:
                hoist_input_proj(seq_ref[...].astype(jnp.bfloat16),
                                 w_ih_ref, b_ref)
                run_recurrence(w_hh_ref, gates_from_scratch)

        # --------------------- fused Linear (lane-dense) --------------------
        out_ref[...] = jnp.dot(seq_ref[...].astype(jnp.bfloat16), fc_w_ref[...],
                               preferred_element_type=jnp.float32) + fc_b_ref[...]

    return kernel


# ---------------------------------------------------------------------------
# Wrapper around pallas_call
# ---------------------------------------------------------------------------
def lstm_autoencoder_forward(params, x, *, batch_tile=None):
    """x: (B, T, input_dim), batch-first like the PyTorch module.

    batch_tile: rows per grid step (rounded up to a multiple of 8).  Default is
    one tile covering the whole padded batch — best for single-TC v5e/v6e.  On
    v7x with B >= 16 pass batch_tile=ceil(B/2) rounded to 8 so the "parallel"
    grid axis spreads the two independent tiles across both TensorCores.
    """
    B, T, D_in = x.shape
    H = params["fc_w_t"].shape[0]
    L = len(params["encoder"])
    G = 4 * H

    Bt = _round_up(max(B if batch_tile is None else batch_tile, 1), 8)
    n_tiles = (B + Bt - 1) // Bt
    Bp = n_tiles * Bt
    Dp = _round_up(D_in, 128)      # lane-dense output width (>= 128)

    # Time-major, batch-padded, split into per-tile time-major 2D slabs.
    x_tm = jnp.transpose(x.astype(jnp.float32), (1, 0, 2))        # (T, B, D)
    x_tm = jnp.pad(x_tm, ((0, 0), (0, Bp - B), (0, 0)))           # (T, Bp, D)
    x_tiles = (x_tm.reshape(T, n_tiles, Bt, D_in)
               .transpose(1, 0, 2, 3)
               .reshape(n_tiles, T * Bt, D_in))

    def _const_spec(a):
        # Full-array block, constant index map -> weights DMA'd to VMEM once.
        return pl.BlockSpec(a.shape, lambda i: (0,) * a.ndim)

    args = [x_tiles]
    in_specs = [pl.BlockSpec((None, T * Bt, D_in), lambda i: (i, 0, 0))]
    for which in ("encoder", "decoder"):
        for (w_ih_t, w_hh_t, b) in params[which]:
            # w_ih feeds the hoisted bf16 matmul; w_hh / b stay f32.
            for a in (w_ih_t.astype(jnp.bfloat16), w_hh_t, b):
                args.append(a)
                in_specs.append(_const_spec(a))

    # Lane-dense padded Linear weights (zero columns are sliced off below).
    fc_w = jnp.zeros((H, Dp), jnp.float32).at[:, :D_in].set(
        params["fc_w_t"]).astype(jnp.bfloat16)
    fc_b = jnp.zeros((1, Dp), jnp.float32).at[:, :D_in].set(params["fc_b"])
    for a in (fc_w, fc_b):
        args.append(a)
        in_specs.append(_const_spec(a))

    out_tiles = pl.pallas_call(
        _make_fused_kernel(T, Bt, D_in, H, L),
        out_shape=jax.ShapeDtypeStruct((n_tiles, T * Bt, Dp), jnp.float32),
        grid_spec=pltpu.PrefetchScalarGridSpec(
            num_scalar_prefetch=0,
            grid=(n_tiles,),
            in_specs=in_specs,
            out_specs=pl.BlockSpec((None, T * Bt, Dp), lambda i: (i, 0, 0)),
            scratch_shapes=[
                pltpu.VMEM((T * Bt, G), jnp.float32),   # hoisted gate proj
                pltpu.VMEM((T * Bt, H), jnp.float32),   # per-step hidden seq
            ]),
        compiler_params=pltpu.CompilerParams(
            dimension_semantics=("parallel",),          # batch tiles independent
            # Resident footprint here is << 1 MiB; for production T/H re-derive
            # the budget against v7x's 64 MiB VMEM and T-chunk the hoisted
            # projection (pltpu.emit_pipeline) before shrinking H.
            vmem_limit_bytes=32 * 1024 * 1024),
    )(*args)

    out = (out_tiles.reshape(n_tiles, T, Bt, Dp)
           .transpose(1, 0, 2, 3)
           .reshape(T, Bp, Dp)[:, :B, :D_in])            # drop pad rows/cols
    return jnp.transpose(out, (1, 0, 2))                 # back to (B, T, D_in)


# ---------------------------------------------------------------------------
# Parameters (deterministic, PyTorch-style uniform(-1/sqrt(H), 1/sqrt(H)))
# ---------------------------------------------------------------------------
def init_params(key, input_dim, hidden_dim, num_layers):
    bound = 1.0 / math.sqrt(hidden_dim)

    def u(k, shape):
        return jax.random.uniform(k, shape, jnp.float32, -bound, bound)

    params = {"encoder": [], "decoder": []}
    for which, first_in in (("encoder", input_dim), ("decoder", hidden_dim)):
        for layer in range(num_layers):
            d_in = first_in if layer == 0 else hidden_dim
            key, k1, k2, k3, k4 = jax.random.split(key, 5)
            # stored pre-transposed: (D_in, 4H) and (H, 4H); gate order i,f,g,o
            w_ih_t = u(k1, (d_in, 4 * hidden_dim))
            w_hh_t = u(k2, (hidden_dim, 4 * hidden_dim))
            b = u(k3, (1, 4 * hidden_dim)) + u(k4, (1, 4 * hidden_dim))
            params[which].append((w_ih_t, w_hh_t, b))
    key, k1, k2 = jax.random.split(key, 3)
    params["fc_w_t"] = u(k1, (hidden_dim, input_dim))
    params["fc_b"] = u(k2, (1, input_dim))
    return params


# ---------------------------------------------------------------------------
# Pure-JAX reference (matmul_dtype=float32 -> PyTorch semantics;
#                     matmul_dtype=bfloat16 -> mirrors the kernel's MXU inputs)
# ---------------------------------------------------------------------------
def _lstm_layer_ref(x_tm, w_ih_t, w_hh_t, b, matmul_dtype):
    T, B, _ = x_tm.shape
    H = w_hh_t.shape[0]
    w_ih_c = w_ih_t.astype(matmul_dtype)

    def step(carry, x_t):
        h, c = carry
        gates = (jnp.dot(x_t.astype(matmul_dtype), w_ih_c,
                         preferred_element_type=jnp.float32,
                         precision=jax.lax.Precision.HIGHEST)
                 + jnp.dot(h, w_hh_t, preferred_element_type=jnp.float32,
                           precision=jax.lax.Precision.HIGHEST)
                 + b)
        i_g = jax.nn.sigmoid(gates[:, :H])
        f_g = jax.nn.sigmoid(gates[:, H:2 * H])
        g_g = jnp.tanh(gates[:, 2 * H:3 * H])
        o_g = jax.nn.sigmoid(gates[:, 3 * H:])
        c = f_g * c + i_g * g_g
        h = o_g * jnp.tanh(c)
        return (h, c), h

    init = (jnp.zeros((B, H), jnp.float32), jnp.zeros((B, H), jnp.float32))
    _, ys = jax.lax.scan(step, init, x_tm)
    return ys


def lstm_autoencoder_ref(params, x, matmul_dtype=jnp.float32):
    B, T, D_in = x.shape
    H = params["fc_w_t"].shape[0]
    h_seq = jnp.transpose(x.astype(jnp.float32), (1, 0, 2))
    for (w_ih_t, w_hh_t, b) in params["encoder"]:
        h_seq = _lstm_layer_ref(h_seq, w_ih_t, w_hh_t, b, matmul_dtype)
    h_seq = jnp.broadcast_to(h_seq[-1][None], (T, B, H))
    for (w_ih_t, w_hh_t, b) in params["decoder"]:
        h_seq = _lstm_layer_ref(h_seq, w_ih_t, w_hh_t, b, matmul_dtype)
    out = (jnp.dot(h_seq.reshape(T * B, H).astype(matmul_dtype),
                   params["fc_w_t"].astype(matmul_dtype),
                   preferred_element_type=jnp.float32,
                   precision=jax.lax.Precision.HIGHEST)
           + params["fc_b"])
    return out.reshape(T, B, D_in).transpose(1, 0, 2)


# ---------------------------------------------------------------------------
if __name__ == "__main__":
    B, T, INPUT_DIM, HIDDEN_DIM, NUM_LAYERS = 2, 8, 16, 32, 2

    key = jax.random.PRNGKey(0)
    key, pkey, xkey = jax.random.split(key, 3)
    params = init_params(pkey, INPUT_DIM, HIDDEN_DIM, NUM_LAYERS)
    x = jax.random.normal(xkey, (B, T, INPUT_DIM), jnp.float32)

    fwd = jax.jit(functools.partial(lstm_autoencoder_forward, params))
    out = jax.block_until_ready(fwd(x))
    assert out.shape == (B, T, INPUT_DIM), out.shape

    # Tight check vs a reference that mirrors the kernel's bf16 MXU inputs
    # (guards kernel-logic regressions without bf16 noise masking them).
    ref_mixed = lstm_autoencoder_ref(params, x, jnp.bfloat16)
    err_mixed = float(jnp.max(jnp.abs(out - ref_mixed)))
    assert err_mixed < 5e-3, err_mixed

    # Semantic check vs the pure-f32 PyTorch-equivalent reference (bf16 inputs
    # on the hoisted projections contribute a few 1e-3 of absolute error).
    ref_f32 = lstm_autoencoder_ref(params, x, jnp.float32)
    err_f32 = float(jnp.max(jnp.abs(out - ref_f32)))
    assert jnp.allclose(out, ref_f32, atol=2e-2, rtol=2e-2), err_f32

    print("KERNEL_OK")
</pallas_src>

<mosaic_0001>
module attributes {stable_mosaic.version = 11 : i64} {
  func.func @kernel(%arg0: i32, %arg1: memref<1x64x16xf32, #tpu.memory_space<vmem>>, %arg2: memref<16x128xbf16, #tpu.memory_space<vmem>>, %arg3: memref<32x128xf32, #tpu.memory_space<vmem>>, %arg4: memref<1x128xf32, #tpu.memory_space<vmem>>, %arg5: memref<32x128xbf16, #tpu.memory_space<vmem>>, %arg6: memref<32x128xf32, #tpu.memory_space<vmem>>, %arg7: memref<1x128xf32, #tpu.memory_space<vmem>>, %arg8: memref<32x128xbf16, #tpu.memory_space<vmem>>, %arg9: memref<32x128xf32, #tpu.memory_space<vmem>>, %arg10: memref<1x128xf32, #tpu.memory_space<vmem>>, %arg11: memref<32x128xbf16, #tpu.memory_space<vmem>>, %arg12: memref<32x128xf32, #tpu.memory_space<vmem>>, %arg13: memref<1x128xf32, #tpu.memory_space<vmem>>, %arg14: memref<32x128xbf16, #tpu.memory_space<vmem>>, %arg15: memref<1x128xf32, #tpu.memory_space<vmem>>, %arg16: memref<1x64x128xf32, #tpu.memory_space<vmem>>, %arg17: memref<64x128xf32, #tpu.memory_space<vmem>>, %arg18: memref<64x32xf32, #tpu.memory_space<vmem>>) attributes {dimension_semantics = [#tpu.dimension_semantics<parallel>], iteration_bounds = array<i64: 1>, scalar_prefetch = 0 : i64, scratch_operands = 2 : i64, tpu.core_type = #tpu.core_type<tc>, window_params = [{transform_indices = @transform_0, window_bounds = array<i64: 1, 64, 16>}, {pipeline_mode = #tpu.pipeline_mode<synchronous>, transform_indices = @transform_1, window_bounds = array<i64: 16, 128>}, {pipeline_mode = #tpu.pipeline_mode<synchronous>, transform_indices = @transform_2, window_bounds = array<i64: 32, 128>}, {pipeline_mode = #tpu.pipeline_mode<synchronous>, transform_indices = @transform_3, window_bounds = array<i64: 1, 128>}, {pipeline_mode = #tpu.pipeline_mode<synchronous>, transform_indices = @transform_4, window_bounds = array<i64: 32, 128>}, {pipeline_mode = #tpu.pipeline_mode<synchronous>, transform_indices = @transform_5, window_bounds = array<i64: 32, 128>}, {pipeline_mode = #tpu.pipeline_mode<synchronous>, transform_indices = @transform_6, window_bounds = array<i64: 1, 128>}, {pipeline_mode = #tpu.pipeline_mode<synchronous>, transform_indices = @transform_7, window_bounds = array<i64: 32, 128>}, {pipeline_mode = #tpu.pipeline_mode<synchronous>, transform_indices = @transform_8, window_bounds = array<i64: 32, 128>}, {pipeline_mode = #tpu.pipeline_mode<synchronous>, transform_indices = @transform_9, window_bounds = array<i64: 1, 128>}, {pipeline_mode = #tpu.pipeline_mode<synchronous>, transform_indices = @transform_10, window_bounds = array<i64: 32, 128>}, {pipeline_mode = #tpu.pipeline_mode<synchronous>, transform_indices = @transform_11, window_bounds = array<i64: 32, 128>}, {pipeline_mode = #tpu.pipeline_mode<synchronous>, transform_indices = @transform_12, window_bounds = array<i64: 1, 128>}, {pipeline_mode = #tpu.pipeline_mode<synchronous>, transform_indices = @transform_13, window_bounds = array<i64: 32, 128>}, {pipeline_mode = #tpu.pipeline_mode<synchronous>, transform_indices = @transform_14, window_bounds = array<i64: 1, 128>}, {transform_indices = @transform_15, window_bounds = array<i64: 1, 64, 128>}]} {
    %c0 = arith.constant 0 : index
    %c0_0 = arith.constant 0 : index
    %c0_1 = arith.constant 0 : index
    %0 = vector.load %arg1[%c0, %c0_0, %c0_1] : memref<1x64x16xf32, #tpu.memory_space<vmem>>, vector<1x64x16xf32>
    %1 = vector.shape_cast %0 : vector<1x64x16xf32> to vector<64x16xf32>
    %2 = arith.truncf %1 : vector<64x16xf32> to vector<64x16xbf16>
    %c0_2 = arith.constant 0 : index
    %c0_3 = arith.constant 0 : index
    %3 = vector.load %arg2[%c0_2, %c0_3] : memref<16x128xbf16, #tpu.memory_space<vmem>>, vector<16x128xbf16>
    %cst = arith.constant dense<0.000000e+00> : vector<64x128xf32>
    %4 = tpu.matmul %2, %3, %cst {dimension_numbers = #tpu.dot_dimension_numbers<[1], [0], [0], [1], [0, 0, 1, 1], [], []>} : vector<64x16xbf16>, vector<16x128xbf16>, vector<64x128xf32> -> vector<64x128xf32>
    %c0_4 = arith.constant 0 : index
    %c0_5 = arith.constant 0 : index
    %5 = vector.load %arg4[%c0_4, %c0_5] : memref<1x128xf32, #tpu.memory_space<vmem>>, vector<1x128xf32>
    %6 = vector.broadcast %5 : vector<1x128xf32> to vector<64x128xf32>
    %7 = arith.addf %4, %6 : vector<64x128xf32>
    %c0_6 = arith.constant 0 : index
    %c0_7 = arith.constant 0 : index
    %8 = vector.load %arg17[%c0_6, %c0_7] : memref<64x128xf32, #tpu.memory_space<vmem>>, vector<64x128xf32>
    tpu.vector_store %arg17[%c0_6, %c0_7], %7 {strides = array<i32>} : memref<64x128xf32, #tpu.memory_space<vmem>>, vector<64x128xf32>,
    %c0_8 = arith.constant 0 : index
    %c0_9 = arith.constant 0 : index
    %9 = vector.load %arg3[%c0_8, %c0_9] : memref<32x128xf32, #tpu.memory_space<vmem>>, vector<32x128xf32>
    %cst_10 = arith.constant 0.000000e+00 : f32
    %10 = vector.broadcast %cst_10 : f32 to vector<8x32xf32>
    %c0_i32 = arith.constant 0 : i32
    %c8_i32 = arith.constant 8 : i32
    %11 = arith.muli %c0_i32, %c8_i32 : i32
    %12 = tpu.assume_multiple %11, 8 : i32
    %13 = arith.index_cast %12 : i32 to index
    %c0_11 = arith.constant 0 : index
    %14 = vector.load %arg17[%13, %c0_11] : memref<64x128xf32, #tpu.memory_space<vmem>>, vector<8x128xf32>
    %cst_12 = arith.constant dense<0.000000e+00> : vector<8x128xf32>
    %15 = tpu.matmul %10, %9, %cst_12 {dimension_numbers = #tpu.dot_dimension_numbers<[1], [0], [0], [1], [0, 0, 1, 1], [], []>} : vector<8x32xf32>, vector<32x128xf32>, vector<8x128xf32> -> vector<8x128xf32>
    %16 = arith.addf %14, %15 : vector<8x128xf32>
    %17 = arith.negf %16 : vector<8x128xf32>
    %18 = math.exp %17 : vector<8x128xf32>
    %cst_13 = arith.constant 1.000000e+00 : f32
    %19 = vector.broadcast %cst_13 : f32 to vector<8x128xf32>
    %20 = arith.addf %19, %18 : vector<8x128xf32>
    %21 = arith.divf %19, %20 : vector<8x128xf32>
    %22 = math.tanh %16 : vector<8x128xf32>
    %23 = vector.extract_strided_slice %21 {offsets = [0, 32], sizes = [8, 32], strides = [1, 1]} : vector<8x128xf32> to vector<8x32xf32>
    %24 = arith.mulf %23, %10 : vector<8x32xf32>
    %25 = vector.extract_strided_slice %21 {offsets = [0, 0], sizes = [8, 32], strides = [1, 1]} : vector<8x128xf32> to vector<8x32xf32>
    %26 = vector.extract_strided_slice %22 {offsets = [0, 64], sizes = [8, 32], strides = [1, 1]} : vector<8x128xf32> to vector<8x32xf32>
    %27 = arith.mulf %25, %26 : vector<8x32xf32>
    %28 = arith.addf %24, %27 : vector<8x32xf32>
    %29 = vector.extract_strided_slice %21 {offsets = [0, 96], sizes = [8, 32], strides = [1, 1]} : vector<8x128xf32> to vector<8x32xf32>
    %30 = math.tanh %28 : vector<8x32xf32>
    %31 = arith.mulf %29, %30 : vector<8x32xf32>
    %c8_i32_14 = arith.constant 8 : i32
    %32 = arith.muli %c0_i32, %c8_i32_14 : i32
    %33 = tpu.assume_multiple %32, 8 : i32
    %34 = arith.index_cast %33 : i32 to index
    %c0_15 = arith.constant 0 : index
    %35 = vector.load %arg18[%34, %c0_15] : memref<64x32xf32, #tpu.memory_space<vmem>>, vector<8x32xf32>
    tpu.vector_store %arg18[%34, %c0_15], %31 {strides = array<i32>} : memref<64x32xf32, #tpu.memory_space<vmem>>, vector<8x32xf32>,
    %c1_i32 = arith.constant 1 : i32
    %c8_i32_16 = arith.constant 8 : i32
    %36 = arith.muli %c1_i32, %c8_i32_16 : i32
    %37 = tpu.assume_multiple %36, 8 : i32
    %38 = arith.index_cast %37 : i32 to index
    %c0_17 = arith.constant 0 : index
    %39 = vector.load %arg17[%38, %c0_17] : memref<64x128xf32, #tpu.memory_space<vmem>>, vector<8x128xf32>
    %cst_18 = arith.constant dense<0.000000e+00> : vector<8x128xf32>
    %40 = tpu.matmul %31, %9, %cst_18 {dimension_numbers = #tpu.dot_dimension_numbers<[1], [0], [0], [1], [0, 0, 1, 1], [], []>} : vector<8x32xf32>, vector<32x128xf32>, vector<8x128xf32> -> vector<8x128xf32>
    %41 = arith.addf %39, %40 : vector<8x128xf32>
    %42 = arith.negf %41 : vector<8x128xf32>
    %43 = math.exp %42 : vector<8x128xf32>
    %cst_19 = arith.constant 1.000000e+00 : f32
    %44 = vector.broadcast %cst_19 : f32 to vector<8x128xf32>
    %45 = arith.addf %44, %43 : vector<8x128xf32>
    %46 = arith.divf %44, %45 : vector<8x128xf32>
    %47 = math.tanh %41 : vector<8x128xf32>
    %48 = vector.extract_strided_slice %46 {offsets = [0, 32], sizes = [8, 32], strides = [1, 1]} : vector<8x128xf32> to vector<8x32xf32>
    %49 = arith.mulf %48, %28 : vector<8x32xf32>
    %50 = vector.extract_strided_slice %46 {offsets = [0, 0], sizes = [8, 32], strides = [1, 1]} : vector<8x128xf32> to vector<8x32xf32>
    %51 = vector.extract_strided_slice %47 {offsets = [0, 64], sizes = [8, 32], strides = [1, 1]} : vector<8x128xf32> to vector<8x32xf32>
    %52 = arith.mulf %50, %51 : vector<8x32xf32>
    %53 = arith.addf %49, %52 : vector<8x32xf32>
    %54 = vector.extract_strided_slice %46 {offsets = [0, 96], sizes = [8, 32], strides = [1, 1]} : vector<8x128xf32> to vector<8x32xf32>
    %55 = math.tanh %53 : vector<8x32xf32>
    %56 = arith.mulf %54, %55 : vector<8x32xf32>
    %c8_i32_20 = arith.constant 8 : i32
    %57 = arith.muli %c1_i32, %c8_i32_20 : i32
    %58 = tpu.assume_multiple %57, 8 : i32
    %59 = arith.index_cast %58 : i32 to index
    %c0_21 = arith.constant 0 : index
    %60 = vector.load %arg18[%59, %c0_21] : memref<64x32xf32, #tpu.memory_space<vmem>>, vector<8x32xf32>
    tpu.vector_store %arg18[%59, %c0_21], %56 {strides = array<i32>} : memref<64x32xf32, #tpu.memory_space<vmem>>, vector<8x32xf32>,
    %c2_i32 = arith.constant 2 : i32
    %c8_i32_22 = arith.constant 8 : i32
    %61 = arith.muli %c2_i32, %c8_i32_22 : i32
    %62 = tpu.assume_multiple %61, 8 : i32
    %63 = arith.index_cast %62 : i32 to index
    %c0_23 = arith.constant 0 : index
    %64 = vector.load %arg17[%63, %c0_23] : memref<64x128xf32, #tpu.memory_space<vmem>>, vector<8x128xf32>
    %cst_24 = arith.constant dense<0.000000e+00> : vector<8x128xf32>
    %65 = tpu.matmul %56, %9, %cst_24 {dimension_numbers = #tpu.dot_dimension_numbers<[1], [0], [0], [1], [0, 0, 1, 1], [], []>} : vector<8x32xf32>, vector<32x128xf32>, vector<8x128xf32> -> vector<8x128xf32>
    %66 = arith.addf %64, %65 : vector<8x128xf32>
    %67 = arith.negf %66 : vector<8x128xf32>
    %68 = math.exp %67 : vector<8x128xf32>
    %cst_25 = arith.constant 1.000000e+00 : f32
    %69 = vector.broadcast %cst_25 : f32 to vector<8x128xf32>
    %70 = arith.addf %69, %68 : vector<8x128xf32>
    %71 = arith.divf %69, %70 : vector<8x128xf32>
    %72 = math.tanh %66 : vector<8x128xf32>
    %73 = vector.extract_strided_slice %71 {offsets = [0, 32], sizes = [8, 32], strides = [1, 1]} : vector<8x128xf32> to vector<8x32xf32>
    %74 = arith.mulf %73, %53 : vector<8x32xf32>
    %75 = vector.extract_strided_slice %71 {offsets = [0, 0], sizes = [8, 32], strides = [1, 1]} : vector<8x128xf32> to vector<8x32xf32>
    %76 = vector.extract_strided_slice %72 {offsets = [0, 64], sizes = [8, 32], strides = [1, 1]} : vector<8x128xf32> to vector<8x32xf32>
    %77 = arith.mulf %75, %76 : vector<8x32xf32>
    %78 = arith.addf %74, %77 : vector<8x32xf32>
    %79 = vector.extract_strided_slice %71 {offsets = [0, 96], sizes = [8, 32], strides = [1, 1]} : vector<8x128xf32> to vector<8x32xf32>
    %80 = math.tanh %78 : vector<8x32xf32>
    %81 = arith.mulf %79, %80 : vector<8x32xf32>
    %c8_i32_26 = arith.constant 8 : i32
    %82 = arith.muli %c2_i32, %c8_i32_26 : i32
    %83 = tpu.assume_multiple %82, 8 : i32
    %84 = arith.index_cast %83 : i32 to index
    %c0_27 = arith.constant 0 : index
    %85 = vector.load %arg18[%84, %c0_27] : memref<64x32xf32, #tpu.memory_space<vmem>>, vector<8x32xf32>
    tpu.vector_store %arg18[%84, %c0_27], %81 {strides = array<i32>} : memref<64x32xf32, #tpu.memory_space<vmem>>, vector<8x32xf32>,
    %c3_i32 = arith.constant 3 : i32
    %c8_i32_28 = arith.constant 8 : i32
    %86 = arith.muli %c3_i32, %c8_i32_28 : i32
    %87 = tpu.assume_multiple %86, 8 : i32
    %88 = arith.index_cast %87 : i32 to index
    %c0_29 = arith.constant 0 : index
    %89 = vector.load %arg17[%88, %c0_29] : memref<64x128xf32, #tpu.memory_space<vmem>>, vector<8x128xf32>
    %cst_30 = arith.constant dense<0.000000e+00> : vector<8x128xf32>
    %90 = tpu.matmul %81, %9, %cst_30 {dimension_numbers = #tpu.dot_dimension_numbers<[1], [0], [0], [1], [0, 0, 1, 1], [], []>} : vector<8x32xf32>, vector<32x128xf32>, vector<8x128xf32> -> vector<8x128xf32>
    %91 = arith.addf %89, %90 : vector<8x128xf32>
    %92 = arith.negf %91 : vector<8x128xf32>
    %93 = math.exp %92 : vector<8x128xf32>
    %cst_31 = arith.constant 1.000000e+00 : f32
    %94 = vector.broadcast %cst_31 : f32 to vector<8x128xf32>
    %95 = arith.addf %94, %93 : vector<8x128xf32>
    %96 = arith.divf %94, %95 : vector<8x128xf32>
    %97 = math.tanh %91 : vector<8x128xf32>
    %98 = vector.extract_strided_slice %96 {offsets = [0, 32], sizes = [8, 32], strides = [1, 1]} : vector<8x128xf32> to vector<8x32xf32>
    %99 = arith.mulf %98, %78 : vector<8x32xf32>
    %100 = vector.extract_strided_slice %96 {offsets = [0, 0], sizes = [8, 32], strides = [1, 1]} : vector<8x128xf32> to vector<8x32xf32>
    %101 = vector.extract_strided_slice %97 {offsets = [0, 64], sizes = [8, 32], strides = [1, 1]} : vector<8x128xf32> to vector<8x32xf32>
    %102 = arith.mulf %100, %101 : vector<8x32xf32>
    %103 = arith.addf %99, %102 : vector<8x32xf32>
    %104 = vector.extract_strided_slice %96 {offsets = [0, 96], sizes = [8, 32], strides = [1, 1]} : vector<8x128xf32> to vector<8x32xf32>
    %105 = math.tanh %103 : vector<8x32xf32>
    %106 = arith.mulf %104, %105 : vector<8x32xf32>
    %c8_i32_32 = arith.constant 8 : i32
    %107 = arith.muli %c3_i32, %c8_i32_32 : i32
    %108 = tpu.assume_multiple %107, 8 : i32
    %109 = arith.index_cast %108 : i32 to index
    %c0_33 = arith.constant 0 : index
    %110 = vector.load %arg18[%109, %c0_33] : memref<64x32xf32, #tpu.memory_space<vmem>>, vector<8x32xf32>
    tpu.vector_store %arg18[%109, %c0_33], %106 {strides = array<i32>} : memref<64x32xf32, #tpu.memory_space<vmem>>, vector<8x32xf32>,
    %c4_i32 = arith.constant 4 : i32
    %c8_i32_34 = arith.constant 8 : i32
    %111 = arith.muli %c4_i32, %c8_i32_34 : i32
    %112 = tpu.assume_multiple %111, 8 : i32
    %113 = arith.index_cast %112 : i32 to index
    %c0_35 = arith.constant 0 : index
    %114 = vector.load %arg17[%113, %c0_35] : memref<64x128xf32, #tpu.memory_space<vmem>>, vector<8x128xf32>
    %cst_36 = arith.constant dense<0.000000e+00> : vector<8x128xf32>
    %115 = tpu.matmul %106, %9, %cst_36 {dimension_numbers = #tpu.dot_dimension_numbers<[1], [0], [0], [1], [0, 0, 1, 1], [], []>} : vector<8x32xf32>, vector<32x128xf32>, vector<8x128xf32> -> vector<8x128xf32>
    %116 = arith.addf %114, %115 : vector<8x128xf32>
    %117 = arith.negf %116 : vector<8x128xf32>
    %118 = math.exp %117 : vector<8x128xf32>
    %cst_37 = arith.constant 1.000000e+00 : f32
    %119 = vector.broadcast %cst_37 : f32 to vector<8x128xf32>
    %120 = arith.addf %119, %118 : vector<8x128xf32>
    %121 = arith.divf %119, %120 : vector<8x128xf32>
    %122 = math.tanh %116 : vector<8x128xf32>
    %123 = vector.extract_strided_slice %121 {offsets = [0, 32], sizes = [8, 32], strides = [1, 1]} : vector<8x128xf32> to vector<8x32xf32>
    %124 = arith.mulf %123, %103 : vector<8x32xf32>
    %125 = vector.extract_strided_slice %121 {offsets = [0, 0], sizes = [8, 32], strides = [1, 1]} : vector<8x128xf32> to vector<8x32xf32>
    %126 = vector.extract_strided_slice %122 {offsets = [0, 64], sizes = [8, 32], strides = [1, 1]} : vector<8x128xf32> to vector<8x32xf32>
    %127 = arith.mulf %125, %126 : vector<8x32xf32>
    %128 = arith.addf %124, %127 : vector<8x32xf32>
    %129 = vector.extract_strided_slice %121 {offsets = [0, 96], sizes = [8, 32], strides = [1, 1]} : vector<8x128xf32> to vector<8x32xf32>
    %130 = math.tanh %128 : vector<8x32xf32>
    %131 = arith.mulf %129, %130 : vector<8x32xf32>
    %c8_i32_38 = arith.constant 8 : i32
    %132 = arith.muli %c4_i32, %c8_i32_38 : i32
    %133 = tpu.assume_multiple %132, 8 : i32
    %134 = arith.index_cast %133 : i32 to index
    %c0_39 = arith.constant 0 : index
    %135 = vector.load %arg18[%134, %c0_39] : memref<64x32xf32, #tpu.memory_space<vmem>>, vector<8x32xf32>
    tpu.vector_store %arg18[%134, %c0_39], %131 {strides = array<i32>} : memref<64x32xf32, #tpu.memory_space<vmem>>, vector<8x32xf32>,
    %c5_i32 = arith.constant 5 : i32
    %c8_i32_40 = arith.constant 8 : i32
    %136 = arith.muli %c5_i32, %c8_i32_40 : i32
    %137 = tpu.assume_multiple %136, 8 : i32
    %138 = arith.index_cast %137 : i32 to index
    %c0_41 = arith.constant 0 : index
    %139 = vector.load %arg17[%138, %c0_41] : memref<64x128xf32, #tpu.memory_space<vmem>>, vector<8x128xf32>
    %cst_42 = arith.constant dense<0.000000e+00> : vector<8x128xf32>
    %140 = tpu.matmul %131, %9, %cst_42 {dimension_numbers = #tpu.dot_dimension_numbers<[1], [0], [0], [1], [0, 0, 1, 1], [], []>} : vector<8x32xf32>, vector<32x128xf32>, vector<8x128xf32> -> vector<8x128xf32>
    %141 = arith.addf %139, %140 : vector<8x128xf32>
    %142 = arith.negf %141 : vector<8x128xf32>
    %143 = math.exp %142 : vector<8x128xf32>
    %cst_43 = arith.constant 1.000000e+00 : f32
    %144 = vector.broadcast %cst_43 : f32 to vector<8x128xf32>
    %145 = arith.addf %144, %143 : vector<8x128xf32>
    %146 = arith.divf %144, %145 : vector<8x128xf32>
    %147 = math.tanh %141 : vector<8x128xf32>
    %148 = vector.extract_strided_slice %146 {offsets = [0, 32], sizes = [8, 32], strides = [1, 1]} : vector<8x128xf32> to vector<8x32xf32>
    %149 = arith.mulf %148, %128 : vector<8x32xf32>
    %150 = vector.extract_strided_slice %146 {offsets = [0, 0], sizes = [8, 32], strides = [1, 1]} : vector<8x128xf32> to vector<8x32xf32>
    %151 = vector.extract_strided_slice %147 {offsets = [0, 64], sizes = [8, 32], strides = [1, 1]} : vector<8x128xf32> to vector<8x32xf32>
    %152 = arith.mulf %150, %151 : vector<8x32xf32>
    %153 = arith.addf %149, %152 : vector<8x32xf32>
    %154 = vector.extract_strided_slice %146 {offsets = [0, 96], sizes = [8, 32], strides = [1, 1]} : vector<8x128xf32> to vector<8x32xf32>
    %155 = math.tanh %153 : vector<8x32xf32>
    %156 = arith.mulf %154, %155 : vector<8x32xf32>
    %c8_i32_44 = arith.constant 8 : i32
    %157 = arith.muli %c5_i32, %c8_i32_44 : i32
    %158 = tpu.assume_multiple %157, 8 : i32
    %159 = arith.index_cast %158 : i32 to index
    %c0_45 = arith.constant 0 : index
    %160 = vector.load %arg18[%159, %c0_45] : memref<64x32xf32, #tpu.memory_space<vmem>>, vector<8x32xf32>
    tpu.vector_store %arg18[%159, %c0_45], %156 {strides = array<i32>} : memref<64x32xf32, #tpu.memory_space<vmem>>, vector<8x32xf32>,
    %c6_i32 = arith.constant 6 : i32
    %c8_i32_46 = arith.constant 8 : i32
    %161 = arith.muli %c6_i32, %c8_i32_46 : i32
    %162 = tpu.assume_multiple %161, 8 : i32
    %163 = arith.index_cast %162 : i32 to index
    %c0_47 = arith.constant 0 : index
    %164 = vector.load %arg17[%163, %c0_47] : memref<64x128xf32, #tpu.memory_space<vmem>>, vector<8x128xf32>
    %cst_48 = arith.constant dense<0.000000e+00> : vector<8x128xf32>
    %165 = tpu.matmul %156, %9, %cst_48 {dimension_numbers = #tpu.dot_dimension_numbers<[1], [0], [0], [1], [0, 0, 1, 1], [], []>} : vector<8x32xf32>, vector<32x128xf32>, vector<8x128xf32> -> vector<8x128xf32>
    %166 = arith.addf %164, %165 : vector<8x128xf32>
    %167 = arith.negf %166 : vector<8x128xf32>
    %168 = math.exp %167 : vector<8x128xf32>
    %cst_49 = arith.constant 1.000000e+00 : f32
    %169 = vector.broadcast %cst_49 : f32 to vector<8x128xf32>
    %170 = arith.addf %169, %168 : vector<8x128xf32>
    %171 = arith.divf %169, %170 : vector<8x128xf32>
    %172 = math.tanh %166 : vector<8x128xf32>
    %173 = vector.extract_strided_slice %171 {offsets = [0, 32], sizes = [8, 32], strides = [1, 1]} : vector<8x128xf32> to vector<8x32xf32>
    %174 = arith.mulf %173, %153 : vector<8x32xf32>
    %175 = vector.extract_strided_slice %171 {offsets = [0, 0], sizes = [8, 32], strides = [1, 1]} : vector<8x128xf32> to vector<8x32xf32>
    %176 = vector.extract_strided_slice %172 {offsets = [0, 64], sizes = [8, 32], strides = [1, 1]} : vector<8x128xf32> to vector<8x32xf32>
    %177 = arith.mulf %175, %176 : vector<8x32xf32>
    %178 = arith.addf %174, %177 : vector<8x32xf32>
    %179 = vector.extract_strided_slice %171 {offsets = [0, 96], sizes = [8, 32], strides = [1, 1]} : vector<8x128xf32> to vector<8x32xf32>
    %180 = math.tanh %178 : vector<8x32xf32>
    %181 = arith.mulf %179, %180 : vector<8x32xf32>
    %c8_i32_50 = arith.constant 8 : i32
    %182 = arith.muli %c6_i32, %c8_i32_50 : i32
    %183 = tpu.assume_multiple %182, 8 : i32
    %184 = arith.index_cast %183 : i32 to index
    %c0_51 = arith.constant 0 : index
    %185 = vector.load %arg18[%184, %c0_51] : memref<64x32xf32, #tpu.memory_space<vmem>>, vector<8x32xf32>
    tpu.vector_store %arg18[%184, %c0_51], %181 {strides = array<i32>} : memref<64x32xf32, #tpu.memory_space<vmem>>, vector<8x32xf32>,
    %c7_i32 = arith.constant 7 : i32
    %c8_i32_52 = arith.constant 8 : i32
    %186 = arith.muli %c7_i32, %c8_i32_52 : i32
    %187 = tpu.assume_multiple %186, 8 : i32
    %188 = arith.index_cast %187 : i32 to index
    %c0_53 = arith.constant 0 : index
    %189 = vector.load %arg17[%188, %c0_53] : memref<64x128xf32, #tpu.memory_space<vmem>>, vector<8x128xf32>
    %cst_54 = arith.constant dense<0.000000e+00> : vector<8x128xf32>
    %190 = tpu.matmul %181, %9, %cst_54 {dimension_numbers = #tpu.dot_dimension_numbers<[1], [0], [0], [1], [0, 0, 1, 1], [], []>} : vector<8x32xf32>, vector<32x128xf32>, vector<8x128xf32> -> vector<8x128xf32>
    %191 = arith.addf %189, %190 : vector<8x128xf32>
    %192 = arith.negf %191 : vector<8x128xf32>
    %193 = math.exp %192 : vector<8x128xf32>
    %cst_55 = arith.constant 1.000000e+00 : f32
    %194 = vector.broadcast %cst_55 : f32 to vector<8x128xf32>
    %195 = arith.addf %194, %193 : vector<8x128xf32>
    %196 = arith.divf %194, %195 : vector<8x128xf32>
    %197 = math.tanh %191 : vector<8x128xf32>
    %198 = vector.extract_strided_slice %196 {offsets = [0, 32], sizes = [8, 32], strides = [1, 1]} : vector<8x128xf32> to vector<8x32xf32>
    %199 = arith.mulf %198, %178 : vector<8x32xf32>
    %200 = vector.extract_strided_slice %196 {offsets = [0, 0], sizes = [8, 32], strides = [1, 1]} : vector<8x128xf32> to vector<8x32xf32>
    %201 = vector.extract_strided_slice %197 {offsets = [0, 64], sizes = [8, 32], strides = [1, 1]} : vector<8x128xf32> to vector<8x32xf32>
    %202 = arith.mulf %200, %201 : vector<8x32xf32>
    %203 = arith.addf %199, %202 : vector<8x32xf32>
    %204 = vector.extract_strided_slice %196 {offsets = [0, 96], sizes = [8, 32], strides = [1, 1]} : vector<8x128xf32> to vector<8x32xf32>
    %205 = math.tanh %203 : vector<8x32xf32>
    %206 = arith.mulf %204, %205 : vector<8x32xf32>
    %c8_i32_56 = arith.constant 8 : i32
    %207 = arith.muli %c7_i32, %c8_i32_56 : i32
    %208 = tpu.assume_multiple %207, 8 : i32
    %209 = arith.index_cast %208 : i32 to index
    %c0_57 = arith.constant 0 : index
    %210 = vector.load %arg18[%209, %c0_57] : memref<64x32xf32, #tpu.memory_space<vmem>>, vector<8x32xf32>
    tpu.vector_store %arg18[%209, %c0_57], %206 {strides = array<i32>} : memref<64x32xf32, #tpu.memory_space<vmem>>, vector<8x32xf32>,
    %c8_i32_58 = arith.constant 8 : i32
    %c0_59 = arith.constant 0 : index
    %c0_60 = arith.constant 0 : index
    %211 = vector.load %arg18[%c0_59, %c0_60] : memref<64x32xf32, #tpu.memory_space<vmem>>, vector<64x32xf32>
    %212 = arith.truncf %211 : vector<64x32xf32> to vector<64x32xbf16>
    %c0_61 = arith.constant 0 : index
    %c0_62 = arith.constant 0 : index
    %213 = vector.load %arg5[%c0_61, %c0_62] : memref<32x128xbf16, #tpu.memory_space<vmem>>, vector<32x128xbf16>
    %cst_63 = arith.constant dense<0.000000e+00> : vector<64x128xf32>
    %214 = tpu.matmul %212, %213, %cst_63 {dimension_numbers = #tpu.dot_dimension_numbers<[1], [0], [0], [1], [0, 0, 1, 1], [], []>} : vector<64x32xbf16>, vector<32x128xbf16>, vector<64x128xf32> -> vector<64x128xf32>
    %c0_64 = arith.constant 0 : index
    %c0_65 = arith.constant 0 : index
    %215 = vector.load %arg7[%c0_64, %c0_65] : memref<1x128xf32, #tpu.memory_space<vmem>>, vector<1x128xf32>
    %216 = vector.broadcast %215 : vector<1x128xf32> to vector<64x128xf32>
    %217 = arith.addf %214, %216 : vector<64x128xf32>
    %c0_66 = arith.constant 0 : index
    %c0_67 = arith.constant 0 : index
    %218 = vector.load %arg17[%c0_66, %c0_67] : memref<64x128xf32, #tpu.memory_space<vmem>>, vector<64x128xf32>
    tpu.vector_store %arg17[%c0_66, %c0_67], %217 {strides = array<i32>} : memref<64x128xf32, #tpu.memory_space<vmem>>, vector<64x128xf32>,
    %c0_68 = arith.constant 0 : index
    %c0_69 = arith.constant 0 : index
    %219 = vector.load %arg6[%c0_68, %c0_69] : memref<32x128xf32, #tpu.memory_space<vmem>>, vector<32x128xf32>
    %cst_70 = arith.constant 0.000000e+00 : f32
    %220 = vector.broadcast %cst_70 : f32 to vector<8x32xf32>
    %c0_i32_71 = arith.constant 0 : i32
    %c8_i32_72 = arith.constant 8 : i32
    %221 = arith.muli %c0_i32_71, %c8_i32_72 : i32
    %222 = tpu.assume_multiple %221, 8 : i32
    %223 = arith.index_cast %222 : i32 to index
    %c0_73 = arith.constant 0 : index
    %224 = vector.load %arg17[%223, %c0_73] : memref<64x128xf32, #tpu.memory_space<vmem>>, vector<8x128xf32>
    %cst_74 = arith.constant dense<0.000000e+00> : vector<8x128xf32>
    %225 = tpu.matmul %220, %219, %cst_74 {dimension_numbers = #tpu.dot_dimension_numbers<[1], [0], [0], [1], [0, 0, 1, 1], [], []>} : vector<8x32xf32>, vector<32x128xf32>, vector<8x128xf32> -> vector<8x128xf32>
    %226 = arith.addf %224, %225 : vector<8x128xf32>
    %227 = arith.negf %226 : vector<8x128xf32>
    %228 = math.exp %227 : vector<8x128xf32>
    %cst_75 = arith.constant 1.000000e+00 : f32
    %229 = vector.broadcast %cst_75 : f32 to vector<8x128xf32>
    %230 = arith.addf %229, %228 : vector<8x128xf32>
    %231 = arith.divf %229, %230 : vector<8x128xf32>
    %232 = math.tanh %226 : vector<8x128xf32>
    %233 = vector.extract_strided_slice %231 {offsets = [0, 32], sizes = [8, 32], strides = [1, 1]} : vector<8x128xf32> to vector<8x32xf32>
    %234 = arith.mulf %233, %220 : vector<8x32xf32>
    %235 = vector.extract_strided_slice %231 {offsets = [0, 0], sizes = [8, 32], strides = [1, 1]} : vector<8x128xf32> to vector<8x32xf32>
    %236 = vector.extract_strided_slice %232 {offsets = [0, 64], sizes = [8, 32], strides = [1, 1]} : vector<8x128xf32> to vector<8x32xf32>
    %237 = arith.mulf %235, %236 : vector<8x32xf32>
    %238 = arith.addf %234, %237 : vector<8x32xf32>
    %239 = vector.extract_strided_slice %231 {offsets = [0, 96], sizes = [8, 32], strides = [1, 1]} : vector<8x128xf32> to vector<8x32xf32>
    %240 = math.tanh %238 : vector<8x32xf32>
    %241 = arith.mulf %239, %240 : vector<8x32xf32>
    %c8_i32_76 = arith.constant 8 : i32
    %242 = arith.muli %c0_i32_71, %c8_i32_76 : i32
    %243 = tpu.assume_multiple %242, 8 : i32
    %244 = arith.index_cast %243 : i32 to index
    %c0_77 = arith.constant 0 : index
    %245 = vector.load %arg18[%244, %c0_77] : memref<64x32xf32, #tpu.memory_space<vmem>>, vector<8x32xf32>
    tpu.vector_store %arg18[%244, %c0_77], %241 {strides = array<i32>} : memref<64x32xf32, #tpu.memory_space<vmem>>, vector<8x32xf32>,
    %c1_i32_78 = arith.constant 1 : i32
    %c8_i32_79 = arith.constant 8 : i32
    %246 = arith.muli %c1_i32_78, %c8_i32_79 : i32
    %247 = tpu.assume_multiple %246, 8 : i32
    %248 = arith.index_cast %247 : i32 to index
    %c0_80 = arith.constant 0 : index
    %249 = vector.load %arg17[%248, %c0_80] : memref<64x128xf32, #tpu.memory_space<vmem>>, vector<8x128xf32>
    %cst_81 = arith.constant dense<0.000000e+00> : vector<8x128xf32>
    %250 = tpu.matmul %241, %219, %cst_81 {dimension_numbers = #tpu.dot_dimension_numbers<[1], [0], [0], [1], [0, 0, 1, 1], [], []>} : vector<8x32xf32>, vector<32x128xf32>, vector<8x128xf32> -> vector<8x128xf32>
    %251 = arith.addf %249, %250 : vector<8x128xf32>
    %252 = arith.negf %251 : vector<8x128xf32>
    %253 = math.exp %252 : vector<8x128xf32>
    %cst_82 = arith.constant 1.000000e+00 : f32
    %254 = vector.broadcast %cst_82 : f32 to vector<8x128xf32>
    %255 = arith.addf %254, %253 : vector<8x128xf32>
    %256 = arith.divf %254, %255 : vector<8x128xf32>
    %257 = math.tanh %251 : vector<8x128xf32>
    %258 = vector.extract_strided_slice %256 {offsets = [0, 32], sizes = [8, 32], strides = [1, 1]} : vector<8x128xf32> to vector<8x32xf32>
    %259 = arith.mulf %258, %238 : vector<8x32xf32>
    %260 = vector.extract_strided_slice %256 {offsets = [0, 0], sizes = [8, 32], strides = [1, 1]} : vector<8x128xf32> to vector<8x32xf32>
    %261 = vector.extract_strided_slice %257 {offsets = [0, 64], sizes = [8, 32], strides = [1, 1]} : vector<8x128xf32> to vector<8x32xf32>
    %262 = arith.mulf %260, %261 : vector<8x32xf32>
    %263 = arith.addf %259, %262 : vector<8x32xf32>
    %264 = vector.extract_strided_slice %256 {offsets = [0, 96], sizes = [8, 32], strides = [1, 1]} : vector<8x128xf32> to vector<8x32xf32>
    %265 = math.tanh %263 : vector<8x32xf32>
    %266 = arith.mulf %264, %265 : vector<8x32xf32>
    %c8_i32_83 = arith.constant 8 : i32
    %267 = arith.muli %c1_i32_78, %c8_i32_83 : i32
    %268 = tpu.assume_multiple %267, 8 : i32
    %269 = arith.index_cast %268 : i32 to index
    %c0_84 = arith.constant 0 : index
    %270 = vector.load %arg18[%269, %c0_84] : memref<64x32xf32, #tpu.memory_space<vmem>>, vector<8x32xf32>
    tpu.vector_store %arg18[%269, %c0_84], %266 {strides = array<i32>} : memref<64x32xf32, #tpu.memory_space<vmem>>, vector<8x32xf32>,
    %c2_i32_85 = arith.constant 2 : i32
    %c8_i32_86 = arith.constant 8 : i32
    %271 = arith.muli %c2_i32_85, %c8_i32_86 : i32
    %272 = tpu.assume_multiple %271, 8 : i32
    %273 = arith.index_cast %272 : i32 to index
    %c0_87 = arith.constant 0 : index
    %274 = vector.load %arg17[%273, %c0_87] : memref<64x128xf32, #tpu.memory_space<vmem>>, vector<8x128xf32>
    %cst_88 = arith.constant dense<0.000000e+00> : vector<8x128xf32>
    %275 = tpu.matmul %266, %219, %cst_88 {dimension_numbers = #tpu.dot_dimension_numbers<[1], [0], [0], [1], [0, 0, 1, 1], [], []>} : vector<8x32xf32>, vector<32x128xf32>, vector<8x128xf32> -> vector<8x128xf32>
    %276 = arith.addf %274, %275 : vector<8x128xf32>
    %277 = arith.negf %276 : vector<8x128xf32>
    %278 = math.exp %277 : vector<8x128xf32>
    %cst_89 = arith.constant 1.000000e+00 : f32
    %279 = vector.broadcast %cst_89 : f32 to vector<8x128xf32>
    %280 = arith.addf %279, %278 : vector<8x128xf32>
    %281 = arith.divf %279, %280 : vector<8x128xf32>
    %282 = math.tanh %276 : vector<8x128xf32>
    %283 = vector.extract_strided_slice %281 {offsets = [0, 32], sizes = [8, 32], strides = [1, 1]} : vector<8x128xf32> to vector<8x32xf32>
    %284 = arith.mulf %283, %263 : vector<8x32xf32>
    %285 = vector.extract_strided_slice %281 {offsets = [0, 0], sizes = [8, 32], strides = [1, 1]} : vector<8x128xf32> to vector<8x32xf32>
    %286 = vector.extract_strided_slice %282 {offsets = [0, 64], sizes = [8, 32], strides = [1, 1]} : vector<8x128xf32> to vector<8x32xf32>
    %287 = arith.mulf %285, %286 : vector<8x32xf32>
    %288 = arith.addf %284, %287 : vector<8x32xf32>
    %289 = vector.extract_strided_slice %281 {offsets = [0, 96], sizes = [8, 32], strides = [1, 1]} : vector<8x128xf32> to vector<8x32xf32>
    %290 = math.tanh %288 : vector<8x32xf32>
    %291 = arith.mulf %289, %290 : vector<8x32xf32>
    %c8_i32_90 = arith.constant 8 : i32
    %292 = arith.muli %c2_i32_85, %c8_i32_90 : i32
    %293 = tpu.assume_multiple %292, 8 : i32
    %294 = arith.index_cast %293 : i32 to index
    %c0_91 = arith.constant 0 : index
    %295 = vector.load %arg18[%294, %c0_91] : memref<64x32xf32, #tpu.memory_space<vmem>>, vector<8x32xf32>
    tpu.vector_store %arg18[%294, %c0_91], %291 {strides = array<i32>} : memref<64x32xf32, #tpu.memory_space<vmem>>, vector<8x32xf32>,
    %c3_i32_92 = arith.constant 3 : i32
    %c8_i32_93 = arith.constant 8 : i32
    %296 = arith.muli %c3_i32_92, %c8_i32_93 : i32
    %297 = tpu.assume_multiple %296, 8 : i32
    %298 = arith.index_cast %297 : i32 to index
    %c0_94 = arith.constant 0 : index
    %299 = vector.load %arg17[%298, %c0_94] : memref<64x128xf32, #tpu.memory_space<vmem>>, vector<8x128xf32>
    %cst_95 = arith.constant dense<0.000000e+00> : vector<8x128xf32>
    %300 = tpu.matmul %291, %219, %cst_95 {dimension_numbers = #tpu.dot_dimension_numbers<[1], [0], [0], [1], [0, 0, 1, 1], [], []>} : vector<8x32xf32>, vector<32x128xf32>, vector<8x128xf32> -> vector<8x128xf32>
    %301 = arith.addf %299, %300 : vector<8x128xf32>
    %302 = arith.negf %301 : vector<8x128xf32>
    %303 = math.exp %302 : vector<8x128xf32>
    %cst_96 = arith.constant 1.000000e+00 : f32
    %304 = vector.broadcast %cst_96 : f32 to vector<8x128xf32>
    %305 = arith.addf %304, %303 : vector<8x128xf32>
    %306 = arith.divf %304, %305 : vector<8x128xf32>
    %307 = math.tanh %301 : vector<8x128xf32>
    %308 = vector.extract_strided_slice %306 {offsets = [0, 32], sizes = [8, 32], strides = [1, 1]} : vector<8x128xf32> to vector<8x32xf32>
    %309 = arith.mulf %308, %288 : vector<8x32xf32>
    %310 = vector.extract_strided_slice %306 {offsets = [0, 0], sizes = [8, 32], strides = [1, 1]} : vector<8x128xf32> to vector<8x32xf32>
    %311 = vector.extract_strided_slice %307 {offsets = [0, 64], sizes = [8, 32], strides = [1, 1]} : vector<8x128xf32> to vector<8x32xf32>
    %312 = arith.mulf %310, %311 : vector<8x32xf32>
    %313 = arith.addf %309, %312 : vector<8x32xf32>
    %314 = vector.extract_strided_slice %306 {offsets = [0, 96], sizes = [8, 32], strides = [1, 1]} : vector<8x128xf32> to vector<8x32xf32>
    %315 = math.tanh %313 : vector<8x32xf32>
    %316 = arith.mulf %314, %315 : vector<8x32xf32>
    %c8_i32_97 = arith.constant 8 : i32
    %317 = arith.muli %c3_i32_92, %c8_i32_97 : i32
    %318 = tpu.assume_multiple %317, 8 : i32
    %319 = arith.index_cast %318 : i32 to index
    %c0_98 = arith.constant 0 : index
    %320 = vector.load %arg18[%319, %c0_98] : memref<64x32xf32, #tpu.memory_space<vmem>>, vector<8x32xf32>
    tpu.vector_store %arg18[%319, %c0_98], %316 {strides = array<i32>} : memref<64x32xf32, #tpu.memory_space<vmem>>, vector<8x32xf32>,
    %c4_i32_99 = arith.constant 4 : i32
    %c8_i32_100 = arith.constant 8 : i32
    %321 = arith.muli %c4_i32_99, %c8_i32_100 : i32
    %322 = tpu.assume_multiple %321, 8 : i32
    %323 = arith.index_cast %322 : i32 to index
    %c0_101 = arith.constant 0 : index
    %324 = vector.load %arg17[%323, %c0_101] : memref<64x128xf32, #tpu.memory_space<vmem>>, vector<8x128xf32>
    %cst_102 = arith.constant dense<0.000000e+00> : vector<8x128xf32>
    %325 = tpu.matmul %316, %219, %cst_102 {dimension_numbers = #tpu.dot_dimension_numbers<[1], [0], [0], [1], [0, 0, 1, 1], [], []>} : vector<8x32xf32>, vector<32x128xf32>, vector<8x128xf32> -> vector<8x128xf32>
    %326 = arith.addf %324, %325 : vector<8x128xf32>
    %327 = arith.negf %326 : vector<8x128xf32>
    %328 = math.exp %327 : vector<8x128xf32>
    %cst_103 = arith.constant 1.000000e+00 : f32
    %329 = vector.broadcast %cst_103 : f32 to vector<8x128xf32>
    %330 = arith.addf %329, %328 : vector<8x128xf32>
    %331 = arith.divf %329, %330 : vector<8x128xf32>
    %332 = math.tanh %326 : vector<8x128xf32>
    %333 = vector.extract_strided_slice %331 {offsets = [0, 32], sizes = [8, 32], strides = [1, 1]} : vector<8x128xf32> to vector<8x32xf32>
    %334 = arith.mulf %333, %313 : vector<8x32xf32>
    %335 = vector.extract_strided_slice %331 {offsets = [0, 0], sizes = [8, 32], strides = [1, 1]} : vector<8x128xf32> to vector<8x32xf32>
    %336 = vector.extract_strided_slice %332 {offsets = [0, 64], sizes = [8, 32], strides = [1, 1]} : vector<8x128xf32> to vector<8x32xf32>
    %337 = arith.mulf %335, %336 : vector<8x32xf32>
    %338 = arith.addf %334, %337 : vector<8x32xf32>
    %339 = vector.extract_strided_slice %331 {offsets = [0, 96], sizes = [8, 32], strides = [1, 1]} : vector<8x128xf32> to vector<8x32xf32>
    %340 = math.tanh %338 : vector<8x32xf32>
    %341 = arith.mulf %339, %340 : vector<8x32xf32>
    %c8_i32_104 = arith.constant 8 : i32
    %342 = arith.muli %c4_i32_99, %c8_i32_104 : i32
    %343 = tpu.assume_multiple %342, 8 : i32
    %344 = arith.index_cast %343 : i32 to index
    %c0_105 = arith.constant 0 : index
    %345 = vector.load %arg18[%344, %c0_105] : memref<64x32xf32, #tpu.memory_space<vmem>>, vector<8x32xf32>
    tpu.vector_store %arg18[%344, %c0_105], %341 {strides = array<i32>} : memref<64x32xf32, #tpu.memory_space<vmem>>, vector<8x32xf32>,
    %c5_i32_106 = arith.constant 5 : i32
    %c8_i32_107 = arith.constant 8 : i32
    %346 = arith.muli %c5_i32_106, %c8_i32_107 : i32
    %347 = tpu.assume_multiple %346, 8 : i32
    %348 = arith.index_cast %347 : i32 to index
    %c0_108 = arith.constant 0 : index
    %349 = vector.load %arg17[%348, %c0_108] : memref<64x128xf32, #tpu.memory_space<vmem>>, vector<8x128xf32>
    %cst_109 = arith.constant dense<0.000000e+00> : vector<8x128xf32>
    %350 = tpu.matmul %341, %219, %cst_109 {dimension_numbers = #tpu.dot_dimension_numbers<[1], [0], [0], [1], [0, 0, 1, 1], [], []>} : vector<8x32xf32>, vector<32x128xf32>, vector<8x128xf32> -> vector<8x128xf32>
    %351 = arith.addf %349, %350 : vector<8x128xf32>
    %352 = arith.negf %351 : vector<8x128xf32>
    %353 = math.exp %352 : vector<8x128xf32>
    %cst_110 = arith.constant 1.000000e+00 : f32
    %354 = vector.broadcast %cst_110 : f32 to vector<8x128xf32>
    %355 = arith.addf %354, %353 : vector<8x128xf32>
    %356 = arith.divf %354, %355 : vector<8x128xf32>
    %357 = math.tanh %351 : vector<8x128xf32>
    %358 = vector.extract_strided_slice %356 {offsets = [0, 32], sizes = [8, 32], strides = [1, 1]} : vector<8x128xf32> to vector<8x32xf32>
    %359 = arith.mulf %358, %338 : vector<8x32xf32>
    %360 = vector.extract_strided_slice %356 {offsets = [0, 0], sizes = [8, 32], strides = [1, 1]} : vector<8x128xf32> to vector<8x32xf32>
    %361 = vector.extract_strided_slice %357 {offsets = [0, 64], sizes = [8, 32], strides = [1, 1]} : vector<8x128xf32> to vector<8x32xf32>
    %362 = arith.mulf %360, %361 : vector<8x32xf32>
    %363 = arith.addf %359, %362 : vector<8x32xf32>
    %364 = vector.extract_strided_slice %356 {offsets = [0, 96], sizes = [8, 32], strides = [1, 1]} : vector<8x128xf32> to vector<8x32xf32>
    %365 = math.tanh %363 : vector<8x32xf32>
    %366 = arith.mulf %364, %365 : vector<8x32xf32>
    %c8_i32_111 = arith.constant 8 : i32
    %367 = arith.muli %c5_i32_106, %c8_i32_111 : i32
    %368 = tpu.assume_multiple %367, 8 : i32
    %369 = arith.index_cast %368 : i32 to index
    %c0_112 = arith.constant 0 : index
    %370 = vector.load %arg18[%369, %c0_112] : memref<64x32xf32, #tpu.memory_space<vmem>>, vector<8x32xf32>
    tpu.vector_store %arg18[%369, %c0_112], %366 {strides = array<i32>} : memref<64x32xf32, #tpu.memory_space<vmem>>, vector<8x32xf32>,
    %c6_i32_113 = arith.constant 6 : i32
    %c8_i32_114 = arith.constant 8 : i32
    %371 = arith.muli %c6_i32_113, %c8_i32_114 : i32
    %372 = tpu.assume_multiple %371, 8 : i32
    %373 = arith.index_cast %372 : i32 to index
    %c0_115 = arith.constant 0 : index
    %374 = vector.load %arg17[%373, %c0_115] : memref<64x128xf32, #tpu.memory_space<vmem>>, vector<8x128xf32>
    %cst_116 = arith.constant dense<0.000000e+00> : vector<8x128xf32>
    %375 = tpu.matmul %366, %219, %cst_116 {dimension_numbers = #tpu.dot_dimension_numbers<[1], [0], [0], [1], [0, 0, 1, 1], [], []>} : vector<8x32xf32>, vector<32x128xf32>, vector<8x128xf32> -> vector<8x128xf32>
    %376 = arith.addf %374, %375 : vector<8x128xf32>
    %377 = arith.negf %376 : vector<8x128xf32>
    %378 = math.exp %377 : vector<8x128xf32>
    %cst_117 = arith.constant 1.000000e+00 : f32
    %379 = vector.broadcast %cst_117 : f32 to vector<8x128xf32>
    %380 = arith.addf %379, %378 : vector<8x128xf32>
    %381 = arith.divf %379, %380 : vector<8x128xf32>
    %382 = math.tanh %376 : vector<8x128xf32>
    %383 = vector.extract_strided_slice %381 {offsets = [0, 32], sizes = [8, 32], strides = [1, 1]} : vector<8x128xf32> to vector<8x32xf32>
    %384 = arith.mulf %383, %363 : vector<8x32xf32>
    %385 = vector.extract_strided_slice %381 {offsets = [0, 0], sizes = [8, 32], strides = [1, 1]} : vector<8x128xf32> to vector<8x32xf32>
    %386 = vector.extract_strided_slice %382 {offsets = [0, 64], sizes = [8, 32], strides = [1, 1]} : vector<8x128xf32> to vector<8x32xf32>
    %387 = arith.mulf %385, %386 : vector<8x32xf32>
    %388 = arith.addf %384, %387 : vector<8x32xf32>
    %389 = vector.extract_strided_slice %381 {offsets = [0, 96], sizes = [8, 32], strides = [1, 1]} : vector<8x128xf32> to vector<8x32xf32>
    %390 = math.tanh %388 : vector<8x32xf32>
    %391 = arith.mulf %389, %390 : vector<8x32xf32>
    %c8_i32_118 = arith.constant 8 : i32
    %392 = arith.muli %c6_i32_113, %c8_i32_118 : i32
    %393 = tpu.assume_multiple %392, 8 : i32
    %394 = arith.index_cast %393 : i32 to index
    %c0_119 = arith.constant 0 : index
    %395 = vector.load %arg18[%394, %c0_119] : memref<64x32xf32, #tpu.memory_space<vmem>>, vector<8x32xf32>
    tpu.vector_store %arg18[%394, %c0_119], %391 {strides = array<i32>} : memref<64x32xf32, #tpu.memory_space<vmem>>, vector<8x32xf32>,
    %c7_i32_120 = arith.constant 7 : i32
    %c8_i32_121 = arith.constant 8 : i32
    %396 = arith.muli %c7_i32_120, %c8_i32_121 : i32
    %397 = tpu.assume_multiple %396, 8 : i32
    %398 = arith.index_cast %397 : i32 to index
    %c0_122 = arith.constant 0 : index
    %399 = vector.load %arg17[%398, %c0_122] : memref<64x128xf32, #tpu.memory_space<vmem>>, vector<8x128xf32>
    %cst_123 = arith.constant dense<0.000000e+00> : vector<8x128xf32>
    %400 = tpu.matmul %391, %219, %cst_123 {dimension_numbers = #tpu.dot_dimension_numbers<[1], [0], [0], [1], [0, 0, 1, 1], [], []>} : vector<8x32xf32>, vector<32x128xf32>, vector<8x128xf32> -> vector<8x128xf32>
    %401 = arith.addf %399, %400 : vector<8x128xf32>
    %402 = arith.negf %401 : vector<8x128xf32>
    %403 = math.exp %402 : vector<8x128xf32>
    %cst_124 = arith.constant 1.000000e+00 : f32
    %404 = vector.broadcast %cst_124 : f32 to vector<8x128xf32>
    %405 = arith.addf %404, %403 : vector<8x128xf32>
    %406 = arith.divf %404, %405 : vector<8x128xf32>
    %407 = math.tanh %401 : vector<8x128xf32>
    %408 = vector.extract_strided_slice %406 {offsets = [0, 32], sizes = [8, 32], strides = [1, 1]} : vector<8x128xf32> to vector<8x32xf32>
    %409 = arith.mulf %408, %388 : vector<8x32xf32>
    %410 = vector.extract_strided_slice %406 {offsets = [0, 0], sizes = [8, 32], strides = [1, 1]} : vector<8x128xf32> to vector<8x32xf32>
    %411 = vector.extract_strided_slice %407 {offsets = [0, 64], sizes = [8, 32], strides = [1, 1]} : vector<8x128xf32> to vector<8x32xf32>
    %412 = arith.mulf %410, %411 : vector<8x32xf32>
    %413 = arith.addf %409, %412 : vector<8x32xf32>
    %414 = vector.extract_strided_slice %406 {offsets = [0, 96], sizes = [8, 32], strides = [1, 1]} : vector<8x128xf32> to vector<8x32xf32>
    %415 = math.tanh %413 : vector<8x32xf32>
    %416 = arith.mulf %414, %415 : vector<8x32xf32>
    %c8_i32_125 = arith.constant 8 : i32
    %417 = arith.muli %c7_i32_120, %c8_i32_125 : i32
    %418 = tpu.assume_multiple %417, 8 : i32
    %419 = arith.index_cast %418 : i32 to index
    %c0_126 = arith.constant 0 : index
    %420 = vector.load %arg18[%419, %c0_126] : memref<64x32xf32, #tpu.memory_space<vmem>>, vector<8x32xf32>
    tpu.vector_store %arg18[%419, %c0_126], %416 {strides = array<i32>} : memref<64x32xf32, #tpu.memory_space<vmem>>, vector<8x32xf32>,
    %c8_i32_127 = arith.constant 8 : i32
    %421 = arith.truncf %416 : vector<8x32xf32> to vector<8x32xbf16>
    %c0_128 = arith.constant 0 : index
    %c0_129 = arith.constant 0 : index
    %422 = vector.load %arg8[%c0_128, %c0_129] : memref<32x128xbf16, #tpu.memory_space<vmem>>, vector<32x128xbf16>
    %cst_130 = arith.constant dense<0.000000e+00> : vector<8x128xf32>
    %423 = tpu.matmul %421, %422, %cst_130 {dimension_numbers = #tpu.dot_dimension_numbers<[1], [0], [0], [1], [0, 0, 1, 1], [], []>} : vector<8x32xbf16>, vector<32x128xbf16>, vector<8x128xf32> -> vector<8x128xf32>
    %c0_131 = arith.constant 0 : index
    %c0_132 = arith.constant 0 : index
    %424 = vector.load %arg10[%c0_131, %c0_132] : memref<1x128xf32, #tpu.memory_space<vmem>>, vector<1x128xf32>
    %425 = vector.broadcast %424 : vector<1x128xf32> to vector<8x128xf32>
    %426 = arith.addf %423, %425 : vector<8x128xf32>
    %c0_133 = arith.constant 0 : index
    %c0_134 = arith.constant 0 : index
    %427 = vector.load %arg9[%c0_133, %c0_134] : memref<32x128xf32, #tpu.memory_space<vmem>>, vector<32x128xf32>
    %cst_135 = arith.constant 0.000000e+00 : f32
    %428 = vector.broadcast %cst_135 : f32 to vector<8x32xf32>
    %c0_i32_136 = arith.constant 0 : i32
    %cst_137 = arith.constant dense<0.000000e+00> : vector<8x128xf32>
    %429 = tpu.matmul %428, %427, %cst_137 {dimension_numbers = #tpu.dot_dimension_numbers<[1], [0], [0], [1], [0, 0, 1, 1], [], []>} : vector<8x32xf32>, vector<32x128xf32>, vector<8x128xf32> -> vector<8x128xf32>
    %430 = arith.addf %426, %429 : vector<8x128xf32>
    %431 = arith.negf %430 : vector<8x128xf32>
    %432 = math.exp %431 : vector<8x128xf32>
    %cst_138 = arith.constant 1.000000e+00 : f32
    %433 = vector.broadcast %cst_138 : f32 to vector<8x128xf32>
    %434 = arith.addf %433, %432 : vector<8x128xf32>
    %435 = arith.divf %433, %434 : vector<8x128xf32>
    %436 = math.tanh %430 : vector<8x128xf32>
    %437 = vector.extract_strided_slice %435 {offsets = [0, 32], sizes = [8, 32], strides = [1, 1]} : vector<8x128xf32> to vector<8x32xf32>
    %438 = arith.mulf %437, %428 : vector<8x32xf32>
    %439 = vector.extract_strided_slice %435 {offsets = [0, 0], sizes = [8, 32], strides = [1, 1]} : vector<8x128xf32> to vector<8x32xf32>
    %440 = vector.extract_strided_slice %436 {offsets = [0, 64], sizes = [8, 32], strides = [1, 1]} : vector<8x128xf32> to vector<8x32xf32>
    %441 = arith.mulf %439, %440 : vector<8x32xf32>
    %442 = arith.addf %438, %441 : vector<8x32xf32>
    %443 = vector.extract_strided_slice %435 {offsets = [0, 96], sizes = [8, 32], strides = [1, 1]} : vector<8x128xf32> to vector<8x32xf32>
    %444 = math.tanh %442 : vector<8x32xf32>
    %445 = arith.mulf %443, %444 : vector<8x32xf32>
    %c8_i32_139 = arith.constant 8 : i32
    %446 = arith.muli %c0_i32_136, %c8_i32_139 : i32
    %447 = tpu.assume_multiple %446, 8 : i32
    %448 = arith.index_cast %447 : i32 to index
    %c0_140 = arith.constant 0 : index
    %449 = vector.load %arg18[%448, %c0_140] : memref<64x32xf32, #tpu.memory_space<vmem>>, vector<8x32xf32>
    tpu.vector_store %arg18[%448, %c0_140], %445 {strides = array<i32>} : memref<64x32xf32, #tpu.memory_space<vmem>>, vector<8x32xf32>,
    %c1_i32_141 = arith.constant 1 : i32
    %cst_142 = arith.constant dense<0.000000e+00> : vector<8x128xf32>
    %450 = tpu.matmul %445, %427, %cst_142 {dimension_numbers = #tpu.dot_dimension_numbers<[1], [0], [0], [1], [0, 0, 1, 1], [], []>} : vector<8x32xf32>, vector<32x128xf32>, vector<8x128xf32> -> vector<8x128xf32>
    %451 = arith.addf %426, %450 : vector<8x128xf32>
    %452 = arith.negf %451 : vector<8x128xf32>
    %453 = math.exp %452 : vector<8x128xf32>
    %cst_143 = arith.constant 1.000000e+00 : f32
    %454 = vector.broadcast %cst_143 : f32 to vector<8x128xf32>
    %455 = arith.addf %454, %453 : vector<8x128xf32>
    %456 = arith.divf %454, %455 : vector<8x128xf32>
    %457 = math.tanh %451 : vector<8x128xf32>
    %458 = vector.extract_strided_slice %456 {offsets = [0, 32], sizes = [8, 32], strides = [1, 1]} : vector<8x128xf32> to vector<8x32xf32>
    %459 = arith.mulf %458, %442 : vector<8x32xf32>
    %460 = vector.extract_strided_slice %456 {offsets = [0, 0], sizes = [8, 32], strides = [1, 1]} : vector<8x128xf32> to vector<8x32xf32>
    %461 = vector.extract_strided_slice %457 {offsets = [0, 64], sizes = [8, 32], strides = [1, 1]} : vector<8x128xf32> to vector<8x32xf32>
    %462 = arith.mulf %460, %461 : vector<8x32xf32>
    %463 = arith.addf %459, %462 : vector<8x32xf32>
    %464 = vector.extract_strided_slice %456 {offsets = [0, 96], sizes = [8, 32], strides = [1, 1]} : vector<8x128xf32> to vector<8x32xf32>
    %465 = math.tanh %463 : vector<8x32xf32>
    %466 = arith.mulf %464, %465 : vector<8x32xf32>
    %c8_i32_144 = arith.constant 8 : i32
    %467 = arith.muli %c1_i32_141, %c8_i32_144 : i32
    %468 = tpu.assume_multiple %467, 8 : i32
    %469 = arith.index_cast %468 : i32 to index
    %c0_145 = arith.constant 0 : index
    %470 = vector.load %arg18[%469, %c0_145] : memref<64x32xf32, #tpu.memory_space<vmem>>, vector<8x32xf32>
    tpu.vector_store %arg18[%469, %c0_145], %466 {strides = array<i32>} : memref<64x32xf32, #tpu.memory_space<vmem>>, vector<8x32xf32>,
    %c2_i32_146 = arith.constant 2 : i32
    %cst_147 = arith.constant dense<0.000000e+00> : vector<8x128xf32>
    %471 = tpu.matmul %466, %427, %cst_147 {dimension_numbers = #tpu.dot_dimension_numbers<[1], [0], [0], [1], [0, 0, 1, 1], [], []>} : vector<8x32xf32>, vector<32x128xf32>, vector<8x128xf32> -> vector<8x128xf32>
    %472 = arith.addf %426, %471 : vector<8x128xf32>
    %473 = arith.negf %472 : vector<8x128xf32>
    %474 = math.exp %473 : vector<8x128xf32>
    %cst_148 = arith.constant 1.000000e+00 : f32
    %475 = vector.broadcast %cst_148 : f32 to vector<8x128xf32>
    %476 = arith.addf %475, %474 : vector<8x128xf32>
    %477 = arith.divf %475, %476 : vector<8x128xf32>
    %478 = math.tanh %472 : vector<8x128xf32>
    %479 = vector.extract_strided_slice %477 {offsets = [0, 32], sizes = [8, 32], strides = [1, 1]} : vector<8x128xf32> to vector<8x32xf32>
    %480 = arith.mulf %479, %463 : vector<8x32xf32>
    %481 = vector.extract_strided_slice %477 {offsets = [0, 0], sizes = [8, 32], strides = [1, 1]} : vector<8x128xf32> to vector<8x32xf32>
    %482 = vector.extract_strided_slice %478 {offsets = [0, 64], sizes = [8, 32], strides = [1, 1]} : vector<8x128xf32> to vector<8x32xf32>
    %483 = arith.mulf %481, %482 : vector<8x32xf32>
    %484 = arith.addf %480, %483 : vector<8x32xf32>
    %485 = vector.extract_strided_slice %477 {offsets = [0, 96], sizes = [8, 32], strides = [1, 1]} : vector<8x128xf32> to vector<8x32xf32>
    %486 = math.tanh %484 : vector<8x32xf32>
    %487 = arith.mulf %485, %486 : vector<8x32xf32>
    %c8_i32_149 = arith.constant 8 : i32
    %488 = arith.muli %c2_i32_146, %c8_i32_149 : i32
    %489 = tpu.assume_multiple %488, 8 : i32
    %490 = arith.index_cast %489 : i32 to index
    %c0_150 = arith.constant 0 : index
    %491 = vector.load %arg18[%490, %c0_150] : memref<64x32xf32, #tpu.memory_space<vmem>>, vector<8x32xf32>
    tpu.vector_store %arg18[%490, %c0_150], %487 {strides = array<i32>} : memref<64x32xf32, #tpu.memory_space<vmem>>, vector<8x32xf32>,
    %c3_i32_151 = arith.constant 3 : i32
    %cst_152 = arith.constant dense<0.000000e+00> : vector<8x128xf32>
    %492 = tpu.matmul %487, %427, %cst_152 {dimension_numbers = #tpu.dot_dimension_numbers<[1], [0], [0], [1], [0, 0, 1, 1], [], []>} : vector<8x32xf32>, vector<32x128xf32>, vector<8x128xf32> -> vector<8x128xf32>
    %493 = arith.addf %426, %492 : vector<8x128xf32>
    %494 = arith.negf %493 : vector<8x128xf32>
    %495 = math.exp %494 : vector<8x128xf32>
    %cst_153 = arith.constant 1.000000e+00 : f32
    %496 = vector.broadcast %cst_153 : f32 to vector<8x128xf32>
    %497 = arith.addf %496, %495 : vector<8x128xf32>
    %498 = arith.divf %496, %497 : vector<8x128xf32>
    %499 = math.tanh %493 : vector<8x128xf32>
    %500 = vector.extract_strided_slice %498 {offsets = [0, 32], sizes = [8, 32], strides = [1, 1]} : vector<8x128xf32> to vector<8x32xf32>
    %501 = arith.mulf %500, %484 : vector<8x32xf32>
    %502 = vector.extract_strided_slice %498 {offsets = [0, 0], sizes = [8, 32], strides = [1, 1]} : vector<8x128xf32> to vector<8x32xf32>
    %503 = vector.extract_strided_slice %499 {offsets = [0, 64], sizes = [8, 32], strides = [1, 1]} : vector<8x128xf32> to vector<8x32xf32>
    %504 = arith.mulf %502, %503 : vector<8x32xf32>
    %505 = arith.addf %501, %504 : vector<8x32xf32>
    %506 = vector.extract_strided_slice %498 {offsets = [0, 96], sizes = [8, 32], strides = [1, 1]} : vector<8x128xf32> to vector<8x32xf32>
    %507 = math.tanh %505 : vector<8x32xf32>
    %508 = arith.mulf %506, %507 : vector<8x32xf32>
    %c8_i32_154 = arith.constant 8 : i32
    %509 = arith.muli %c3_i32_151, %c8_i32_154 : i32
    %510 = tpu.assume_multiple %509, 8 : i32
    %511 = arith.index_cast %510 : i32 to index
    %c0_155 = arith.constant 0 : index
    %512 = vector.load %arg18[%511, %c0_155] : memref<64x32xf32, #tpu.memory_space<vmem>>, vector<8x32xf32>
    tpu.vector_store %arg18[%511, %c0_155], %508 {strides = array<i32>} : memref<64x32xf32, #tpu.memory_space<vmem>>, vector<8x32xf32>,
    %c4_i32_156 = arith.constant 4 : i32
    %cst_157 = arith.constant dense<0.000000e+00> : vector<8x128xf32>
    %513 = tpu.matmul %508, %427, %cst_157 {dimension_numbers = #tpu.dot_dimension_numbers<[1], [0], [0], [1], [0, 0, 1, 1], [], []>} : vector<8x32xf32>, vector<32x128xf32>, vector<8x128xf32> -> vector<8x128xf32>
    %514 = arith.addf %426, %513 : vector<8x128xf32>
    %515 = arith.negf %514 : vector<8x128xf32>
    %516 = math.exp %515 : vector<8x128xf32>
    %cst_158 = arith.constant 1.000000e+00 : f32
    %517 = vector.broadcast %cst_158 : f32 to vector<8x128xf32>
    %518 = arith.addf %517, %516 : vector<8x128xf32>
    %519 = arith.divf %517, %518 : vector<8x128xf32>
    %520 = math.tanh %514 : vector<8x128xf32>
    %521 = vector.extract_strided_slice %519 {offsets = [0, 32], sizes = [8, 32], strides = [1, 1]} : vector<8x128xf32> to vector<8x32xf32>
    %522 = arith.mulf %521, %505 : vector<8x32xf32>
    %523 = vector.extract_strided_slice %519 {offsets = [0, 0], sizes = [8, 32], strides = [1, 1]} : vector<8x128xf32> to vector<8x32xf32>
    %524 = vector.extract_strided_slice %520 {offsets = [0, 64], sizes = [8, 32], strides = [1, 1]} : vector<8x128xf32> to vector<8x32xf32>
    %525 = arith.mulf %523, %524 : vector<8x32xf32>
    %526 = arith.addf %522, %525 : vector<8x32xf32>
    %527 = vector.extract_strided_slice %519 {offsets = [0, 96], sizes = [8, 32], strides = [1, 1]} : vector<8x128xf32> to vector<8x32xf32>
    %528 = math.tanh %526 : vector<8x32xf32>
    %529 = arith.mulf %527, %528 : vector<8x32xf32>
    %c8_i32_159 = arith.constant 8 : i32
    %530 = arith.muli %c4_i32_156, %c8_i32_159 : i32
    %531 = tpu.assume_multiple %530, 8 : i32
    %532 = arith.index_cast %531 : i32 to index
    %c0_160 = arith.constant 0 : index
    %533 = vector.load %arg18[%532, %c0_160] : memref<64x32xf32, #tpu.memory_space<vmem>>, vector<8x32xf32>
    tpu.vector_store %arg18[%532, %c0_160], %529 {strides = array<i32>} : memref<64x32xf32, #tpu.memory_space<vmem>>, vector<8x32xf32>,
    %c5_i32_161 = arith.constant 5 : i32
    %cst_162 = arith.constant dense<0.000000e+00> : vector<8x128xf32>
    %534 = tpu.matmul %529, %427, %cst_162 {dimension_numbers = #tpu.dot_dimension_numbers<[1], [0], [0], [1], [0, 0, 1, 1], [], []>} : vector<8x32xf32>, vector<32x128xf32>, vector<8x128xf32> -> vector<8x128xf32>
    %535 = arith.addf %426, %534 : vector<8x128xf32>
    %536 = arith.negf %535 : vector<8x128xf32>
    %537 = math.exp %536 : vector<8x128xf32>
    %cst_163 = arith.constant 1.000000e+00 : f32
    %538 = vector.broadcast %cst_163 : f32 to vector<8x128xf32>
    %539 = arith.addf %538, %537 : vector<8x128xf32>
    %540 = arith.divf %538, %539 : vector<8x128xf32>
    %541 = math.tanh %535 : vector<8x128xf32>
    %542 = vector.extract_strided_slice %540 {offsets = [0, 32], sizes = [8, 32], strides = [1, 1]} : vector<8x128xf32> to vector<8x32xf32>
    %543 = arith.mulf %542, %526 : vector<8x32xf32>
    %544 = vector.extract_strided_slice %540 {offsets = [0, 0], sizes = [8, 32], strides = [1, 1]} : vector<8x128xf32> to vector<8x32xf32>
    %545 = vector.extract_strided_slice %541 {offsets = [0, 64], sizes = [8, 32], strides = [1, 1]} : vector<8x128xf32> to vector<8x32xf32>
    %546 = arith.mulf %544, %545 : vector<8x32xf32>
    %547 = arith.addf %543, %546 : vector<8x32xf32>
    %548 = vector.extract_strided_slice %540 {offsets = [0, 96], sizes = [8, 32], strides = [1, 1]} : vector<8x128xf32> to vector<8x32xf32>
    %549 = math.tanh %547 : vector<8x32xf32>
    %550 = arith.mulf %548, %549 : vector<8x32xf32>
    %c8_i32_164 = arith.constant 8 : i32
    %551 = arith.muli %c5_i32_161, %c8_i32_164 : i32
    %552 = tpu.assume_multiple %551, 8 : i32
    %553 = arith.index_cast %552 : i32 to index
    %c0_165 = arith.constant 0 : index
    %554 = vector.load %arg18[%553, %c0_165] : memref<64x32xf32, #tpu.memory_space<vmem>>, vector<8x32xf32>
    tpu.vector_store %arg18[%553, %c0_165], %550 {strides = array<i32>} : memref<64x32xf32, #tpu.memory_space<vmem>>, vector<8x32xf32>,
    %c6_i32_166 = arith.constant 6 : i32
    %cst_167 = arith.constant dense<0.000000e+00> : vector<8x128xf32>
    %555 = tpu.matmul %550, %427, %cst_167 {dimension_numbers = #tpu.dot_dimension_numbers<[1], [0], [0], [1], [0, 0, 1, 1], [], []>} : vector<8x32xf32>, vector<32x128xf32>, vector<8x128xf32> -> vector<8x128xf32>
    %556 = arith.addf %426, %555 : vector<8x128xf32>
    %557 = arith.negf %556 : vector<8x128xf32>
    %558 = math.exp %557 : vector<8x128xf32>
    %cst_168 = arith.constant 1.000000e+00 : f32
    %559 = vector.broadcast %cst_168 : f32 to vector<8x128xf32>
    %560 = arith.addf %559, %558 : vector<8x128xf32>
    %561 = arith.divf %559, %560 : vector<8x128xf32>
    %562 = math.tanh %556 : vector<8x128xf32>
    %563 = vector.extract_strided_slice %561 {offsets = [0, 32], sizes = [8, 32], strides = [1, 1]} : vector<8x128xf32> to vector<8x32xf32>
    %564 = arith.mulf %563, %547 : vector<8x32xf32>
    %565 = vector.extract_strided_slice %561 {offsets = [0, 0], sizes = [8, 32], strides = [1, 1]} : vector<8x128xf32> to vector<8x32xf32>
    %566 = vector.extract_strided_slice %562 {offsets = [0, 64], sizes = [8, 32], strides = [1, 1]} : vector<8x128xf32> to vector<8x32xf32>
    %567 = arith.mulf %565, %566 : vector<8x32xf32>
    %568 = arith.addf %564, %567 : vector<8x32xf32>
    %569 = vector.extract_strided_slice %561 {offsets = [0, 96], sizes = [8, 32], strides = [1, 1]} : vector<8x128xf32> to vector<8x32xf32>
    %570 = math.tanh %568 : vector<8x32xf32>
    %571 = arith.mulf %569, %570 : vector<8x32xf32>
    %c8_i32_169 = arith.constant 8 : i32
    %572 = arith.muli %c6_i32_166, %c8_i32_169 : i32
    %573 = tpu.assume_multiple %572, 8 : i32
    %574 = arith.index_cast %573 : i32 to index
    %c0_170 = arith.constant 0 : index
    %575 = vector.load %arg18[%574, %c0_170] : memref<64x32xf32, #tpu.memory_space<vmem>>, vector<8x32xf32>
    tpu.vector_store %arg18[%574, %c0_170], %571 {strides = array<i32>} : memref<64x32xf32, #tpu.memory_space<vmem>>, vector<8x32xf32>,
    %c7_i32_171 = arith.constant 7 : i32
    %cst_172 = arith.constant dense<0.000000e+00> : vector<8x128xf32>
    %576 = tpu.matmul %571, %427, %cst_172 {dimension_numbers = #tpu.dot_dimension_numbers<[1], [0], [0], [1], [0, 0, 1, 1], [], []>} : vector<8x32xf32>, vector<32x128xf32>, vector<8x128xf32> -> vector<8x128xf32>
    %577 = arith.addf %426, %576 : vector<8x128xf32>
    %578 = arith.negf %577 : vector<8x128xf32>
    %579 = math.exp %578 : vector<8x128xf32>
    %cst_173 = arith.constant 1.000000e+00 : f32
    %580 = vector.broadcast %cst_173 : f32 to vector<8x128xf32>
    %581 = arith.addf %580, %579 : vector<8x128xf32>
    %582 = arith.divf %580, %581 : vector<8x128xf32>
    %583 = math.tanh %577 : vector<8x128xf32>
    %584 = vector.extract_strided_slice %582 {offsets = [0, 32], sizes = [8, 32], strides = [1, 1]} : vector<8x128xf32> to vector<8x32xf32>
    %585 = arith.mulf %584, %568 : vector<8x32xf32>
    %586 = vector.extract_strided_slice %582 {offsets = [0, 0], sizes = [8, 32], strides = [1, 1]} : vector<8x128xf32> to vector<8x32xf32>
    %587 = vector.extract_strided_slice %583 {offsets = [0, 64], sizes = [8, 32], strides = [1, 1]} : vector<8x128xf32> to vector<8x32xf32>
    %588 = arith.mulf %586, %587 : vector<8x32xf32>
    %589 = arith.addf %585, %588 : vector<8x32xf32>
    %590 = vector.extract_strided_slice %582 {offsets = [0, 96], sizes = [8, 32], strides = [1, 1]} : vector<8x128xf32> to vector<8x32xf32>
    %591 = math.tanh %589 : vector<8x32xf32>
    %592 = arith.mulf %590, %591 : vector<8x32xf32>
    %c8_i32_174 = arith.constant 8 : i32
    %593 = arith.muli %c7_i32_171, %c8_i32_174 : i32
    %594 = tpu.assume_multiple %593, 8 : i32
    %595 = arith.index_cast %594 : i32 to index
    %c0_175 = arith.constant 0 : index
    %596 = vector.load %arg18[%595, %c0_175] : memref<64x32xf32, #tpu.memory_space<vmem>>, vector<8x32xf32>
    tpu.vector_store %arg18[%595, %c0_175], %592 {strides = array<i32>} : memref<64x32xf32, #tpu.memory_space<vmem>>, vector<8x32xf32>,
    %c8_i32_176 = arith.constant 8 : i32
    %c0_177 = arith.constant 0 : index
    %c0_178 = arith.constant 0 : index
    %597 = vector.load %arg18[%c0_177, %c0_178] : memref<64x32xf32, #tpu.memory_space<vmem>>, vector<64x32xf32>
    %598 = arith.truncf %597 : vector<64x32xf32> to vector<64x32xbf16>
    %c0_179 = arith.constant 0 : index
    %c0_180 = arith.constant 0 : index
    %599 = vector.load %arg11[%c0_179, %c0_180] : memref<32x128xbf16, #tpu.memory_space<vmem>>, vector<32x128xbf16>
    %cst_181 = arith.constant dense<0.000000e+00> : vector<64x128xf32>
    %600 = tpu.matmul %598, %599, %cst_181 {dimension_numbers = #tpu.dot_dimension_numbers<[1], [0], [0], [1], [0, 0, 1, 1], [], []>} : vector<64x32xbf16>, vector<32x128xbf16>, vector<64x128xf32> -> vector<64x128xf32>
    %c0_182 = arith.constant 0 : index
    %c0_183 = arith.constant 0 : index
    %601 = vector.load %arg13[%c0_182, %c0_183] : memref<1x128xf32, #tpu.memory_space<vmem>>, vector<1x128xf32>
    %602 = vector.broadcast %601 : vector<1x128xf32> to vector<64x128xf32>
    %603 = arith.addf %600, %602 : vector<64x128xf32>
    %c0_184 = arith.constant 0 : index
    %c0_185 = arith.constant 0 : index
    %604 = vector.load %arg17[%c0_184, %c0_185] : memref<64x128xf32, #tpu.memory_space<vmem>>, vector<64x128xf32>
    tpu.vector_store %arg17[%c0_184, %c0_185], %603 {strides = array<i32>} : memref<64x128xf32, #tpu.memory_space<vmem>>, vector<64x128xf32>,
    %c0_186 = arith.constant 0 : index
    %c0_187 = arith.constant 0 : index
    %605 = vector.load %arg12[%c0_186, %c0_187] : memref<32x128xf32, #tpu.memory_space<vmem>>, vector<32x128xf32>
    %cst_188 = arith.constant 0.000000e+00 : f32
    %606 = vector.broadcast %cst_188 : f32 to vector<8x32xf32>
    %c0_i32_189 = arith.constant 0 : i32
    %c8_i32_190 = arith.constant 8 : i32
    %607 = arith.muli %c0_i32_189, %c8_i32_190 : i32
    %608 = tpu.assume_multiple %607, 8 : i32
    %609 = arith.index_cast %608 : i32 to index
    %c0_191 = arith.constant 0 : index
    %610 = vector.load %arg17[%609, %c0_191] : memref<64x128xf32, #tpu.memory_space<vmem>>, vector<8x128xf32>
    %cst_192 = arith.constant dense<0.000000e+00> : vector<8x128xf32>
    %611 = tpu.matmul %606, %605, %cst_192 {dimension_numbers = #tpu.dot_dimension_numbers<[1], [0], [0], [1], [0, 0, 1, 1], [], []>} : vector<8x32xf32>, vector<32x128xf32>, vector<8x128xf32> -> vector<8x128xf32>
    %612 = arith.addf %610, %611 : vector<8x128xf32>
    %613 = arith.negf %612 : vector<8x128xf32>
    %614 = math.exp %613 : vector<8x128xf32>
    %cst_193 = arith.constant 1.000000e+00 : f32
    %615 = vector.broadcast %cst_193 : f32 to vector<8x128xf32>
    %616 = arith.addf %615, %614 : vector<8x128xf32>
    %617 = arith.divf %615, %616 : vector<8x128xf32>
    %618 = math.tanh %612 : vector<8x128xf32>
    %619 = vector.extract_strided_slice %617 {offsets = [0, 32], sizes = [8, 32], strides = [1, 1]} : vector<8x128xf32> to vector<8x32xf32>
    %620 = arith.mulf %619, %606 : vector<8x32xf32>
    %621 = vector.extract_strided_slice %617 {offsets = [0, 0], sizes = [8, 32], strides = [1, 1]} : vector<8x128xf32> to vector<8x32xf32>
    %622 = vector.extract_strided_slice %618 {offsets = [0, 64], sizes = [8, 32], strides = [1, 1]} : vector<8x128xf32> to vector<8x32xf32>
    %623 = arith.mulf %621, %622 : vector<8x32xf32>
    %624 = arith.addf %620, %623 : vector<8x32xf32>
    %625 = vector.extract_strided_slice %617 {offsets = [0, 96], sizes = [8, 32], strides = [1, 1]} : vector<8x128xf32> to vector<8x32xf32>
    %626 = math.tanh %624 : vector<8x32xf32>
    %627 = arith.mulf %625, %626 : vector<8x32xf32>
    %c8_i32_194 = arith.constant 8 : i32
    %628 = arith.muli %c0_i32_189, %c8_i32_194 : i32
    %629 = tpu.assume_multiple %628, 8 : i32
    %630 = arith.index_cast %629 : i32 to index
    %c0_195 = arith.constant 0 : index
    %631 = vector.load %arg18[%630, %c0_195] : memref<64x32xf32, #tpu.memory_space<vmem>>, vector<8x32xf32>
    tpu.vector_store %arg18[%630, %c0_195], %627 {strides = array<i32>} : memref<64x32xf32, #tpu.memory_space<vmem>>, vector<8x32xf32>,
    %c1_i32_196 = arith.constant 1 : i32
    %c8_i32_197 = arith.constant 8 : i32
    %632 = arith.muli %c1_i32_196, %c8_i32_197 : i32
    %633 = tpu.assume_multiple %632, 8 : i32
    %634 = arith.index_cast %633 : i32 to index
    %c0_198 = arith.constant 0 : index
    %635 = vector.load %arg17[%634, %c0_198] : memref<64x128xf32, #tpu.memory_space<vmem>>, vector<8x128xf32>
    %cst_199 = arith.constant dense<0.000000e+00> : vector<8x128xf32>
    %636 = tpu.matmul %627, %605, %cst_199 {dimension_numbers = #tpu.dot_dimension_numbers<[1], [0], [0], [1], [0, 0, 1, 1], [], []>} : vector<8x32xf32>, vector<32x128xf32>, vector<8x128xf32> -> vector<8x128xf32>
    %637 = arith.addf %635, %636 : vector<8x128xf32>
    %638 = arith.negf %637 : vector<8x128xf32>
    %639 = math.exp %638 : vector<8x128xf32>
    %cst_200 = arith.constant 1.000000e+00 : f32
    %640 = vector.broadcast %cst_200 : f32 to vector<8x128xf32>
    %641 = arith.addf %640, %639 : vector<8x128xf32>
    %642 = arith.divf %640, %641 : vector<8x128xf32>
    %643 = math.tanh %637 : vector<8x128xf32>
    %644 = vector.extract_strided_slice %642 {offsets = [0, 32], sizes = [8, 32], strides = [1, 1]} : vector<8x128xf32> to vector<8x32xf32>
    %645 = arith.mulf %644, %624 : vector<8x32xf32>
    %646 = vector.extract_strided_slice %642 {offsets = [0, 0], sizes = [8, 32], strides = [1, 1]} : vector<8x128xf32> to vector<8x32xf32>
    %647 = vector.extract_strided_slice %643 {offsets = [0, 64], sizes = [8, 32], strides = [1, 1]} : vector<8x128xf32> to vector<8x32xf32>
    %648 = arith.mulf %646, %647 : vector<8x32xf32>
    %649 = arith.addf %645, %648 : vector<8x32xf32>
    %650 = vector.extract_strided_slice %642 {offsets = [0, 96], sizes = [8, 32], strides = [1, 1]} : vector<8x128xf32> to vector<8x32xf32>
    %651 = math.tanh %649 : vector<8x32xf32>
    %652 = arith.mulf %650, %651 : vector<8x32xf32>
    %c8_i32_201 = arith.constant 8 : i32
    %653 = arith.muli %c1_i32_196, %c8_i32_201 : i32
    %654 = tpu.assume_multiple %653, 8 : i32
    %655 = arith.index_cast %654 : i32 to index
    %c0_202 = arith.constant 0 : index
    %656 = vector.load %arg18[%655, %c0_202] : memref<64x32xf32, #tpu.memory_space<vmem>>, vector<8x32xf32>
    tpu.vector_store %arg18[%655, %c0_202], %652 {strides = array<i32>} : memref<64x32xf32, #tpu.memory_space<vmem>>, vector<8x32xf32>,
    %c2_i32_203 = arith.constant 2 : i32
    %c8_i32_204 = arith.constant 8 : i32
    %657 = arith.muli %c2_i32_203, %c8_i32_204 : i32
    %658 = tpu.assume_multiple %657, 8 : i32
    %659 = arith.index_cast %658 : i32 to index
    %c0_205 = arith.constant 0 : index
    %660 = vector.load %arg17[%659, %c0_205] : memref<64x128xf32, #tpu.memory_space<vmem>>, vector<8x128xf32>
    %cst_206 = arith.constant dense<0.000000e+00> : vector<8x128xf32>
    %661 = tpu.matmul %652, %605, %cst_206 {dimension_numbers = #tpu.dot_dimension_numbers<[1], [0], [0], [1], [0, 0, 1, 1], [], []>} : vector<8x32xf32>, vector<32x128xf32>, vector<8x128xf32> -> vector<8x128xf32>
    %662 = arith.addf %660, %661 : vector<8x128xf32>
    %663 = arith.negf %662 : vector<8x128xf32>
    %664 = math.exp %663 : vector<8x128xf32>
    %cst_207 = arith.constant 1.000000e+00 : f32
    %665 = vector.broadcast %cst_207 : f32 to vector<8x128xf32>
    %666 = arith.addf %665, %664 : vector<8x128xf32>
    %667 = arith.divf %665, %666 : vector<8x128xf32>
    %668 = math.tanh %662 : vector<8x128xf32>
    %669 = vector.extract_strided_slice %667 {offsets = [0, 32], sizes = [8, 32], strides = [1, 1]} : vector<8x128xf32> to vector<8x32xf32>
    %670 = arith.mulf %669, %649 : vector<8x32xf32>
    %671 = vector.extract_strided_slice %667 {offsets = [0, 0], sizes = [8, 32], strides = [1, 1]} : vector<8x128xf32> to vector<8x32xf32>
    %672 = vector.extract_strided_slice %668 {offsets = [0, 64], sizes = [8, 32], strides = [1, 1]} : vector<8x128xf32> to vector<8x32xf32>
    %673 = arith.mulf %671, %672 : vector<8x32xf32>
    %674 = arith.addf %670, %673 : vector<8x32xf32>
    %675 = vector.extract_strided_slice %667 {offsets = [0, 96], sizes = [8, 32], strides = [1, 1]} : vector<8x128xf32> to vector<8x32xf32>
    %676 = math.tanh %674 : vector<8x32xf32>
    %677 = arith.mulf %675, %676 : vector<8x32xf32>
    %c8_i32_208 = arith.constant 8 : i32
    %678 = arith.muli %c2_i32_203, %c8_i32_208 : i32
    %679 = tpu.assume_multiple %678, 8 : i32
    %680 = arith.index_cast %679 : i32 to index
    %c0_209 = arith.constant 0 : index
    %681 = vector.load %arg18[%680, %c0_209] : memref<64x32xf32, #tpu.memory_space<vmem>>, vector<8x32xf32>
    tpu.vector_store %arg18[%680, %c0_209], %677 {strides = array<i32>} : memref<64x32xf32, #tpu.memory_space<vmem>>, vector<8x32xf32>,
    %c3_i32_210 = arith.constant 3 : i32
    %c8_i32_211 = arith.constant 8 : i32
    %682 = arith.muli %c3_i32_210, %c8_i32_211 : i32
    %683 = tpu.assume_multiple %682, 8 : i32
    %684 = arith.index_cast %683 : i32 to index
    %c0_212 = arith.constant 0 : index
    %685 = vector.load %arg17[%684, %c0_212] : memref<64x128xf32, #tpu.memory_space<vmem>>, vector<8x128xf32>
    %cst_213 = arith.constant dense<0.000000e+00> : vector<8x128xf32>
    %686 = tpu.matmul %677, %605, %cst_213 {dimension_numbers = #tpu.dot_dimension_numbers<[1], [0], [0], [1], [0, 0, 1, 1], [], []>} : vector<8x32xf32>, vector<32x128xf32>, vector<8x128xf32> -> vector<8x128xf32>
    %687 = arith.addf %685, %686 : vector<8x128xf32>
    %688 = arith.negf %687 : vector<8x128xf32>
    %689 = math.exp %688 : vector<8x128xf32>
    %cst_214 = arith.constant 1.000000e+00 : f32
    %690 = vector.broadcast %cst_214 : f32 to vector<8x128xf32>
    %691 = arith.addf %690, %689 : vector<8x128xf32>
    %692 = arith.divf %690, %691 : vector<8x128xf32>
    %693 = math.tanh %687 : vector<8x128xf32>
    %694 = vector.extract_strided_slice %692 {offsets = [0, 32], sizes = [8, 32], strides = [1, 1]} : vector<8x128xf32> to vector<8x32xf32>
    %695 = arith.mulf %694, %674 : vector<8x32xf32>
    %696 = vector.extract_strided_slice %692 {offsets = [0, 0], sizes = [8, 32], strides = [1, 1]} : vector<8x128xf32> to vector<8x32xf32>
    %697 = vector.extract_strided_slice %693 {offsets = [0, 64], sizes = [8, 32], strides = [1, 1]} : vector<8x128xf32> to vector<8x32xf32>
    %698 = arith.mulf %696, %697 : vector<8x32xf32>
    %699 = arith.addf %695, %698 : vector<8x32xf32>
    %700 = vector.extract_strided_slice %692 {offsets = [0, 96], sizes = [8, 32], strides = [1, 1]} : vector<8x128xf32> to vector<8x32xf32>
    %701 = math.tanh %699 : vector<8x32xf32>
    %702 = arith.mulf %700, %701 : vector<8x32xf32>
    %c8_i32_215 = arith.constant 8 : i32
    %703 = arith.muli %c3_i32_210, %c8_i32_215 : i32
    %704 = tpu.assume_multiple %703, 8 : i32
    %705 = arith.index_cast %704 : i32 to index
    %c0_216 = arith.constant 0 : index
    %706 = vector.load %arg18[%705, %c0_216] : memref<64x32xf32, #tpu.memory_space<vmem>>, vector<8x32xf32>
    tpu.vector_store %arg18[%705, %c0_216], %702 {strides = array<i32>} : memref<64x32xf32, #tpu.memory_space<vmem>>, vector<8x32xf32>,
    %c4_i32_217 = arith.constant 4 : i32
    %c8_i32_218 = arith.constant 8 : i32
    %707 = arith.muli %c4_i32_217, %c8_i32_218 : i32
    %708 = tpu.assume_multiple %707, 8 : i32
    %709 = arith.index_cast %708 : i32 to index
    %c0_219 = arith.constant 0 : index
    %710 = vector.load %arg17[%709, %c0_219] : memref<64x128xf32, #tpu.memory_space<vmem>>, vector<8x128xf32>
    %cst_220 = arith.constant dense<0.000000e+00> : vector<8x128xf32>
    %711 = tpu.matmul %702, %605, %cst_220 {dimension_numbers = #tpu.dot_dimension_numbers<[1], [0], [0], [1], [0, 0, 1, 1], [], []>} : vector<8x32xf32>, vector<32x128xf32>, vector<8x128xf32> -> vector<8x128xf32>
    %712 = arith.addf %710, %711 : vector<8x128xf32>
    %713 = arith.negf %712 : vector<8x128xf32>
    %714 = math.exp %713 : vector<8x128xf32>
    %cst_221 = arith.constant 1.000000e+00 : f32
    %715 = vector.broadcast %cst_221 : f32 to vector<8x128xf32>
    %716 = arith.addf %715, %714 : vector<8x128xf32>
    %717 = arith.divf %715, %716 : vector<8x128xf32>
    %718 = math.tanh %712 : vector<8x128xf32>
    %719 = vector.extract_strided_slice %717 {offsets = [0, 32], sizes = [8, 32], strides = [1, 1]} : vector<8x128xf32> to vector<8x32xf32>
    %720 = arith.mulf %719, %699 : vector<8x32xf32>
    %721 = vector.extract_strided_slice %717 {offsets = [0, 0], sizes = [8, 32], strides = [1, 1]} : vector<8x128xf32> to vector<8x32xf32>
    %722 = vector.extract_strided_slice %718 {offsets = [0, 64], sizes = [8, 32], strides = [1, 1]} : vector<8x128xf32> to vector<8x32xf32>
    %723 = arith.mulf %721, %722 : vector<8x32xf32>
    %724 = arith.addf %720, %723 : vector<8x32xf32>
    %725 = vector.extract_strided_slice %717 {offsets = [0, 96], sizes = [8, 32], strides = [1, 1]} : vector<8x128xf32> to vector<8x32xf32>
    %726 = math.tanh %724 : vector<8x32xf32>
    %727 = arith.mulf %725, %726 : vector<8x32xf32>
    %c8_i32_222 = arith.constant 8 : i32
    %728 = arith.muli %c4_i32_217, %c8_i32_222 : i32
    %729 = tpu.assume_multiple %728, 8 : i32
    %730 = arith.index_cast %729 : i32 to index
    %c0_223 = arith.constant 0 : index
    %731 = vector.load %arg18[%730, %c0_223] : memref<64x32xf32, #tpu.memory_space<vmem>>, vector<8x32xf32>
    tpu.vector_store %arg18[%730, %c0_223], %727 {strides = array<i32>} : memref<64x32xf32, #tpu.memory_space<vmem>>, vector<8x32xf32>,
    %c5_i32_224 = arith.constant 5 : i32
    %c8_i32_225 = arith.constant 8 : i32
    %732 = arith.muli %c5_i32_224, %c8_i32_225 : i32
    %733 = tpu.assume_multiple %732, 8 : i32
    %734 = arith.index_cast %733 : i32 to index
    %c0_226 = arith.constant 0 : index
    %735 = vector.load %arg17[%734, %c0_226] : memref<64x128xf32, #tpu.memory_space<vmem>>, vector<8x128xf32>
    %cst_227 = arith.constant dense<0.000000e+00> : vector<8x128xf32>
    %736 = tpu.matmul %727, %605, %cst_227 {dimension_numbers = #tpu.dot_dimension_numbers<[1], [0], [0], [1], [0, 0, 1, 1], [], []>} : vector<8x32xf32>, vector<32x128xf32>, vector<8x128xf32> -> vector<8x128xf32>
    %737 = arith.addf %735, %736 : vector<8x128xf32>
    %738 = arith.negf %737 : vector<8x128xf32>
    %739 = math.exp %738 : vector<8x128xf32>
    %cst_228 = arith.constant 1.000000e+00 : f32
    %740 = vector.broadcast %cst_228 : f32 to vector<8x128xf32>
    %741 = arith.addf %740, %739 : vector<8x128xf32>
    %742 = arith.divf %740, %741 : vector<8x128xf32>
    %743 = math.tanh %737 : vector<8x128xf32>
    %744 = vector.extract_strided_slice %742 {offsets = [0, 32], sizes = [8, 32], strides = [1, 1]} : vector<8x128xf32> to vector<8x32xf32>
    %745 = arith.mulf %744, %724 : vector<8x32xf32>
    %746 = vector.extract_strided_slice %742 {offsets = [0, 0], sizes = [8, 32], strides = [1, 1]} : vector<8x128xf32> to vector<8x32xf32>
    %747 = vector.extract_strided_slice %743 {offsets = [0, 64], sizes = [8, 32], strides = [1, 1]} : vector<8x128xf32> to vector<8x32xf32>
    %748 = arith.mulf %746, %747 : vector<8x32xf32>
    %749 = arith.addf %745, %748 : vector<8x32xf32>
    %750 = vector.extract_strided_slice %742 {offsets = [0, 96], sizes = [8, 32], strides = [1, 1]} : vector<8x128xf32> to vector<8x32xf32>
    %751 = math.tanh %749 : vector<8x32xf32>
    %752 = arith.mulf %750, %751 : vector<8x32xf32>
    %c8_i32_229 = arith.constant 8 : i32
    %753 = arith.muli %c5_i32_224, %c8_i32_229 : i32
    %754 = tpu.assume_multiple %753, 8 : i32
    %755 = arith.index_cast %754 : i32 to index
    %c0_230 = arith.constant 0 : index
    %756 = vector.load %arg18[%755, %c0_230] : memref<64x32xf32, #tpu.memory_space<vmem>>, vector<8x32xf32>
    tpu.vector_store %arg18[%755, %c0_230], %752 {strides = array<i32>} : memref<64x32xf32, #tpu.memory_space<vmem>>, vector<8x32xf32>,
    %c6_i32_231 = arith.constant 6 : i32
    %c8_i32_232 = arith.constant 8 : i32
    %757 = arith.muli %c6_i32_231, %c8_i32_232 : i32
    %758 = tpu.assume_multiple %757, 8 : i32
    %759 = arith.index_cast %758 : i32 to index
    %c0_233 = arith.constant 0 : index
    %760 = vector.load %arg17[%759, %c0_233] : memref<64x128xf32, #tpu.memory_space<vmem>>, vector<8x128xf32>
    %cst_234 = arith.constant dense<0.000000e+00> : vector<8x128xf32>
    %761 = tpu.matmul %752, %605, %cst_234 {dimension_numbers = #tpu.dot_dimension_numbers<[1], [0], [0], [1], [0, 0, 1, 1], [], []>} : vector<8x32xf32>, vector<32x128xf32>, vector<8x128xf32> -> vector<8x128xf32>
    %762 = arith.addf %760, %761 : vector<8x128xf32>
    %763 = arith.negf %762 : vector<8x128xf32>
    %764 = math.exp %763 : vector<8x128xf32>
    %cst_235 = arith.constant 1.000000e+00 : f32
    %765 = vector.broadcast %cst_235 : f32 to vector<8x128xf32>
    %766 = arith.addf %765, %764 : vector<8x128xf32>
    %767 = arith.divf %765, %766 : vector<8x128xf32>
    %768 = math.tanh %762 : vector<8x128xf32>
    %769 = vector.extract_strided_slice %767 {offsets = [0, 32], sizes = [8, 32], strides = [1, 1]} : vector<8x128xf32> to vector<8x32xf32>
    %770 = arith.mulf %769, %749 : vector<8x32xf32>
    %771 = vector.extract_strided_slice %767 {offsets = [0, 0], sizes = [8, 32], strides = [1, 1]} : vector<8x128xf32> to vector<8x32xf32>
    %772 = vector.extract_strided_slice %768 {offsets = [0, 64], sizes = [8, 32], strides = [1, 1]} : vector<8x128xf32> to vector<8x32xf32>
    %773 = arith.mulf %771, %772 : vector<8x32xf32>
    %774 = arith.addf %770, %773 : vector<8x32xf32>
    %775 = vector.extract_strided_slice %767 {offsets = [0, 96], sizes = [8, 32], strides = [1, 1]} : vector<8x128xf32> to vector<8x32xf32>
    %776 = math.tanh %774 : vector<8x32xf32>
    %777 = arith.mulf %775, %776 : vector<8x32xf32>
    %c8_i32_236 = arith.constant 8 : i32
    %778 = arith.muli %c6_i32_231, %c8_i32_236 : i32
    %779 = tpu.assume_multiple %778, 8 : i32
    %780 = arith.index_cast %779 : i32 to index
    %c0_237 = arith.constant 0 : index
    %781 = vector.load %arg18[%780, %c0_237] : memref<64x32xf32, #tpu.memory_space<vmem>>, vector<8x32xf32>
    tpu.vector_store %arg18[%780, %c0_237], %777 {strides = array<i32>} : memref<64x32xf32, #tpu.memory_space<vmem>>, vector<8x32xf32>,
    %c7_i32_238 = arith.constant 7 : i32
    %c8_i32_239 = arith.constant 8 : i32
    %782 = arith.muli %c7_i32_238, %c8_i32_239 : i32
    %783 = tpu.assume_multiple %782, 8 : i32
    %784 = arith.index_cast %783 : i32 to index
    %c0_240 = arith.constant 0 : index
    %785 = vector.load %arg17[%784, %c0_240] : memref<64x128xf32, #tpu.memory_space<vmem>>, vector<8x128xf32>
    %cst_241 = arith.constant dense<0.000000e+00> : vector<8x128xf32>
    %786 = tpu.matmul %777, %605, %cst_241 {dimension_numbers = #tpu.dot_dimension_numbers<[1], [0], [0], [1], [0, 0, 1, 1], [], []>} : vector<8x32xf32>, vector<32x128xf32>, vector<8x128xf32> -> vector<8x128xf32>
    %787 = arith.addf %785, %786 : vector<8x128xf32>
    %788 = arith.negf %787 : vector<8x128xf32>
    %789 = math.exp %788 : vector<8x128xf32>
    %cst_242 = arith.constant 1.000000e+00 : f32
    %790 = vector.broadcast %cst_242 : f32 to vector<8x128xf32>
    %791 = arith.addf %790, %789 : vector<8x128xf32>
    %792 = arith.divf %790, %791 : vector<8x128xf32>
    %793 = math.tanh %787 : vector<8x128xf32>
    %794 = vector.extract_strided_slice %792 {offsets = [0, 32], sizes = [8, 32], strides = [1, 1]} : vector<8x128xf32> to vector<8x32xf32>
    %795 = arith.mulf %794, %774 : vector<8x32xf32>
    %796 = vector.extract_strided_slice %792 {offsets = [0, 0], sizes = [8, 32], strides = [1, 1]} : vector<8x128xf32> to vector<8x32xf32>
    %797 = vector.extract_strided_slice %793 {offsets = [0, 64], sizes = [8, 32], strides = [1, 1]} : vector<8x128xf32> to vector<8x32xf32>
    %798 = arith.mulf %796, %797 : vector<8x32xf32>
    %799 = arith.addf %795, %798 : vector<8x32xf32>
    %800 = vector.extract_strided_slice %792 {offsets = [0, 96], sizes = [8, 32], strides = [1, 1]} : vector<8x128xf32> to vector<8x32xf32>
    %801 = math.tanh %799 : vector<8x32xf32>
    %802 = arith.mulf %800, %801 : vector<8x32xf32>
    %c8_i32_243 = arith.constant 8 : i32
    %803 = arith.muli %c7_i32_238, %c8_i32_243 : i32
    %804 = tpu.assume_multiple %803, 8 : i32
    %805 = arith.index_cast %804 : i32 to index
    %c0_244 = arith.constant 0 : index
    %806 = vector.load %arg18[%805, %c0_244] : memref<64x32xf32, #tpu.memory_space<vmem>>, vector<8x32xf32>
    tpu.vector_store %arg18[%805, %c0_244], %802 {strides = array<i32>} : memref<64x32xf32, #tpu.memory_space<vmem>>, vector<8x32xf32>,
    %c8_i32_245 = arith.constant 8 : i32
    %c0_246 = arith.constant 0 : index
    %c0_247 = arith.constant 0 : index
    %807 = vector.load %arg18[%c0_246, %c0_247] : memref<64x32xf32, #tpu.memory_space<vmem>>, vector<64x32xf32>
    %808 = arith.truncf %807 : vector<64x32xf32> to vector<64x32xbf16>
    %c0_248 = arith.constant 0 : index
    %c0_249 = arith.constant 0 : index
    %809 = vector.load %arg14[%c0_248, %c0_249] : memref<32x128xbf16, #tpu.memory_space<vmem>>, vector<32x128xbf16>
    %cst_250 = arith.constant dense<0.000000e+00> : vector<64x128xf32>
    %810 = tpu.matmul %808, %809, %cst_250 {dimension_numbers = #tpu.dot_dimension_numbers<[1], [0], [0], [1], [0, 0, 1, 1], [], []>} : vector<64x32xbf16>, vector<32x128xbf16>, vector<64x128xf32> -> vector<64x128xf32>
    %c0_251 = arith.constant 0 : index
    %c0_252 = arith.constant 0 : index
    %811 = vector.load %arg15[%c0_251, %c0_252] : memref<1x128xf32, #tpu.memory_space<vmem>>, vector<1x128xf32>
    %812 = vector.broadcast %811 : vector<1x128xf32> to vector<64x128xf32>
    %813 = arith.addf %810, %812 : vector<64x128xf32>
    %c0_253 = arith.constant 0 : index
    %c0_254 = arith.constant 0 : index
    %c0_255 = arith.constant 0 : index
    %814 = vector.load %arg16[%c0_253, %c0_254, %c0_255] : memref<1x64x128xf32, #tpu.memory_space<vmem>>, vector<1x64x128xf32>
    %815 = vector.shape_cast %814 : vector<1x64x128xf32> to vector<64x128xf32>
    %816 = vector.shape_cast %813 : vector<64x128xf32> to vector<1x64x128xf32>
    tpu.vector_store %arg16[%c0_253, %c0_254, %c0_255], %816 {strides = array<i32>} : memref<1x64x128xf32, #tpu.memory_space<vmem>>, vector<1x64x128xf32>,
    return
  }
  func.func @transform_0(%arg0: i32) -> (i32, i32, i32) {
    %c0_i32 = arith.constant 0 : i32
    %c0_i32_0 = arith.constant 0 : i32
    %c0_i32_1 = arith.constant 0 : i32
    return %arg0, %c0_i32, %c0_i32_0 : i32, i32, i32
  }
  func.func @transform_1(%arg0: i32) -> (i32, i32) {
    %c0_i32 = arith.constant 0 : i32
    %c0_i32_0 = arith.constant 0 : i32
    %c0_i32_1 = arith.constant 0 : i32
    return %c0_i32, %c0_i32_0 : i32, i32
  }
  func.func @transform_2(%arg0: i32) -> (i32, i32) {
    %c0_i32 = arith.constant 0 : i32
    %c0_i32_0 = arith.constant 0 : i32
    %c0_i32_1 = arith.constant 0 : i32
    return %c0_i32, %c0_i32_0 : i32, i32
  }
  func.func @transform_3(%arg0: i32) -> (i32, i32) {
    %c0_i32 = arith.constant 0 : i32
    %c0_i32_0 = arith.constant 0 : i32
    %c0_i32_1 = arith.constant 0 : i32
    return %c0_i32, %c0_i32_0 : i32, i32
  }
  func.func @transform_4(%arg0: i32) -> (i32, i32) {
    %c0_i32 = arith.constant 0 : i32
    %c0_i32_0 = arith.constant 0 : i32
    %c0_i32_1 = arith.constant 0 : i32
    return %c0_i32, %c0_i32_0 : i32, i32
  }
  func.func @transform_5(%arg0: i32) -> (i32, i32) {
    %c0_i32 = arith.constant 0 : i32
    %c0_i32_0 = arith.constant 0 : i32
    %c0_i32_1 = arith.constant 0 : i32
    return %c0_i32, %c0_i32_0 : i32, i32
  }
  func.func @transform_6(%arg0: i32) -> (i32, i32) {
    %c0_i32 = arith.constant 0 : i32
    %c0_i32_0 = arith.constant 0 : i32
    %c0_i32_1 = arith.constant 0 : i32
    return %c0_i32, %c0_i32_0 : i32, i32
  }
  func.func @transform_7(%arg0: i32) -> (i32, i32) {
    %c0_i32 = arith.constant 0 : i32
    %c0_i32_0 = arith.constant 0 : i32
    %c0_i32_1 = arith.constant 0 : i32
    return %c0_i32, %c0_i32_0 : i32, i32
  }
  func.func @transform_8(%arg0: i32) -> (i32, i32) {
    %c0_i32 = arith.constant 0 : i32
    %c0_i32_0 = arith.constant 0 : i32
    %c0_i32_1 = arith.constant 0 : i32
    return %c0_i32, %c0_i32_0 : i32, i32
  }
  func.func @transform_9(%arg0: i32) -> (i32, i32) {
    %c0_i32 = arith.constant 0 : i32
    %c0_i32_0 = arith.constant 0 : i32
    %c0_i32_1 = arith.constant 0 : i32
    return %c0_i32, %c0_i32_0 : i32, i32
  }
  func.func @transform_10(%arg0: i32) -> (i32, i32) {
    %c0_i32 = arith.constant 0 : i32
    %c0_i32_0 = arith.constant 0 : i32
    %c0_i32_1 = arith.constant 0 : i32
    return %c0_i32, %c0_i32_0 : i32, i32
  }
  func.func @transform_11(%arg0: i32) -> (i32, i32) {
    %c0_i32 = arith.constant 0 : i32
    %c0_i32_0 = arith.constant 0 : i32
    %c0_i32_1 = arith.constant 0 : i32
    return %c0_i32, %c0_i32_0 : i32, i32
  }
  func.func @transform_12(%arg0: i32) -> (i32, i32) {
    %c0_i32 = arith.constant 0 : i32
    %c0_i32_0 = arith.constant 0 : i32
    %c0_i32_1 = arith.constant 0 : i32
    return %c0_i32, %c0_i32_0 : i32, i32
  }
  func.func @transform_13(%arg0: i32) -> (i32, i32) {
    %c0_i32 = arith.constant 0 : i32
    %c0_i32_0 = arith.constant 0 : i32
    %c0_i32_1 = arith.constant 0 : i32
    return %c0_i32, %c0_i32_0 : i32, i32
  }
  func.func @transform_14(%arg0: i32) -> (i32, i32) {
    %c0_i32 = arith.constant 0 : i32
    %c0_i32_0 = arith.constant 0 : i32
    %c0_i32_1 = arith.constant 0 : i32
    return %c0_i32, %c0_i32_0 : i32, i32
  }
  func.func @transform_15(%arg0: i32) -> (i32, i32, i32) {
    %c0_i32 = arith.constant 0 : i32
    %c0_i32_0 = arith.constant 0 : i32
    %c0_i32_1 = arith.constant 0 : i32
    return %arg0, %c0_i32, %c0_i32_0 : i32, i32, i32
  }
}

</mosaic_0001>

<bundles_post_ra>
// kernel: lstm_autoencoder_forward.1
= control target key start
LH: loop header
LB: loop body
LE: loop exit
PB: predicated region body
PF: predicated region fallthrough
CT: control target
= control target key end

     0   :  { %20 = vsyncpa [#allocation5], 0  ;;  %s5095_s18 = smov [#allocation4]   ;;  %s5863_s0 = inlined_call_operand.vmem [shape: f32[1,64,16], index: 0, kind: input, shape index: {}]   ;;  %s5864_s1 = inlined_call_operand.vmem [shape: bf16[16,128], index: 1, kind: input, shape index: {}]   ;;  %s5865_s2 = inlined_call_operand.vmem [shape: f32[32,128], index: 2, kind: input, shape index: {}]   ;;  %s5866_s3 = inlined_call_operand.hbm [shape: f32[1,128], index: 3, kind: input, shape index: {}]   ;;  %s5867_s4 = inlined_call_operand.vmem [shape: bf16[32,128], index: 4, kind: input, shape index: {}]   ;;  %s5868_s5 = inlined_call_operand.vmem [shape: f32[32,128], index: 5, kind: input, shape index: {}]   ;;  %s5869_s6 = inlined_call_operand.vmem [shape: f32[1,128], index: 6, kind: input, shape index: {}]   ;;  %s5870_s7 = inlined_call_operand.vmem [shape: bf16[32,128], index: 7, kind: input, shape index: {}]   ;;  %s5871_s8 = inlined_call_operand.vmem [shape: f32[32,128], index: 8, kind: input, shape index: {}]   ;;  %s5872_s9 = inlined_call_operand.vmem [shape: f32[1,128], index: 9, kind: input, shape index: {}]   ;;  %s5873_s10 = inlined_call_operand.vmem [shape: bf16[32,128], index: 10, kind: input, shape index: {}]   ;;  %s5874_s11 = inlined_call_operand.vmem [shape: f32[32,128], index: 11, kind: input, shape index: {}]   ;;  %s5875_s12 = inlined_call_operand.vmem [shape: f32[1,128], index: 12, kind: input, shape index: {}]   ;;  %s5876_s13 = inlined_call_operand.vmem [shape: bf16[32,128], index: 13, kind: input, shape index: {}]   ;;  %s5877_s14 = inlined_call_operand.vmem [shape: f32[1,128], index: 14, kind: input, shape index: {}]   ;;  %s5878_s15 = inlined_call_operand.vmem [shape: f32[1,64,128], index: 15, kind: output, shape index: {}]  }
   0x1   :  { %s33_s19 = sshll.u32 %s5095_s18, 4  ;;  %s5071_s22 = scalar_lea.hbm %s5866_s3, 16  ;;  %s34_s19 = int_to_ptr.vmem [resolvable:$true] %s33_s19 }
   0x2   :  { %p5072_p0 = scmp.ne.s32.totalorder %s5866_s3, %s5071_s22  ;;  %p5075_p1 = scmp.lt.u32.totalorder %s5071_s22, %s5866_s3 }
   0x4   :  { %p5077_p2 = pnand %p5075_p1, %p5072_p0 }
   0x6   :  { %5080 = shalt.err (!%p5077_p2)
}
   0x7   :  { %s5081_s27 = scalar_lea.vmem %s34_s19, 16  ;;  %s5085_s28 = scalar_lea.vmem %s34_s19, 32 }
   0x8   :  { %p5082_p3 = scmp.ne.s32.totalorder %s34_s19, %s5081_s27  ;;  %p5086_p4 = scmp.lt.s32.totalorder %s34_s19, %s34_s19 }
   0x9   :  { %p5087_p5 = scmp.lt.s32.totalorder %s5085_s28, %s5081_s27 }
   0xb   :  { %p5088_p6 = por %p5087_p5, %p5086_p4 }
   0xd   :  { %p5089_p7 = pnand %p5088_p6, %p5082_p3 }
   0xf   :  { %5092 = shalt.err (!%p5089_p7)
}
  0x10   :  { %36 = dma.hbm_to_vmem [thread:$0]  %s5866_s3, 16, %s34_s19, [#allocation5]  }
  0x11   :  { %5093 = dma.done.wait [#allocation5], 16  }
  0x12   :  { %5094 = vsyncadd [#allocation5], 4294967280  ;;  %v5096_v0 = vmov 0.0|0.0   ;;  %vm5097_vm0 = vmmov 0   ;;  %v5098_v1 = vmov 0.0   ;;  %v4806_v2 = vld [vmem:[%s5864_s1] sm:$0xff]  }
  0x13   :  { %4614 = vmatprep.subr.bf16.mxu1 %v5096_v0  ;;  %4231 = vmatprep.mubr.msk.f32.mxu1 %vm5097_vm0, %v5098_v1  ;;  %v63_v3 = vld [vmem:[%s5863_s0] sm:$0xff]  ;;  %v64_v4 = vld [vmem:[%s5863_s0 + $0x8] sm:$0xff]  ;;  %vm90_vm1 = vcmask 130048   ;;  %v65_v5 = vld [vmem:[%s5863_s0 + $0x10] sm:$0xff]  ;;  %vm181_vm2 = vcmask 261120  }
  0x14   :  { %4202 = vmatprep.subr.bf16.mxu0 %v4806_v2  ;;  %v71_v6 = vpack.c.bf16 %v64_v4, %v63_v3  ;;  %v66_v7 = vld [vmem:[%s5863_s0 + $0x18] sm:$0xff]  ;;  %v176_v8 = vld [vmem:[%s5865_s2] sm:$0xff]  ;;  %v177_v9 = vld [vmem:[%s5865_s2 + $0x8] sm:$0xff] }
  0x15   :  { %4203 = vmatpush3.bf16.msra.mxu0 %v4806_v2  ;;  %v72_v10 = vpack.c.bf16 %v66_v7, %v65_v5  ;;  %v5217_v11 = vpack.c.bf16 %v177_v9, %v176_v8  ;;  %v67_v12 = vld [vmem:[%s5863_s0 + $0x20] sm:$0xff]  ;;  %v68_v13 = vld [vmem:[%s5863_s0 + $0x28] sm:$0xff]  ;;  %v178_v15 = vld [vmem:[%s5865_s2 + $0x10] sm:$0xff] }
  0x16   :  { %4204 = vmatprep.mubr.msk.bf16.mxu0 %vm90_vm1, %v71_v6  ;;  %4608 = vmatprep.subr.bf16.mxu0 %v5096_v0  ;;  %v73_v14 = vpack.c.bf16 %v68_v13, %v67_v12  ;;  %v179_v16 = vld [vmem:[%s5865_s2 + $0x18] sm:$0xff]  ;;  %v69_v17 = vld [vmem:[%s5863_s0 + $0x30] sm:$0xff]  ;;  %v3925_v21 = vld [vmem:[#allocation4] ss:$0 sm:$0xff]  ;;  %s5100_s2 = smov 32  }
  0x17   :  { %v70_v18 = vld [vmem:[%s5863_s0 + $0x38] sm:$0xff]  ;;  %4616 = vmatpush3.bf16.msra.mxu1 %v5217_v11  ;;  %v5244_v19 = vpack.c.bf16 %v179_v16, %v178_v15  ;;  %s5099_s0 = smov 64  }
  0x18   :  { %4205 = vmatmul.mubr.msk.bf16.vlgmr.msra.gmra.mrb[0].mxu0 %vm90_vm1, %v72_v10  ;;  %4617 = vmatprep.subr.bf16.mxu1 %v5096_v0  ;;  %v74_v20 = vpack.c.bf16 %v70_v18, %v69_v17 }
  0x19   :  { %4610 = vmatpush3.bf16.msra.mxu0 %v5217_v11  ;;  %4208 = vmatprep.mubr.msk.bf16.mxu0 %vm90_vm1, %v73_v14 }
  0x1a   :  { %4611 = vmatprep.subr.bf16.mxu0 %v5096_v0 }
  0x1b   :  { %4619 = vmatpush3.bf16.msra.mxu1 %v5244_v19 }
  0x1c   :  { %4626 = vmatprep.subr.bf16.mxu1 %v5096_v0 }
  0x1d   :  { %4613 = vmatpush3.bf16.msra.mxu0 %v5244_v19 }
  0x1e   :  { %4620 = vmatprep.subr.bf16.mxu0 %v5096_v0 }
  0x20   :  { %4209 = vmatmul.mubr.msk.bf16.gmra.mrb[4].mxu0 %vm90_vm1, %v74_v20 }
  0x21   :  { %4220 = vmatprep.mubr.msk.f32.mxu0 %vm5097_vm0, %v5098_v1 }
  0x28   :  { %4221 = vmatmul.mubr.f32.vlgmr.msra.gmra.mrb[8].mxu0 %v5098_v1 }
  0x29   :  { %4622 = vmatpush3.bf16.msra.mxu0 %v5217_v11  ;;  %4242 = vmatprep.mubr.msk.f32.mxu0 %vm5097_vm0, %v5098_v1 }
  0x2a   :  { %4623 = vmatprep.subr.bf16.mxu0 %v5096_v0 }
  0x2d   :  { %4625 = vmatpush3.bf16.msra.mxu0 %v5244_v19 }
  0x2e   :  { %4632 = vmatprep.subr.bf16.mxu0 %v5096_v0 }
  0xeb   :  { %v4206_v22 = vpop.f32.mrb[0].mxu0 }
  0xec   :  { %v5261_v23 = vadd.f32 %v4206_v22, %v3925_v21  ;;  %v137_v24 = vpop.f32.mrb[1].mxu0 }
  0xed   :  { %v4207_v25 = vpop.f32.mrb[2].mxu0  ;;  %v138_v37 = vadd.f32 %v3925_v21, %v137_v24 }
  0xee   :  { %v5263_v26 = vadd.f32 %v4207_v25, %v3925_v21  ;;  %v140_v27 = vpop.f32.mrb[3].mxu0 }
  0xef   :  { %v141_v28 = vadd.f32 %v3925_v21, %v140_v27 }
  0xf3   :  { %v4210_v29 = vpop.f32.mrb[4].mxu0 }
  0xf4   :  { %v5265_v30 = vadd.f32 %v4210_v29, %v3925_v21  ;;  %v153_v31 = vpop.f32.mrb[5].mxu0 }
  0xf5   :  { %v5267_v32 = vadd.f32 %v3925_v21, %v153_v31  ;;  %v4211_v33 = vpop.f32.mrb[6].mxu0 }
  0xf6   :  { %v5269_v34 = vadd.f32 %v4211_v33, %v3925_v21  ;;  %v156_v35 = vpop.f32.mrb[7].mxu0 }
  0xf7   :  { %v5271_v36 = vadd.f32 %v3925_v21, %v156_v35 }
  0xfb   :  { %v251_v38 = vpop.f32.mrb[8].mxu0 }
  0xfc   :  { %v255_v39 = vadd.f32 %v251_v38, %v138_v37  ;;  %v4222_v40 = vpop.f32.mrb[9].mxu0 }
  0xfe   :  { %4815 = vtanh.f32 %v255_v39  ;;  %v3931_v42 = vmul.f32 -1.442695, %v255_v39 }
 0x100   :  { %4817 = vpow2.f32 %v3931_v42 }
 0x108   :  { %v4816_v41 = vpop.eup %4815 }
 0x109   :  { %265 = vrot.lane.b32.xlu0 %v4816_v41, %s5099_s0 }
 0x10a   :  { %v4818_v43 = vpop.eup %4817 }
 0x10b   :  { %v259_v44 = vadd.f32 1.0, %v4818_v43 }
 0x10d   :  { %4819 = vrcp.f32 %v259_v44 }
 0x117   :  { %v4820_v45 = vpop.eup %4819 }
 0x118   :  { %v263_v48 = vmul.f32 0.0, %v4820_v45 }
 0x17b   :  { %v266_v46 = vpop.permute.xlu0 %265 }
 0x17c   :  { %v268_v47 = vmul.f32 %v4820_v45, %v266_v46 }
 0x17e   :  { %270 = vrot.lane.b32.xlu0 %v268_v47, %s5100_s2 }
 0x1f0   :  { %v271_v49 = vpop.permute.xlu0 %270 }
 0x1f1   :  { %v273_v50 = vadd.f32 %v271_v49, %v263_v48 }
 0x1f3   :  { %4821 = vtanh.f32 %v273_v50 }
 0x1fd   :  { %v4822_v51 = vpop.eup %4821 }
 0x1fe   :  { %276 = vrot.lane.b32.xlu1 %v4822_v51, %s5099_s0 }
 0x270   :  { %v277_v52 = vpop.permute.xlu1 %276 }
 0x271   :  { %v279_v53 = vmul.f32 %v4820_v45, %v277_v52 }
 0x273   :  { %281 = vrot.lane.b32.xlu1 %v279_v53, %s5100_s2 }
 0x2e5   :  { %v282_v54 = vpop.permute.xlu1 %281 }
 0x2e6   :  { %284 = vst.msk [vmem:[#allocation3] sm:$0xff] %vm181_vm2, %v282_v54  ;;  %4232 = vmatmul.mubr.msk.f32.vlgmr.msra.gmra.mrb[0].mxu1 %vm181_vm2, %v282_v54 }
 0x2e7   :  { %4628 = vmatpush3.bf16.msra.mxu1 %v5217_v11  ;;  %4253 = vmatprep.mubr.msk.f32.mxu1 %vm5097_vm0, %v5098_v1 }
 0x2e8   :  { %4629 = vmatprep.subr.bf16.mxu1 %v5096_v0 }
 0x2eb   :  { %4631 = vmatpush3.bf16.msra.mxu1 %v5244_v19 }
 0x2ec   :  { %4638 = vmatprep.subr.bf16.mxu1 %v5096_v0 }
 0x3b9   :  { %v355_v55 = vpop.f32.mrb[0].mxu1 }
 0x3ba   :  { %v359_v56 = vadd.f32 %v355_v55, %v141_v28  ;;  %v4233_v57 = vpop.f32.mrb[1].mxu1 }
 0x3bc   :  { %4823 = vtanh.f32 %v359_v56  ;;  %v3933_v59 = vmul.f32 -1.442695, %v359_v56 }
 0x3be   :  { %4825 = vpow2.f32 %v3933_v59 }
 0x3c6   :  { %v4824_v58 = vpop.eup %4823 }
 0x3c7   :  { %369 = vrot.lane.b32.xlu0 %v4824_v58, %s5099_s0 }
 0x3c8   :  { %v4826_v60 = vpop.eup %4825 }
 0x3c9   :  { %v363_v61 = vadd.f32 1.0, %v4826_v60 }
 0x3cb   :  { %4827 = vrcp.f32 %v363_v61 }
 0x3d5   :  { %v4828_v62 = vpop.eup %4827 }
 0x3d6   :  { %v367_v3 = vmul.f32 %v4828_v62, %v273_v50 }
 0x439   :  { %v370_v63 = vpop.permute.xlu0 %369 }
 0x43a   :  { %v372_v2 = vmul.f32 %v4828_v62, %v370_v63 }
 0x43c   :  { %374 = vrot.lane.b32.xlu1 %v372_v2, %s5100_s2 }
 0x4ae   :  { %v375_v4 = vpop.permute.xlu1 %374 }
 0x4af   :  { %v377_v5 = vadd.f32 %v375_v4, %v367_v3 }
 0x4b1   :  { %4829 = vtanh.f32 %v377_v5 }
 0x4bb   :  { %v4830_v6 = vpop.eup %4829 }
 0x4bc   :  { %380 = vrot.lane.b32.xlu0 %v4830_v6, %s5099_s0 }
 0x52e   :  { %v381_v7 = vpop.permute.xlu0 %380 }
 0x52f   :  { %v383_v8 = vmul.f32 %v4828_v62, %v381_v7 }
 0x531   :  { %385 = vrot.lane.b32.xlu1 %v383_v8, %s5100_s2 }
 0x5a3   :  { %v386_v9 = vpop.permute.xlu1 %385 }
 0x5a4   :  { %389 = vst.msk [vmem:[#allocation3 + $0x8] sm:$0xff] %vm181_vm2, %v386_v9  ;;  %4243 = vmatmul.mubr.msk.f32.vlgmr.msra.gmra.mrb[10].mxu0 %vm181_vm2, %v386_v9 }
 0x5a5   :  { %4634 = vmatpush3.bf16.msra.mxu0 %v5217_v11  ;;  %4264 = vmatprep.mubr.msk.f32.mxu0 %vm5097_vm0, %v5098_v1 }
 0x5a6   :  { %4635 = vmatprep.subr.bf16.mxu0 %v5096_v0 }
 0x5a9   :  { %4637 = vmatpush3.bf16.msra.mxu0 %v5244_v19 }
 0x5aa   :  { %4644 = vmatprep.subr.bf16.mxu0 %v5096_v0 }
 0x677   :  { %v460_v10 = vpop.f32.mrb[10].mxu0 }
 0x678   :  { %v464_v12 = vadd.f32 %v460_v10, %v5261_v23  ;;  %v4244_v13 = vpop.f32.mrb[11].mxu0 }
 0x67a   :  { %4831 = vtanh.f32 %v464_v12  ;;  %v3935_v15 = vmul.f32 -1.442695, %v464_v12 }
 0x67c   :  { %4833 = vpow2.f32 %v3935_v15 }
 0x684   :  { %v4832_v14 = vpop.eup %4831 }
 0x685   :  { %474 = vrot.lane.b32.xlu0 %v4832_v14, %s5099_s0 }
 0x686   :  { %v4834_v16 = vpop.eup %4833 }
 0x687   :  { %v468_v17 = vadd.f32 1.0, %v4834_v16 }
 0x689   :  { %4835 = vrcp.f32 %v468_v17 }
 0x693   :  { %v4836_v18 = vpop.eup %4835 }
 0x694   :  { %v472_v22 = vmul.f32 %v4836_v18, %v377_v5 }
 0x6f7   :  { %v475_v20 = vpop.permute.xlu0 %474 }
 0x6f8   :  { %v477_v21 = vmul.f32 %v4836_v18, %v475_v20  ;;  %v1021_v20 = vld [vmem:[#allocation3 + $0x8] sm:$0xff] }
 0x6fa   :  { %479 = vrot.lane.b32.xlu1 %v477_v21, %s5100_s2  ;;  %v1020_v21 = vld [vmem:[#allocation3] sm:$0xff] }
 0x76c   :  { %v480_v24 = vpop.permute.xlu1 %479 }
 0x76d   :  { %v482_v25 = vadd.f32 %v480_v24, %v472_v22  ;;  %v4808_v22 = vld [vmem:[%s5867_s4 + $0x8] sm:$0xff]  }
 0x76f   :  { %4837 = vtanh.f32 %v482_v25 }
 0x779   :  { %v4838_v23 = vpop.eup %4837 }
 0x77a   :  { %485 = vrot.lane.b32.xlu0 %v4838_v23, %s5099_s0 }
 0x7ec   :  { %v486_v27 = vpop.permute.xlu0 %485 }
 0x7ed   :  { %v488_v28 = vmul.f32 %v4836_v18, %v486_v27 }
 0x7ef   :  { %490 = vrot.lane.b32.xlu1 %v488_v28, %s5100_s2 }
 0x861   :  { %v491_v29 = vpop.permute.xlu1 %490 }
 0x862   :  { %494 = vst.msk [vmem:[#allocation3 + $0x10] sm:$0xff] %vm181_vm2, %v491_v29  ;;  %4254 = vmatmul.mubr.msk.f32.vlgmr.msra.gmra.mrb[2].mxu1 %vm181_vm2, %v491_v29 }
 0x863   :  { %4640 = vmatpush3.bf16.msra.mxu1 %v5217_v11  ;;  %4275 = vmatprep.mubr.msk.f32.mxu1 %vm5097_vm0, %v5098_v1 }
 0x864   :  { %4641 = vmatprep.subr.bf16.mxu1 %v5096_v0 }
 0x867   :  { %4643 = vmatpush3.bf16.msra.mxu1 %v5244_v19 }
 0x868   :  { %4650 = vmatprep.subr.bf16.mxu1 %v5096_v0 }
 0x869   :  { %v1022_v27 = vld [vmem:[#allocation3 + $0x10] sm:$0xff] }
 0x935   :  { %v565_v31 = vpop.f32.mrb[2].mxu1 }
 0x936   :  { %v569_v33 = vadd.f32 %v565_v31, %v5263_v26  ;;  %v4255_v35 = vpop.f32.mrb[3].mxu1 }
 0x938   :  { %4839 = vtanh.f32 %v569_v33  ;;  %v3937_v38 = vmul.f32 -1.442695, %v569_v33 }
 0x93a   :  { %4841 = vpow2.f32 %v3937_v38 }
 0x942   :  { %v4840_v37 = vpop.eup %4839 }
 0x943   :  { %579 = vrot.lane.b32.xlu0 %v4840_v37, %s5099_s0 }
 0x944   :  { %v4842_v39 = vpop.eup %4841 }
 0x945   :  { %v573_v40 = vadd.f32 1.0, %v4842_v39 }
 0x947   :  { %4843 = vrcp.f32 %v573_v40 }
 0x951   :  { %v4844_v41 = vpop.eup %4843 }
 0x952   :  { %v577_v44 = vmul.f32 %v4844_v41, %v482_v25  ;;  %v1028_v25 = vpack.c.bf16 %v1021_v20, %v1020_v21 }
 0x9b5   :  { %v580_v42 = vpop.permute.xlu0 %579 }
 0x9b6   :  { %v582_v43 = vmul.f32 %v4844_v41, %v580_v42 }
 0x9b8   :  { %584 = vrot.lane.b32.xlu1 %v582_v43, %s5100_s2 }
 0xa2a   :  { %v585_v45 = vpop.permute.xlu1 %584 }
 0xa2b   :  { %v587_v46 = vadd.f32 %v585_v45, %v577_v44 }
 0xa2d   :  { %4845 = vtanh.f32 %v587_v46 }
 0xa37   :  { %v4846_v26 = vpop.eup %4845 }
 0xa38   :  { %590 = vrot.lane.b32.xlu0 %v4846_v26, %s5099_s0 }
 0xaaa   :  { %v591_v47 = vpop.permute.xlu0 %590 }
 0xaab   :  { %v593_v48 = vmul.f32 %v4844_v41, %v591_v47 }
 0xaad   :  { %595 = vrot.lane.b32.xlu1 %v593_v48, %s5100_s2 }
 0xb1f   :  { %v596_v49 = vpop.permute.xlu1 %595 }
 0xb20   :  { %599 = vst.msk [vmem:[#allocation3 + $0x18] sm:$0xff] %vm181_vm2, %v596_v49  ;;  %4265 = vmatmul.mubr.msk.f32.vlgmr.msra.gmra.mrb[12].mxu0 %vm181_vm2, %v596_v49 }
 0xb21   :  { %4646 = vmatpush3.bf16.msra.mxu0 %v5217_v11  ;;  %4286 = vmatprep.mubr.msk.f32.mxu0 %vm5097_vm0, %v5098_v1 }
 0xb22   :  { %4647 = vmatprep.subr.bf16.mxu0 %v5096_v0 }
 0xb25   :  { %4649 = vmatpush3.bf16.msra.mxu0 %v5244_v19 }
 0xb27   :  { %v1023_v23 = vld [vmem:[#allocation3 + $0x18] sm:$0xff] }
 0xb28   :  { %v1029_v28 = vpack.c.bf16 %v1023_v23, %v1022_v27 }
 0xbf3   :  { %v670_v50 = vpop.f32.mrb[12].mxu0 }
 0xbf4   :  { %v674_v51 = vadd.f32 %v670_v50, %v5267_v32  ;;  %v4266_v52 = vpop.f32.mrb[13].mxu0 }
 0xbf5   :  { %v1140_v52 = vld [vmem:[%s5868_s5] sm:$0xff] }
 0xbf6   :  { %4847 = vtanh.f32 %v674_v51  ;;  %v3939_v54 = vmul.f32 -1.442695, %v674_v51 }
 0xbf8   :  { %4849 = vpow2.f32 %v3939_v54 }
 0xc00   :  { %v4848_v53 = vpop.eup %4847 }
 0xc01   :  { %684 = vrot.lane.b32.xlu0 %v4848_v53, %s5099_s0  ;;  %v1141_v53 = vld [vmem:[%s5868_s5 + $0x8] sm:$0xff] }
 0xc02   :  { %v4850_v55 = vpop.eup %4849  ;;  %v5371_v54 = vpack.c.bf16 %v1141_v53, %v1140_v52 }
 0xc03   :  { %v678_v56 = vadd.f32 1.0, %v4850_v55  ;;  %v1142_v55 = vld [vmem:[%s5868_s5 + $0x10] sm:$0xff] }
 0xc05   :  { %4851 = vrcp.f32 %v678_v56  ;;  %v1143_v56 = vld [vmem:[%s5868_s5 + $0x18] sm:$0xff] }
 0xc0f   :  { %v4852_v57 = vpop.eup %4851 }
 0xc10   :  { %v682_v60 = vmul.f32 %v4852_v57, %v587_v46 }
 0xc73   :  { %v685_v58 = vpop.permute.xlu0 %684 }
 0xc74   :  { %v687_v59 = vmul.f32 %v4852_v57, %v685_v58 }
 0xc76   :  { %689 = vrot.lane.b32.xlu1 %v687_v59, %s5100_s2 }
 0xce8   :  { %v690_v61 = vpop.permute.xlu1 %689 }
 0xce9   :  { %v692_v62 = vadd.f32 %v690_v61, %v682_v60 }
 0xceb   :  { %4853 = vtanh.f32 %v692_v62 }
 0xcf5   :  { %v4854_v32 = vpop.eup %4853 }
 0xcf6   :  { %695 = vrot.lane.b32.xlu0 %v4854_v32, %s5099_s0 }
 0xd68   :  { %v696_v63 = vpop.permute.xlu0 %695 }
 0xd69   :  { %v698_v2 = vmul.f32 %v4852_v57, %v696_v63  ;;  %v5381_v57 = vpack.c.bf16 %v1143_v56, %v1142_v55  ;;  %v5405_v63 = vld [vmem:[%s5869_s6] ss:$0 sm:$0xff] }
 0xd6b   :  { %700 = vrot.lane.b32.xlu1 %v698_v2, %s5100_s2 }
 0xddd   :  { %v701_v3 = vpop.permute.xlu1 %700 }
 0xdde   :  { %704 = vst.msk [vmem:[#allocation3 + $0x20] sm:$0xff] %vm181_vm2, %v701_v3  ;;  %4276 = vmatmul.mubr.msk.f32.vlgmr.msra.gmra.mrb[4].mxu1 %vm181_vm2, %v701_v3 }
 0xddf   :  { %4652 = vmatpush3.bf16.msra.mxu1 %v5217_v11  ;;  %4297 = vmatprep.mubr.msk.f32.mxu1 %vm5097_vm0, %v5098_v1 }
 0xde0   :  { %4653 = vmatprep.subr.bf16.mxu1 %v5096_v0 }
 0xde3   :  { %4655 = vmatpush3.bf16.msra.mxu1 %v5244_v19 }
 0xde4   :  { %4656 = vmatprep.subr.bf16.mxu1 %v5096_v0 }
 0xde5   :  { %v1024_v29 = vld [vmem:[#allocation3 + $0x20] sm:$0xff] }
 0xeb1   :  { %v775_v4 = vpop.f32.mrb[4].mxu1 }
 0xeb2   :  { %v779_v5 = vadd.f32 %v775_v4, %v5271_v36  ;;  %v4277_v6 = vpop.f32.mrb[5].mxu1  ;;  %v4807_v36 = vld [vmem:[%s5867_s4] sm:$0xff]  }
 0xeb3   :  { %4300 = vmatprep.subr.bf16.mxu0 %v4807_v36 }
 0xeb4   :  { %4855 = vtanh.f32 %v779_v5  ;;  %v3941_v8 = vmul.f32 -1.442695, %v779_v5 }
 0xeb6   :  { %4857 = vpow2.f32 %v3941_v8 }
 0xebe   :  { %v4856_v7 = vpop.eup %4855 }
 0xebf   :  { %789 = vrot.lane.b32.xlu0 %v4856_v7, %s5099_s0 }
 0xec0   :  { %v4858_v11 = vpop.eup %4857 }
 0xec1   :  { %v783_v9 = vadd.f32 1.0, %v4858_v11 }
 0xec3   :  { %4859 = vrcp.f32 %v783_v9 }
 0xecd   :  { %v4860_v10 = vpop.eup %4859 }
 0xece   :  { %v787_v19 = vmul.f32 %v4860_v10, %v692_v62 }
 0xf31   :  { %v790_v12 = vpop.permute.xlu0 %789 }
 0xf32   :  { %v792_v13 = vmul.f32 %v4860_v10, %v790_v12 }
 0xf34   :  { %794 = vrot.lane.b32.xlu1 %v792_v13, %s5100_s2 }
 0xfa6   :  { %v795_v14 = vpop.permute.xlu1 %794 }
 0xfa7   :  { %v797_v15 = vadd.f32 %v795_v14, %v787_v19 }
 0xfa9   :  { %4861 = vtanh.f32 %v797_v15 }
 0xfb3   :  { %v4862_v16 = vpop.eup %4861 }
 0xfb4   :  { %800 = vrot.lane.b32.xlu0 %v4862_v16, %s5099_s0 }
0x1026   :  { %v801_v17 = vpop.permute.xlu0 %800 }
0x1027   :  { %v803_v18 = vmul.f32 %v4860_v10, %v801_v17 }
0x1029   :  { %805 = vrot.lane.b32.xlu1 %v803_v18, %s5100_s2 }
0x109b   :  { %v806_v24 = vpop.permute.xlu1 %805 }
0x109c   :  { %809 = vst.msk [vmem:[#allocation3 + $0x28] sm:$0xff] %vm181_vm2, %v806_v24  ;;  %4287 = vmatmul.mubr.msk.f32.vlgmr.msra.gmra.mrb[14].mxu0 %vm181_vm2, %v806_v24 }
0x109d   :  { %4301 = vmatpush3.bf16.msra.mxu0 %v4807_v36  ;;  %4304 = vmatprep.mubr.msk.bf16.mxu0 %vm181_vm2, %v1028_v25 }
0x109e   :  { %4302 = vmatprep.subr.bf16.mxu0 %v4808_v22 }
0x10a1   :  { %4303 = vmatpush3.bf16.msra.mxu0 %v4808_v22 }
0x10a2   :  { %4668 = vmatprep.subr.bf16.mxu0 %v5096_v0 }
0x10a3   :  { %v1025_v31 = vld [vmem:[#allocation3 + $0x28] sm:$0xff] }
0x10a4   :  { %4305 = vmatmul.mubr.msk.bf16.vlgmr.msra.gmra.mrb[16].mxu0 %vm181_vm2, %v1029_v28  ;;  %v1030_v33 = vpack.c.bf16 %v1025_v31, %v1024_v29 }
0x10a5   :  { %4670 = vmatpush3.bf16.msra.mxu0 %v5371_v54 }
0x10a6   :  { %4308 = vmatprep.mubr.msk.bf16.mxu0 %vm181_vm2, %v1030_v33  ;;  %4671 = vmatprep.subr.bf16.mxu0 %v5096_v0 }
0x10a9   :  { %4673 = vmatpush3.bf16.msra.mxu0 %v5381_v57 }
0x10aa   :  { %4680 = vmatprep.subr.bf16.mxu0 %v5096_v0 }
0x116f   :  { %v880_v35 = vpop.f32.mrb[14].mxu0 }
0x1170   :  { %v884_v37 = vadd.f32 %v880_v35, %v5265_v30  ;;  %v4288_v38 = vpop.f32.mrb[15].mxu0 }
0x1172   :  { %4863 = vtanh.f32 %v884_v37  ;;  %v3943_v44 = vmul.f32 -1.442695, %v884_v37 }
0x1174   :  { %4865 = vpow2.f32 %v3943_v44 }
0x1177   :  { %v5353_v39 = vpop.f32.mrb[16].mxu0 }
0x1178   :  { %v1101_v40 = vpop.f32.mrb[17].mxu0 }
0x1179   :  { %v5355_v41 = vpop.f32.mrb[18].mxu0  ;;  %v1102_v2 = vadd.f32 %v5405_v63, %v1101_v40 }
0x117a   :  { %v5357_v42 = vpop.f32.mrb[19].mxu0 }
0x117b   :  { %v1105_v35 = vadd.f32 %v5405_v63, %v5357_v42 }
0x117c   :  { %v4864_v43 = vpop.eup %4863 }
0x117d   :  { %894 = vrot.lane.b32.xlu0 %v4864_v43, %s5099_s0 }
0x117e   :  { %v4866_v45 = vpop.eup %4865 }
0x117f   :  { %v888_v46 = vadd.f32 1.0, %v4866_v45 }
0x1181   :  { %4867 = vrcp.f32 %v888_v46 }
0x118b   :  { %v4868_v26 = vpop.eup %4867 }
0x118c   :  { %v892_v48 = vmul.f32 %v4868_v26, %v797_v15 }
0x11ef   :  { %v895_v47 = vpop.permute.xlu0 %894 }
0x11f0   :  { %v897_v30 = vmul.f32 %v4868_v26, %v895_v47 }
0x11f2   :  { %899 = vrot.lane.b32.xlu1 %v897_v30, %s5100_s2 }
0x1264   :  { %v900_v49 = vpop.permute.xlu1 %899 }
0x1265   :  { %v5361_v50 = vadd.f32 %v900_v49, %v892_v48 }
0x1267   :  { %4869 = vtanh.f32 %v5361_v50 }
0x1271   :  { %v4870_v51 = vpop.eup %4869 }
0x1272   :  { %905 = vrot.lane.b32.xlu0 %v4870_v51, %s5099_s0 }
0x12e4   :  { %v906_v58 = vpop.permute.xlu0 %905 }
0x12e5   :  { %v908_v59 = vmul.f32 %v4868_v26, %v906_v58 }
0x12e7   :  { %910 = vrot.lane.b32.xlu1 %v908_v59, %s5100_s2 }
0x1359   :  { %v911_v60 = vpop.permute.xlu1 %910 }
0x135a   :  { %914 = vst.msk [vmem:[#allocation3 + $0x30] sm:$0xff] %vm181_vm2, %v911_v60  ;;  %4298 = vmatmul.mubr.msk.f32.vlgmr.msra.gmra.mrb[6].mxu1 %vm181_vm2, %v911_v60 }
0x135b   :  { %4658 = vmatpush3.bf16.msra.mxu1 %v5371_v54  ;;  %4320 = vmatprep.mubr.msk.f32.mxu1 %vm5097_vm0, %v5098_v1 }
0x135c   :  { %4659 = vmatprep.subr.bf16.mxu1 %v5096_v0 }
0x135f   :  { %4661 = vmatpush3.bf16.msra.mxu1 %v5381_v57 }
0x1360   :  { %4662 = vmatprep.subr.bf16.mxu1 %v5096_v0 }
0x1361   :  { %v1026_v45 = vld [vmem:[#allocation3 + $0x30] sm:$0xff] }
0x1362   :  { %4321 = vmatmul.mubr.f32.vlgmr.msra.gmra.mrb[8].mxu1 %v5098_v1 }
0x1363   :  { %4664 = vmatpush3.bf16.msra.mxu1 %v5371_v54  ;;  %4331 = vmatprep.mubr.msk.f32.mxu1 %vm5097_vm0, %v5098_v1 }
0x1364   :  { %4665 = vmatprep.subr.bf16.mxu1 %v5096_v0 }
0x1367   :  { %4667 = vmatpush3.bf16.msra.mxu1 %v5381_v57 }
0x1368   :  { %4674 = vmatprep.subr.bf16.mxu1 %v5096_v0 }
0x142d   :  { %v985_v61 = vpop.f32.mrb[6].mxu1 }
0x142e   :  { %v989_v62 = vadd.f32 %v985_v61, %v5269_v34  ;;  %v4299_v32 = vpop.f32.mrb[7].mxu1 }
0x1430   :  { %v3945_v36 = vmul.f32 -1.442695, %v989_v62 }
0x1435   :  { %v1211_v3 = vpop.f32.mrb[8].mxu1 }
0x1436   :  { %v1215_v4 = vadd.f32 %v1211_v3, %v1102_v2  ;;  %v4322_v5 = vpop.f32.mrb[9].mxu1  ;;  %v1110_v2 = vadd.f32 %v5353_v39, %v5405_v63 }
0x1438   :  { %4871 = vtanh.f32 %v1215_v4  ;;  %v3953_v7 = vmul.f32 -1.442695, %v1215_v4 }
0x143a   :  { %4873 = vpow2.f32 %v3953_v7 }
0x1442   :  { %v4872_v6 = vpop.eup %4871 }
0x1443   :  { %1225 = vrot.lane.b32.xlu0 %v4872_v6, %s5099_s0 }
0x1444   :  { %v4874_v8 = vpop.eup %4873 }
0x1445   :  { %v1219_v11 = vadd.f32 1.0, %v4874_v8 }
0x1447   :  { %4875 = vrcp.f32 %v1219_v11 }
0x1451   :  { %v4876_v34 = vpop.eup %4875 }
0x1452   :  { %v1223_v12 = vmul.f32 0.0, %v4876_v34 }
0x14b5   :  { %v1226_v9 = vpop.permute.xlu0 %1225 }
0x14b6   :  { %v1228_v10 = vmul.f32 %v4876_v34, %v1226_v9 }
0x14b8   :  { %1230 = vrot.lane.b32.xlu1 %v1228_v10, %s5100_s2 }
0x152a   :  { %v1231_v13 = vpop.permute.xlu1 %1230 }
0x152b   :  { %v1233_v19 = vadd.f32 %v1231_v13, %v1223_v12 }
0x152d   :  { %4877 = vtanh.f32 %v1233_v19 }
0x152e   :  { %4879 = vtanh.f32 %v989_v62 }
0x152f   :  { %4881 = vpow2.f32 %v3945_v36 }
0x1537   :  { %v4878_v14 = vpop.eup %4877 }
0x1538   :  { %1236 = vrot.lane.b32.xlu0 %v4878_v14, %s5099_s0  ;;  %v4880_v15 = vpop.eup %4879 }
0x1539   :  { %v4882_v16 = vpop.eup %4881 }
0x153a   :  { %v993_v17 = vadd.f32 1.0, %v4882_v16  ;;  %v1113_v16 = vadd.f32 %v5355_v41, %v5405_v63 }
0x153c   :  { %999 = vrot.lane.b32.xlu0 %v4880_v15, %s5099_s0  ;;  %4883 = vrcp.f32 %v993_v17 }
0x1546   :  { %v4884_v21 = vpop.eup %4883 }
0x1547   :  { %v997_v23 = vmul.f32 %v4884_v21, %v5361_v50 }
0x15aa   :  { %v1237_v18 = vpop.permute.xlu0 %1236 }
0x15ab   :  { %v1239_v20 = vmul.f32 %v4876_v34, %v1237_v18 }
0x15ad   :  { %1241 = vrot.lane.b32.xlu1 %v1239_v20, %s5100_s2 }
0x15ae   :  { %v1000_v22 = vpop.permute.xlu0 %999 }
0x15af   :  { %v1002_v24 = vmul.f32 %v4884_v21, %v1000_v22 }
0x15b1   :  { %1004 = vrot.lane.b32.xlu0 %v1002_v24, %s5100_s2 }
0x161f   :  { %v1242_v25 = vpop.permute.xlu1 %1241 }
0x1620   :  { %1244 = vst.msk [vmem:[#allocation3] sm:$0xff] %vm181_vm2, %v1242_v25  ;;  %4332 = vmatmul.mubr.msk.f32.vlgmr.msra.gmra.mrb[10].mxu1 %vm181_vm2, %v1242_v25 }
0x1621   :  { %4676 = vmatpush3.bf16.msra.mxu1 %v5371_v54  ;;  %4353 = vmatprep.mubr.msk.f32.mxu1 %vm5097_vm0, %v5098_v1 }
0x1622   :  { %4677 = vmatprep.subr.bf16.mxu1 %v5096_v0 }
0x1623   :  { %v1005_v27 = vpop.permute.xlu0 %1004 }
0x1624   :  { %v1007_v28 = vadd.f32 %v1005_v27, %v997_v23 }
0x1625   :  { %4679 = vmatpush3.bf16.msra.mxu1 %v5381_v57 }
0x1626   :  { %4885 = vtanh.f32 %v1007_v28  ;;  %4686 = vmatprep.subr.bf16.mxu1 %v5096_v0 }
0x1630   :  { %v4886_v29 = vpop.eup %4885 }
0x1631   :  { %1010 = vrot.lane.b32.xlu0 %v4886_v29, %s5099_s0 }
0x16a3   :  { %v1011_v31 = vpop.permute.xlu0 %1010 }
0x16a4   :  { %v1013_v33 = vmul.f32 %v4884_v21, %v1011_v31 }
0x16a6   :  { %1015 = vrot.lane.b32.xlu0 %v1013_v33, %s5100_s2 }
0x16f3   :  { %v1314_v37 = vpop.f32.mrb[10].mxu1 }
0x16f4   :  { %v1318_v38 = vadd.f32 %v1314_v37, %v1105_v35  ;;  %v4333_v40 = vpop.f32.mrb[11].mxu1 }
0x16f6   :  { %4887 = vtanh.f32 %v1318_v38  ;;  %v3955_v47 = vmul.f32 -1.442695, %v1318_v38 }
0x16f8   :  { %4889 = vpow2.f32 %v3955_v47 }
0x1700   :  { %v4888_v43 = vpop.eup %4887 }
0x1701   :  { %1328 = vrot.lane.b32.xlu1 %v4888_v43, %s5099_s0 }
0x1702   :  { %v4890_v42 = vpop.eup %4889 }
0x1703   :  { %v1322_v30 = vadd.f32 1.0, %v4890_v42 }
0x1705   :  { %4891 = vrcp.f32 %v1322_v30 }
0x170f   :  { %v4892_v48 = vpop.eup %4891 }
0x1710   :  { %v1326_v51 = vmul.f32 %v4892_v48, %v1233_v19 }
0x1718   :  { %v1016_v44 = vpop.permute.xlu0 %1015 }
0x1719   :  { %1019 = vst.msk [vmem:[#allocation3 + $0x38] sm:$0xff] %vm181_vm2, %v1016_v44 }
0x1720   :  { %v1027_v46 = vld [vmem:[#allocation3 + $0x38] sm:$0xff] }
0x1721   :  { %v1031_v26 = vpack.c.bf16 %v1027_v46, %v1026_v45 }
0x1723   :  { %4309 = vmatmul.mubr.msk.bf16.gmra.mrb[20].mxu0 %vm181_vm2, %v1031_v26 }
0x1724   :  { %4342 = vmatprep.mubr.msk.f32.mxu0 %vm5097_vm0, %v5098_v1 }
0x1773   :  { %v1329_v49 = vpop.permute.xlu1 %1328 }
0x1774   :  { %v1331_v50 = vmul.f32 %v4892_v48, %v1329_v49 }
0x1776   :  { %1333 = vrot.lane.b32.xlu1 %v1331_v50, %s5100_s2 }
0x17e8   :  { %v1334_v52 = vpop.permute.xlu1 %1333 }
0x17e9   :  { %v1336_v53 = vadd.f32 %v1334_v52, %v1326_v51 }
0x17eb   :  { %4893 = vtanh.f32 %v1336_v53 }
0x17f5   :  { %v4894_v55 = vpop.eup %4893 }
0x17f6   :  { %1339 = vrot.lane.b32.xlu1 %v4894_v55, %s5099_s0  ;;  %v5434_v56 = vpop.f32.mrb[20].mxu0 }
0x17f7   :  { %v5436_v58 = vpop.f32.mrb[21].mxu0 }
0x17f8   :  { %v5438_v59 = vpop.f32.mrb[22].mxu0  ;;  %v1118_v40 = vadd.f32 %v5405_v63, %v5436_v58 }
0x17f9   :  { %v5440_v60 = vpop.f32.mrb[23].mxu0 }
0x1868   :  { %v1340_v61 = vpop.permute.xlu1 %1339 }
0x1869   :  { %v1342_v62 = vmul.f32 %v4892_v48, %v1340_v61 }
0x186b   :  { %1344 = vrot.lane.b32.xlu1 %v1342_v62, %s5100_s2  ;;  %v1121_v62 = vadd.f32 %v5405_v63, %v5440_v60 }
0x18dd   :  { %v1345_v32 = vpop.permute.xlu1 %1344 }
0x18de   :  { %1347 = vst.msk [vmem:[#allocation3 + $0x8] sm:$0xff] %vm181_vm2, %v1345_v32  ;;  %4343 = vmatmul.mubr.msk.f32.vlgmr.msra.gmra.mrb[24].mxu0 %vm181_vm2, %v1345_v32 }
0x18df   :  { %4682 = vmatpush3.bf16.msra.mxu0 %v5371_v54  ;;  %4364 = vmatprep.mubr.msk.f32.mxu0 %vm5097_vm0, %v5098_v1 }
0x18e0   :  { %4683 = vmatprep.subr.bf16.mxu0 %v5096_v0 }
0x18e3   :  { %4685 = vmatpush3.bf16.msra.mxu0 %v5381_v57 }
0x18e4   :  { %4692 = vmatprep.subr.bf16.mxu0 %v5096_v0 }
0x19b1   :  { %v1417_v3 = vpop.f32.mrb[24].mxu0 }
0x19b2   :  { %v1421_v4 = vadd.f32 %v1417_v3, %v1110_v2  ;;  %v4344_v5 = vpop.f32.mrb[25].mxu0 }
0x19b4   :  { %4895 = vtanh.f32 %v1421_v4  ;;  %v3957_v7 = vmul.f32 -1.442695, %v1421_v4 }
0x19b6   :  { %4897 = vpow2.f32 %v3957_v7 }
0x19be   :  { %v4896_v6 = vpop.eup %4895 }
0x19bf   :  { %1431 = vrot.lane.b32.xlu0 %v4896_v6, %s5099_s0 }
0x19c0   :  { %v4898_v8 = vpop.eup %4897 }
0x19c1   :  { %v1425_v11 = vadd.f32 1.0, %v4898_v8 }
0x19c3   :  { %4899 = vrcp.f32 %v1425_v11 }
0x19cd   :  { %v4900_v34 = vpop.eup %4899 }
0x19ce   :  { %v1429_v12 = vmul.f32 %v4900_v34, %v1336_v53 }
0x1a31   :  { %v1432_v9 = vpop.permute.xlu0 %1431 }
0x1a32   :  { %v1434_v10 = vmul.f32 %v4900_v34, %v1432_v9 }
0x1a34   :  { %1436 = vrot.lane.b32.xlu1 %v1434_v10, %s5100_s2 }
0x1aa6   :  { %v1437_v13 = vpop.permute.xlu1 %1436 }
0x1aa7   :  { %v1439_v39 = vadd.f32 %v1437_v13, %v1429_v12 }
0x1aa9   :  { %4901 = vtanh.f32 %v1439_v39 }
0x1ab3   :  { %v4902_v19 = vpop.eup %4901 }
0x1ab4   :  { %1442 = vrot.lane.b32.xlu0 %v4902_v19, %s5099_s0 }
0x1b26   :  { %v1443_v14 = vpop.permute.xlu0 %1442 }
0x1b27   :  { %v1445_v15 = vmul.f32 %v4900_v34, %v1443_v14 }
0x1b29   :  { %1447 = vrot.lane.b32.xlu1 %v1445_v15, %s5100_s2 }
0x1b9b   :  { %v1448_v36 = vpop.permute.xlu1 %1447 }
0x1b9c   :  { %1450 = vst.msk [vmem:[#allocation3 + $0x10] sm:$0xff] %vm181_vm2, %v1448_v36  ;;  %4354 = vmatmul.mubr.msk.f32.vlgmr.msra.gmra.mrb[12].mxu1 %vm181_vm2, %v1448_v36 }
0x1b9d   :  { %4688 = vmatpush3.bf16.msra.mxu1 %v5371_v54  ;;  %4375 = vmatprep.mubr.msk.f32.mxu1 %vm5097_vm0, %v5098_v1 }
0x1b9e   :  { %4689 = vmatprep.subr.bf16.mxu1 %v5096_v0 }
0x1ba1   :  { %4691 = vmatpush3.bf16.msra.mxu1 %v5381_v57 }
0x1ba2   :  { %4698 = vmatprep.subr.bf16.mxu1 %v5096_v0 }
0x1c6f   :  { %v1520_v17 = vpop.f32.mrb[12].mxu1 }
0x1c70   :  { %v1524_v18 = vadd.f32 %v1520_v17, %v1113_v16  ;;  %v4355_v20 = vpop.f32.mrb[13].mxu1 }
0x1c72   :  { %4903 = vtanh.f32 %v1524_v18  ;;  %v3959_v22 = vmul.f32 -1.442695, %v1524_v18 }
0x1c74   :  { %4905 = vpow2.f32 %v3959_v22 }
0x1c7c   :  { %v4904_v21 = vpop.eup %4903 }
0x1c7d   :  { %1534 = vrot.lane.b32.xlu0 %v4904_v21, %s5099_s0 }
0x1c7e   :  { %v4906_v24 = vpop.eup %4905 }
0x1c7f   :  { %v1528_v25 = vadd.f32 1.0, %v4906_v24 }
0x1c81   :  { %4907 = vrcp.f32 %v1528_v25 }
0x1c8b   :  { %v4908_v23 = vpop.eup %4907 }
0x1c8c   :  { %v1532_v29 = vmul.f32 %v4908_v23, %v1439_v39  ;;  %v1126_v39 = vadd.f32 %v5434_v56, %v5405_v63 }
0x1cef   :  { %v1535_v27 = vpop.permute.xlu0 %1534 }
0x1cf0   :  { %v1537_v28 = vmul.f32 %v4908_v23, %v1535_v27 }
0x1cf2   :  { %1539 = vrot.lane.b32.xlu1 %v1537_v28, %s5100_s2 }
0x1d64   :  { %v1540_v31 = vpop.permute.xlu1 %1539 }
0x1d65   :  { %v1542_v41 = vadd.f32 %v1540_v31, %v1532_v29  ;;  %v1129_v31 = vadd.f32 %v5438_v59, %v5405_v63  ;;  %v4809_v59 = vld [vmem:[%s5870_s7] sm:$0xff]  }
0x1d67   :  { %4909 = vtanh.f32 %v1542_v41 }
0x1d71   :  { %v4910_v33 = vpop.eup %4909 }
0x1d72   :  { %1545 = vrot.lane.b32.xlu0 %v4910_v33, %s5099_s0 }
0x1de4   :  { %v1546_v35 = vpop.permute.xlu0 %1545 }
0x1de5   :  { %v1548_v37 = vmul.f32 %v4908_v23, %v1546_v35 }
0x1de7   :  { %1550 = vrot.lane.b32.xlu1 %v1548_v37, %s5100_s2 }
0x1e59   :  { %v1551_v38 = vpop.permute.xlu1 %1550 }
0x1e5a   :  { %1553 = vst.msk [vmem:[#allocation3 + $0x18] sm:$0xff] %vm181_vm2, %v1551_v38  ;;  %4365 = vmatmul.mubr.msk.f32.vlgmr.msra.gmra.mrb[26].mxu0 %vm181_vm2, %v1551_v38 }
0x1e5b   :  { %4694 = vmatpush3.bf16.msra.mxu0 %v5371_v54  ;;  %4386 = vmatprep.mubr.msk.f32.mxu0 %vm5097_vm0, %v5098_v1 }
0x1e5c   :  { %4695 = vmatprep.subr.bf16.mxu0 %v5096_v0 }
0x1e5f   :  { %4697 = vmatpush3.bf16.msra.mxu0 %v5381_v57 }
0x1e60   :  { %4400 = vmatprep.subr.bf16.mxu0 %v5098_v1 }
0x1f2d   :  { %v1623_v43 = vpop.f32.mrb[26].mxu0 }
0x1f2e   :  { %v1627_v44 = vadd.f32 %v1623_v43, %v1118_v40  ;;  %v4366_v45 = vpop.f32.mrb[27].mxu0 }
0x1f30   :  { %4911 = vtanh.f32 %v1627_v44  ;;  %v3961_v26 = vmul.f32 -1.442695, %v1627_v44 }
0x1f32   :  { %4913 = vpow2.f32 %v3961_v26 }
0x1f3a   :  { %v4912_v46 = vpop.eup %4911 }
0x1f3b   :  { %1637 = vrot.lane.b32.xlu0 %v4912_v46, %s5099_s0 }
0x1f3c   :  { %v4914_v47 = vpop.eup %4913 }
0x1f3d   :  { %v1631_v42 = vadd.f32 1.0, %v4914_v47 }
0x1f3f   :  { %4915 = vrcp.f32 %v1631_v42  ;;  %v2036_v42 = vld [vmem:[%s5871_s8] sm:$0xff] }
0x1f49   :  { %v4916_v30 = vpop.eup %4915 }
0x1f4a   :  { %v1635_v50 = vmul.f32 %v4916_v30, %v1542_v41 }
0x1fad   :  { %v1638_v48 = vpop.permute.xlu0 %1637 }
0x1fae   :  { %v1640_v49 = vmul.f32 %v4916_v30, %v1638_v48 }
0x1fb0   :  { %1642 = vrot.lane.b32.xlu1 %v1640_v49, %s5100_s2  ;;  %v2038_v49 = vld [vmem:[%s5871_s8 + $0x10] sm:$0xff] }
0x2022   :  { %v1643_v51 = vpop.permute.xlu1 %1642 }
0x2023   :  { %v1645_v52 = vadd.f32 %v1643_v51, %v1635_v50  ;;  %v2039_v50 = vld [vmem:[%s5871_s8 + $0x18] sm:$0xff]  ;;  %v4810_v51 = vld [vmem:[%s5870_s7 + $0x8] sm:$0xff]  }
0x2025   :  { %4917 = vtanh.f32 %v1645_v52 }
0x202f   :  { %v4918_v53 = vpop.eup %4917 }
0x2030   :  { %1648 = vrot.lane.b32.xlu0 %v4918_v53, %s5099_s0 }
0x20a2   :  { %v1649_v55 = vpop.permute.xlu0 %1648 }
0x20a3   :  { %v1651_v58 = vmul.f32 %v4916_v30, %v1649_v55  ;;  %v2037_v30 = vld [vmem:[%s5871_s8 + $0x8] sm:$0xff] }
0x20a4   :  { %v5526_v48 = vpack.c.bf16 %v2037_v30, %v2036_v42 }
0x20a5   :  { %1653 = vrot.lane.b32.xlu1 %v1651_v58, %s5100_s2 }
0x2117   :  { %v1654_v61 = vpop.permute.xlu1 %1653 }
0x2118   :  { %1656 = vst.msk [vmem:[#allocation3 + $0x20] sm:$0xff] %vm181_vm2, %v1654_v61  ;;  %4376 = vmatmul.mubr.msk.f32.vlgmr.msra.gmra.mrb[14].mxu1 %vm181_vm2, %v1654_v61 }
0x2119   :  { %4700 = vmatpush3.bf16.msra.mxu1 %v5371_v54  ;;  %4397 = vmatprep.mubr.msk.f32.mxu1 %vm5097_vm0, %v5098_v1 }
0x211a   :  { %4701 = vmatprep.subr.bf16.mxu1 %v5096_v0 }
0x211d   :  { %4703 = vmatpush3.bf16.msra.mxu1 %v5381_v57 }
0x211e   :  { %4704 = vmatprep.subr.bf16.mxu1 %v5096_v0 }
0x21eb   :  { %v1726_v32 = vpop.f32.mrb[14].mxu1 }
0x21ec   :  { %v1730_v2 = vadd.f32 %v1726_v32, %v1121_v62  ;;  %v4377_v3 = vpop.f32.mrb[15].mxu1 }
0x21ed   :  { %v3968_v3 = vld [vmem:[%s5872_s9] ss:$0 sm:$0xff] }
0x21ee   :  { %4919 = vtanh.f32 %v1730_v2  ;;  %v3963_v54 = vmul.f32 -1.442695, %v1730_v2 }
0x21f0   :  { %4921 = vpow2.f32 %v3963_v54 }
0x21f8   :  { %v4920_v4 = vpop.eup %4919 }
0x21f9   :  { %1740 = vrot.lane.b32.xlu0 %v4920_v4, %s5099_s0 }
0x21fa   :  { %v4922_v5 = vpop.eup %4921 }
0x21fb   :  { %v1734_v6 = vadd.f32 1.0, %v4922_v5 }
0x21fd   :  { %4923 = vrcp.f32 %v1734_v6 }
0x2207   :  { %v4924_v7 = vpop.eup %4923 }
0x2208   :  { %v1738_v11 = vmul.f32 %v4924_v7, %v1645_v52  ;;  %v5539_v52 = vpack.c.bf16 %v2039_v50, %v2038_v49 }
0x226b   :  { %v1741_v8 = vpop.permute.xlu0 %1740 }
0x226c   :  { %v1743_v57 = vmul.f32 %v4924_v7, %v1741_v8 }
0x226e   :  { %1745 = vrot.lane.b32.xlu1 %v1743_v57, %s5100_s2 }
0x22e0   :  { %v1746_v34 = vpop.permute.xlu1 %1745 }
0x22e1   :  { %v1748_v60 = vadd.f32 %v1746_v34, %v1738_v11 }
0x22e3   :  { %4925 = vtanh.f32 %v1748_v60 }
0x22ed   :  { %v4926_v9 = vpop.eup %4925 }
0x22ee   :  { %1751 = vrot.lane.b32.xlu0 %v4926_v9, %s5099_s0 }
0x2360   :  { %v1752_v10 = vpop.permute.xlu0 %1751 }
0x2361   :  { %v1754_v12 = vmul.f32 %v4924_v7, %v1752_v10 }
0x2363   :  { %1756 = vrot.lane.b32.xlu1 %v1754_v12, %s5100_s2 }
0x23d5   :  { %v1757_v13 = vpop.permute.xlu1 %1756 }
0x23d6   :  { %1759 = vst.msk [vmem:[#allocation3 + $0x28] sm:$0xff] %vm181_vm2, %v1757_v13  ;;  %4387 = vmatmul.mubr.msk.f32.vlgmr.msra.gmra.mrb[28].mxu0 %vm181_vm2, %v1757_v13 }
0x23d7   :  { %4404 = vmatprep.mubr.msk.bf16.mxu0 %vm5097_vm0, %v5098_v1  ;;  %4401 = vmatpush3.bf16.msra.mxu0 %v4809_v59 }
0x23d8   :  { %4402 = vmatprep.subr.bf16.mxu0 %v5098_v1 }
0x23db   :  { %4403 = vmatpush3.bf16.msra.mxu0 %v4810_v51 }
0x23dc   :  { %4710 = vmatprep.subr.bf16.mxu0 %v5096_v0 }
0x24a9   :  { %v1829_v19 = vpop.f32.mrb[28].mxu0 }
0x24aa   :  { %v1833_v14 = vadd.f32 %v1829_v19, %v1126_v39  ;;  %v4388_v15 = vpop.f32.mrb[29].mxu0 }
0x24ac   :  { %4927 = vtanh.f32 %v1833_v14  ;;  %v3965_v16 = vmul.f32 -1.442695, %v1833_v14 }
0x24ae   :  { %4929 = vpow2.f32 %v3965_v16 }
0x24b6   :  { %v4928_v36 = vpop.eup %4927 }
0x24b7   :  { %1843 = vrot.lane.b32.xlu0 %v4928_v36, %s5099_s0 }
0x24b8   :  { %v4930_v17 = vpop.eup %4929 }
0x24b9   :  { %v1837_v18 = vadd.f32 1.0, %v4930_v17 }
0x24bb   :  { %4931 = vrcp.f32 %v1837_v18 }
0x24c5   :  { %v4932_v20 = vpop.eup %4931 }
0x24c6   :  { %v1841_v24 = vmul.f32 %v4932_v20, %v1748_v60 }
0x2529   :  { %v1844_v21 = vpop.permute.xlu0 %1843 }
0x252a   :  { %v1846_v22 = vmul.f32 %v4932_v20, %v1844_v21 }
0x252c   :  { %1848 = vrot.lane.b32.xlu1 %v1846_v22, %s5100_s2 }
0x259e   :  { %v1849_v25 = vpop.permute.xlu1 %1848 }
0x259f   :  { %v1851_v56 = vadd.f32 %v1849_v25, %v1841_v24 }
0x25a1   :  { %4933 = vtanh.f32 %v1851_v56 }
0x25ab   :  { %v4934_v23 = vpop.eup %4933 }
0x25ac   :  { %1854 = vrot.lane.b32.xlu0 %v4934_v23, %s5099_s0 }
0x261e   :  { %v1855_v27 = vpop.permute.xlu0 %1854 }
0x261f   :  { %v1857_v28 = vmul.f32 %v4932_v20, %v1855_v27 }
0x2621   :  { %1859 = vrot.lane.b32.xlu1 %v1857_v28, %s5100_s2 }
0x2693   :  { %v1860_v29 = vpop.permute.xlu1 %1859 }
0x2694   :  { %1862 = vst.msk [vmem:[#allocation3 + $0x30] sm:$0xff] %vm181_vm2, %v1860_v29  ;;  %4398 = vmatmul.mubr.msk.f32.vlgmr.msra.gmra.mrb[16].mxu1 %vm181_vm2, %v1860_v29 }
0x2695   :  { %4416 = vmatprep.mubr.msk.f32.mxu1 %vm5097_vm0, %v5098_v1  ;;  %4706 = vmatpush3.bf16.msra.mxu1 %v5526_v48 }
0x2696   :  { %4707 = vmatprep.subr.bf16.mxu1 %v5096_v0 }
0x2699   :  { %4709 = vmatpush3.bf16.msra.mxu1 %v5539_v52 }
0x269a   :  { %4716 = vmatprep.subr.bf16.mxu1 %v5096_v0 }
0x269c   :  { %4417 = vmatmul.mubr.f32.vlgmr.msra.gmra.mrb[18].mxu1 %v5098_v1 }
0x269d   :  { %4718 = vmatpush3.bf16.msra.mxu1 %v5526_v48  ;;  %4438 = vmatprep.mubr.msk.f32.mxu1 %vm5097_vm0, %v5098_v1 }
0x269e   :  { %4719 = vmatprep.subr.bf16.mxu1 %v5096_v0 }
0x26a1   :  { %4721 = vmatpush3.bf16.msra.mxu1 %v5539_v52 }
0x26a2   :  { %4728 = vmatprep.subr.bf16.mxu1 %v5096_v0 }
0x2767   :  { %v1932_v41 = vpop.f32.mrb[16].mxu1 }
0x2768   :  { %v1936_v33 = vadd.f32 %v1932_v41, %v1129_v31  ;;  %v4399_v35 = vpop.f32.mrb[17].mxu1 }
0x276a   :  { %4935 = vtanh.f32 %v1936_v33  ;;  %v3967_v38 = vmul.f32 -1.442695, %v1936_v33 }
0x276c   :  { %4937 = vpow2.f32 %v3967_v38 }
0x276f   :  { %v2106_v32 = vpop.f32.mrb[18].mxu1 }
0x2770   :  { %v4418_v2 = vpop.f32.mrb[19].mxu1 }
0x2774   :  { %v4936_v37 = vpop.eup %4935 }
0x2775   :  { %1946 = vrot.lane.b32.xlu0 %v4936_v37, %s5099_s0 }
0x2776   :  { %v4938_v40 = vpop.eup %4937 }
0x2777   :  { %v1940_v43 = vadd.f32 1.0, %v4938_v40 }
0x2779   :  { %4939 = vrcp.f32 %v1940_v43 }
0x2783   :  { %v4940_v44 = vpop.eup %4939 }
0x2784   :  { %v1944_v26 = vmul.f32 %v4940_v44, %v1851_v56 }
0x27e7   :  { %v1947_v45 = vpop.permute.xlu0 %1946 }
0x27e8   :  { %v1949_v46 = vmul.f32 %v4940_v44, %v1947_v45 }
0x27ea   :  { %1951 = vrot.lane.b32.xlu1 %v1949_v46, %s5100_s2 }
0x285c   :  { %v1952_v47 = vpop.permute.xlu1 %1951 }
0x285d   :  { %v1954_v63 = vadd.f32 %v1952_v47, %v1944_v26 }
0x285f   :  { %4941 = vtanh.f32 %v1954_v63 }
0x2869   :  { %v4942_v53 = vpop.eup %4941 }
0x286a   :  { %1957 = vrot.lane.b32.xlu0 %v4942_v53, %s5099_s0 }
0x28dc   :  { %v1958_v55 = vpop.permute.xlu0 %1957 }
0x28dd   :  { %v5553_v58 = vmul.f32 %v4940_v44, %v1958_v55 }
0x28df   :  { %v1966_v61 = vpack.c.bf16 %v5553_v58, %v5553_v58 }
0x28e1   :  { %1979 = vrot.lane.b32.xlu1 %v1966_v61, %s5100_s2 }
0x2953   :  { %v1980_v62 = vpop.permute.xlu1 %1979 }
0x2954   :  { %4405 = vmatmul.mubr.msk.bf16.vlgmr.msra.gmra.mrb[32].mxu0 %vm181_vm2, %v1980_v62 }
0x2955   :  { %4712 = vmatpush3.bf16.msra.mxu0 %v5526_v48  ;;  %4427 = vmatprep.mubr.msk.f32.mxu0 %vm5097_vm0, %v5098_v1 }
0x2956   :  { %4713 = vmatprep.subr.bf16.mxu0 %v5096_v0 }
0x2959   :  { %4715 = vmatpush3.bf16.msra.mxu0 %v5539_v52 }
0x295a   :  { %4722 = vmatprep.subr.bf16.mxu0 %v5096_v0 }
0x2a27   :  { %v2030_v4 = vpop.f32.mrb[32].mxu0 }
0x2a28   :  { %v5568_v54 = vadd.f32 %v3968_v3, %v2030_v4  ;;  %v4406_v5 = vpop.f32.mrb[33].mxu0 }
0x2a29   :  { %v2033_v6 = vpop.f32.mrb[34].mxu0 }
0x2a2a   :  { %v2110_v7 = vadd.f32 %v2106_v32, %v5568_v54  ;;  %v4407_v8 = vpop.f32.mrb[35].mxu0 }
0x2a2c   :  { %4943 = vtanh.f32 %v2110_v7  ;;  %v3972_v11 = vmul.f32 -1.442695, %v2110_v7 }
0x2a2e   :  { %4945 = vpow2.f32 %v3972_v11 }
0x2a36   :  { %v4944_v57 = vpop.eup %4943 }
0x2a37   :  { %2120 = vrot.lane.b32.xlu0 %v4944_v57, %s5099_s0 }
0x2a38   :  { %v4946_v34 = vpop.eup %4945 }
0x2a39   :  { %v2114_v60 = vadd.f32 1.0, %v4946_v34 }
0x2a3b   :  { %4947 = vrcp.f32 %v2114_v60 }
0x2a45   :  { %v4948_v9 = vpop.eup %4947 }
0x2a46   :  { %v2118_v13 = vmul.f32 0.0, %v4948_v9 }
0x2aa9   :  { %v2121_v10 = vpop.permute.xlu0 %2120 }
0x2aaa   :  { %v2123_v12 = vmul.f32 %v4948_v9, %v2121_v10 }
0x2aac   :  { %2125 = vrot.lane.b32.xlu1 %v2123_v12, %s5100_s2 }
0x2b1e   :  { %v2126_v39 = vpop.permute.xlu1 %2125 }
0x2b1f   :  { %v2128_v19 = vadd.f32 %v2126_v39, %v2118_v13 }
0x2b21   :  { %4949 = vtanh.f32 %v2128_v19 }
0x2b2b   :  { %v4950_v14 = vpop.eup %4949 }
0x2b2c   :  { %2131 = vrot.lane.b32.xlu0 %v4950_v14, %s5099_s0 }
0x2b9e   :  { %v2132_v15 = vpop.permute.xlu0 %2131 }
0x2b9f   :  { %v2134_v36 = vmul.f32 %v4948_v9, %v2132_v15 }
0x2ba1   :  { %2136 = vrot.lane.b32.xlu1 %v2134_v36, %s5100_s2 }
0x2c13   :  { %v2137_v16 = vpop.permute.xlu1 %2136 }
0x2c14   :  { %2139 = vst.msk [vmem:[#allocation3] sm:$0xff] %vm181_vm2, %v2137_v16  ;;  %4428 = vmatmul.mubr.msk.f32.vlgmr.msra.gmra.mrb[30].mxu0 %vm181_vm2, %v2137_v16 }
0x2c15   :  { %4724 = vmatpush3.bf16.msra.mxu0 %v5526_v48  ;;  %4449 = vmatprep.mubr.msk.f32.mxu0 %vm5097_vm0, %v5098_v1 }
0x2c16   :  { %4725 = vmatprep.subr.bf16.mxu0 %v5096_v0 }
0x2c19   :  { %4727 = vmatpush3.bf16.msra.mxu0 %v5539_v52 }
0x2c1a   :  { %4734 = vmatprep.subr.bf16.mxu0 %v5096_v0 }
0x2ce7   :  { %v2208_v17 = vpop.f32.mrb[30].mxu0 }
0x2ce8   :  { %v2212_v18 = vadd.f32 %v2208_v17, %v5568_v54  ;;  %v4429_v20 = vpop.f32.mrb[31].mxu0 }
0x2cea   :  { %4951 = vtanh.f32 %v2212_v18  ;;  %v3974_v22 = vmul.f32 -1.442695, %v2212_v18 }
0x2cec   :  { %4953 = vpow2.f32 %v3974_v22 }
0x2cf4   :  { %v4952_v21 = vpop.eup %4951 }
0x2cf5   :  { %2222 = vrot.lane.b32.xlu0 %v4952_v21, %s5099_s0 }
0x2cf6   :  { %v4954_v24 = vpop.eup %4953 }
0x2cf7   :  { %v2216_v25 = vadd.f32 1.0, %v4954_v24 }
0x2cf9   :  { %4955 = vrcp.f32 %v2216_v25 }
0x2d03   :  { %v4956_v56 = vpop.eup %4955 }
0x2d04   :  { %v2220_v28 = vmul.f32 %v4956_v56, %v2128_v19 }
0x2d67   :  { %v2223_v23 = vpop.permute.xlu0 %2222 }
0x2d68   :  { %v2225_v27 = vmul.f32 %v4956_v56, %v2223_v23 }
0x2d6a   :  { %2227 = vrot.lane.b32.xlu1 %v2225_v27, %s5100_s2 }
0x2ddc   :  { %v2228_v29 = vpop.permute.xlu1 %2227 }
0x2ddd   :  { %v2230_v31 = vadd.f32 %v2228_v29, %v2220_v28 }
0x2ddf   :  { %4957 = vtanh.f32 %v2230_v31 }
0x2de9   :  { %v4958_v41 = vpop.eup %4957 }
0x2dea   :  { %2233 = vrot.lane.b32.xlu0 %v4958_v41, %s5099_s0 }
0x2e5c   :  { %v2234_v33 = vpop.permute.xlu0 %2233 }
0x2e5d   :  { %v2236_v35 = vmul.f32 %v4956_v56, %v2234_v33 }
0x2e5f   :  { %2238 = vrot.lane.b32.xlu1 %v2236_v35, %s5100_s2 }
0x2ed1   :  { %v2239_v37 = vpop.permute.xlu1 %2238 }
0x2ed2   :  { %2241 = vst.msk [vmem:[#allocation3 + $0x8] sm:$0xff] %vm181_vm2, %v2239_v37  ;;  %4439 = vmatmul.mubr.msk.f32.vlgmr.msra.gmra.mrb[20].mxu1 %vm181_vm2, %v2239_v37 }
0x2ed3   :  { %4730 = vmatpush3.bf16.msra.mxu1 %v5526_v48  ;;  %4460 = vmatprep.mubr.msk.f32.mxu1 %vm5097_vm0, %v5098_v1 }
0x2ed4   :  { %4731 = vmatprep.subr.bf16.mxu1 %v5096_v0 }
0x2ed7   :  { %4733 = vmatpush3.bf16.msra.mxu1 %v5539_v52 }
0x2ed8   :  { %4740 = vmatprep.subr.bf16.mxu1 %v5096_v0 }
0x2fa5   :  { %v2310_v38 = vpop.f32.mrb[20].mxu1 }
0x2fa6   :  { %v2314_v40 = vadd.f32 %v2310_v38, %v5568_v54  ;;  %v4440_v43 = vpop.f32.mrb[21].mxu1 }
0x2fa8   :  { %4959 = vtanh.f32 %v2314_v40  ;;  %v3976_v45 = vmul.f32 -1.442695, %v2314_v40 }
0x2faa   :  { %4961 = vpow2.f32 %v3976_v45  ;;  %v4811_v45 = vld [vmem:[%s5873_s10] sm:$0xff]  }
0x2fb2   :  { %v4960_v44 = vpop.eup %4959 }
0x2fb3   :  { %2324 = vrot.lane.b32.xlu0 %v4960_v44, %s5099_s0 }
0x2fb4   :  { %v4962_v46 = vpop.eup %4961 }
0x2fb5   :  { %v2318_v26 = vadd.f32 1.0, %v4962_v46 }
0x2fb7   :  { %4963 = vrcp.f32 %v2318_v26 }
0x2fc1   :  { %v4964_v47 = vpop.eup %4963 }
0x2fc2   :  { %v2322_v42 = vmul.f32 %v4964_v47, %v2230_v31 }
0x3025   :  { %v2325_v63 = vpop.permute.xlu0 %2324 }
0x3026   :  { %v2327_v59 = vmul.f32 %v4964_v47, %v2325_v63  ;;  %v2855_v63 = vld [vmem:[#allocation3 + $0x8] sm:$0xff] }
0x3028   :  { %2329 = vrot.lane.b32.xlu1 %v2327_v59, %s5100_s2  ;;  %v2854_v59 = vld [vmem:[#allocation3] sm:$0xff] }
0x309a   :  { %v2330_v30 = vpop.permute.xlu1 %2329 }
0x309b   :  { %v2332_v49 = vadd.f32 %v2330_v30, %v2322_v42  ;;  %v4812_v42 = vld [vmem:[%s5873_s10 + $0x8] sm:$0xff]  }
0x309d   :  { %4965 = vtanh.f32 %v2332_v49 }
0x30a7   :  { %v4966_v50 = vpop.eup %4965 }
0x30a8   :  { %2335 = vrot.lane.b32.xlu0 %v4966_v50, %s5099_s0 }
0x311a   :  { %v2336_v51 = vpop.permute.xlu0 %2335 }
0x311b   :  { %v2338_v53 = vmul.f32 %v4964_v47, %v2336_v51 }
0x311d   :  { %2340 = vrot.lane.b32.xlu1 %v2338_v53, %s5100_s2 }
0x318f   :  { %v2341_v55 = vpop.permute.xlu1 %2340 }
0x3190   :  { %2343 = vst.msk [vmem:[#allocation3 + $0x10] sm:$0xff] %vm181_vm2, %v2341_v55  ;;  %4450 = vmatmul.mubr.msk.f32.vlgmr.msra.gmra.mrb[36].mxu0 %vm181_vm2, %v2341_v55 }
0x3191   :  { %4736 = vmatpush3.bf16.msra.mxu0 %v5526_v48  ;;  %4471 = vmatprep.mubr.msk.f32.mxu0 %vm5097_vm0, %v5098_v1 }
0x3192   :  { %4737 = vmatprep.subr.bf16.mxu0 %v5096_v0 }
0x3195   :  { %4739 = vmatpush3.bf16.msra.mxu0 %v5539_v52 }
0x3196   :  { %4746 = vmatprep.subr.bf16.mxu0 %v5096_v0 }
0x3197   :  { %v2856_v51 = vld [vmem:[#allocation3 + $0x10] sm:$0xff] }
0x3263   :  { %v2412_v61 = vpop.f32.mrb[36].mxu0 }
0x3264   :  { %v2416_v62 = vadd.f32 %v2412_v61, %v5568_v54  ;;  %v4451_v32 = vpop.f32.mrb[37].mxu0 }
0x3266   :  { %4967 = vtanh.f32 %v2416_v62  ;;  %v3978_v3 = vmul.f32 -1.442695, %v2416_v62 }
0x3268   :  { %4969 = vpow2.f32 %v3978_v3 }
0x3270   :  { %v4968_v2 = vpop.eup %4967 }
0x3271   :  { %2426 = vrot.lane.b32.xlu0 %v4968_v2, %s5099_s0 }
0x3272   :  { %v4970_v4 = vpop.eup %4969 }
0x3273   :  { %v2420_v5 = vadd.f32 1.0, %v4970_v4 }
0x3275   :  { %4971 = vrcp.f32 %v2420_v5 }
0x327f   :  { %v4972_v6 = vpop.eup %4971 }
0x3280   :  { %v2424_v57 = vmul.f32 %v4972_v6, %v2332_v49  ;;  %v2862_v49 = vpack.c.bf16 %v2855_v63, %v2854_v59 }
0x32e3   :  { %v2427_v7 = vpop.permute.xlu0 %2426 }
0x32e4   :  { %v2429_v8 = vmul.f32 %v4972_v6, %v2427_v7 }
0x32e6   :  { %2431 = vrot.lane.b32.xlu1 %v2429_v8, %s5100_s2 }
0x3358   :  { %v2432_v11 = vpop.permute.xlu1 %2431 }
0x3359   :  { %v2434_v34 = vadd.f32 %v2432_v11, %v2424_v57 }
0x335b   :  { %4973 = vtanh.f32 %v2434_v34 }
0x3365   :  { %v4974_v60 = vpop.eup %4973 }
0x3366   :  { %2437 = vrot.lane.b32.xlu0 %v4974_v60, %s5099_s0 }
0x33d8   :  { %v2438_v9 = vpop.permute.xlu0 %2437 }
0x33d9   :  { %v2440_v10 = vmul.f32 %v4972_v6, %v2438_v9 }
0x33db   :  { %2442 = vrot.lane.b32.xlu1 %v2440_v10, %s5100_s2 }
0x344d   :  { %v2443_v12 = vpop.permute.xlu1 %2442 }
0x344e   :  { %2445 = vst.msk [vmem:[#allocation3 + $0x18] sm:$0xff] %vm181_vm2, %v2443_v12  ;;  %4461 = vmatmul.mubr.msk.f32.vlgmr.msra.gmra.mrb[22].mxu1 %vm181_vm2, %v2443_v12 }
0x344f   :  { %4742 = vmatpush3.bf16.msra.mxu1 %v5526_v48  ;;  %4482 = vmatprep.mubr.msk.f32.mxu1 %vm5097_vm0, %v5098_v1 }
0x3450   :  { %4743 = vmatprep.subr.bf16.mxu1 %v5096_v0 }
0x3453   :  { %4745 = vmatpush3.bf16.msra.mxu1 %v5539_v52 }
0x3454   :  { %4496 = vmatprep.subr.bf16.mxu1 %v4811_v45 }
0x3455   :  { %v2857_v50 = vld [vmem:[#allocation3 + $0x18] sm:$0xff] }
0x3456   :  { %v2863_v53 = vpack.c.bf16 %v2857_v50, %v2856_v51 }
0x3521   :  { %v2514_v13 = vpop.f32.mrb[22].mxu1 }
0x3522   :  { %v2518_v39 = vadd.f32 %v2514_v13, %v5568_v54  ;;  %v4462_v19 = vpop.f32.mrb[23].mxu1 }
0x3524   :  { %4975 = vtanh.f32 %v2518_v39  ;;  %v3980_v15 = vmul.f32 -1.442695, %v2518_v39 }
0x3526   :  { %4977 = vpow2.f32 %v3980_v15  ;;  %v2975_v15 = vld [vmem:[%s5874_s11 + $0x8] sm:$0xff] }
0x352e   :  { %v4976_v14 = vpop.eup %4975 }
0x352f   :  { %2528 = vrot.lane.b32.xlu0 %v4976_v14, %s5099_s0  ;;  %v2974_v14 = vld [vmem:[%s5874_s11] sm:$0xff] }
0x3530   :  { %v4978_v36 = vpop.eup %4977 }
0x3531   :  { %v2522_v16 = vadd.f32 1.0, %v4978_v36  ;;  %v5670_v36 = vpack.c.bf16 %v2975_v15, %v2974_v14 }
0x3533   :  { %4979 = vrcp.f32 %v2522_v16  ;;  %v2976_v16 = vld [vmem:[%s5874_s11 + $0x10] sm:$0xff] }
0x353d   :  { %v4980_v17 = vpop.eup %4979 }
0x353e   :  { %v2526_v21 = vmul.f32 %v4980_v17, %v2434_v34 }
0x35a1   :  { %v2529_v18 = vpop.permute.xlu0 %2528 }
0x35a2   :  { %v2531_v20 = vmul.f32 %v4980_v17, %v2529_v18 }
0x35a4   :  { %2533 = vrot.lane.b32.xlu1 %v2531_v20, %s5100_s2 }
0x3616   :  { %v2534_v22 = vpop.permute.xlu1 %2533 }
0x3617   :  { %v2536_v24 = vadd.f32 %v2534_v22, %v2526_v21 }
0x3619   :  { %4981 = vtanh.f32 %v2536_v24 }
0x3623   :  { %v4982_v25 = vpop.eup %4981 }
0x3624   :  { %2539 = vrot.lane.b32.xlu0 %v4982_v25, %s5099_s0 }
0x3696   :  { %v2540_v56 = vpop.permute.xlu0 %2539 }
0x3697   :  { %v2542_v23 = vmul.f32 %v4980_v17, %v2540_v56  ;;  %v2977_v17 = vld [vmem:[%s5874_s11 + $0x18] sm:$0xff]  ;;  %v5703_v56 = vld [vmem:[%s5875_s12] ss:$0 sm:$0xff] }
0x3698   :  { %v5680_v18 = vpack.c.bf16 %v2977_v17, %v2976_v16 }
0x3699   :  { %2544 = vrot.lane.b32.xlu1 %v2542_v23, %s5100_s2 }
0x370b   :  { %v2545_v27 = vpop.permute.xlu1 %2544 }
0x370c   :  { %2547 = vst.msk [vmem:[#allocation3 + $0x20] sm:$0xff] %vm181_vm2, %v2545_v27  ;;  %4472 = vmatmul.mubr.msk.f32.vlgmr.msra.gmra.mrb[38].mxu0 %vm181_vm2, %v2545_v27 }
0x370d   :  { %4748 = vmatpush3.bf16.msra.mxu0 %v5526_v48  ;;  %4493 = vmatprep.mubr.msk.f32.mxu0 %vm5097_vm0, %v5098_v1 }
0x370e   :  { %4749 = vmatprep.subr.bf16.mxu0 %v5096_v0 }
0x3711   :  { %4751 = vmatpush3.bf16.msra.mxu0 %v5539_v52 }
0x3712   :  { %4752 = vmatprep.subr.bf16.mxu0 %v5096_v0 }
0x3713   :  { %v2858_v55 = vld [vmem:[#allocation3 + $0x20] sm:$0xff] }
0x37df   :  { %v2616_v28 = vpop.f32.mrb[38].mxu0 }
0x37e0   :  { %v2620_v29 = vadd.f32 %v2616_v28, %v5568_v54  ;;  %v4473_v31 = vpop.f32.mrb[39].mxu0 }
0x37e2   :  { %4983 = vtanh.f32 %v2620_v29  ;;  %v3982_v33 = vmul.f32 -1.442695, %v2620_v29 }
0x37e4   :  { %4985 = vpow2.f32 %v3982_v33 }
0x37ec   :  { %v4984_v41 = vpop.eup %4983 }
0x37ed   :  { %2630 = vrot.lane.b32.xlu0 %v4984_v41, %s5099_s0 }
0x37ee   :  { %v4986_v48 = vpop.eup %4985 }
0x37ef   :  { %v2624_v35 = vadd.f32 1.0, %v4986_v48 }
0x37f1   :  { %4987 = vrcp.f32 %v2624_v35 }
0x37fb   :  { %v4988_v37 = vpop.eup %4987 }
0x37fc   :  { %v2628_v52 = vmul.f32 %v4988_v37, %v2536_v24 }
0x385f   :  { %v2631_v38 = vpop.permute.xlu0 %2630 }
0x3860   :  { %v2633_v40 = vmul.f32 %v4988_v37, %v2631_v38 }
0x3862   :  { %2635 = vrot.lane.b32.xlu1 %v2633_v40, %s5100_s2 }
0x38d4   :  { %v2636_v43 = vpop.permute.xlu1 %2635 }
0x38d5   :  { %v2638_v44 = vadd.f32 %v2636_v43, %v2628_v52 }
0x38d7   :  { %4989 = vtanh.f32 %v2638_v44 }
0x38e1   :  { %v4990_v46 = vpop.eup %4989 }
0x38e2   :  { %2641 = vrot.lane.b32.xlu0 %v4990_v46, %s5099_s0 }
0x3954   :  { %v2642_v26 = vpop.permute.xlu0 %2641 }
0x3955   :  { %v2644_v47 = vmul.f32 %v4988_v37, %v2642_v26 }
0x3957   :  { %2646 = vrot.lane.b32.xlu1 %v2644_v47, %s5100_s2 }
0x39c9   :  { %v2647_v30 = vpop.permute.xlu1 %2646 }
0x39ca   :  { %2649 = vst.msk [vmem:[#allocation3 + $0x28] sm:$0xff] %vm181_vm2, %v2647_v30  ;;  %4483 = vmatmul.mubr.msk.f32.vlgmr.msra.gmra.mrb[24].mxu1 %vm181_vm2, %v2647_v30 }
0x39cb   :  { %4497 = vmatpush3.bf16.msra.mxu1 %v4811_v45  ;;  %4500 = vmatprep.mubr.msk.bf16.mxu1 %vm181_vm2, %v2862_v49 }
0x39cc   :  { %4498 = vmatprep.subr.bf16.mxu1 %v4812_v42 }
0x39cf   :  { %4499 = vmatpush3.bf16.msra.mxu1 %v4812_v42 }
0x39d0   :  { %4764 = vmatprep.subr.bf16.mxu1 %v5096_v0 }
0x39d1   :  { %v2859_v61 = vld [vmem:[#allocation3 + $0x28] sm:$0xff] }
0x39d2   :  { %4501 = vmatmul.mubr.msk.bf16.vlgmr.msra.gmra.mrb[28].mxu1 %vm181_vm2, %v2863_v53  ;;  %v2864_v62 = vpack.c.bf16 %v2859_v61, %v2858_v55 }
0x39d3   :  { %4766 = vmatpush3.bf16.msra.mxu1 %v5670_v36 }
0x39d4   :  { %4504 = vmatprep.mubr.msk.bf16.mxu1 %vm181_vm2, %v2864_v62  ;;  %4767 = vmatprep.subr.bf16.mxu1 %v5096_v0 }
0x39d7   :  { %4769 = vmatpush3.bf16.msra.mxu1 %v5680_v18 }
0x39d8   :  { %4776 = vmatprep.subr.bf16.mxu1 %v5096_v0 }
0x3a9d   :  { %v2718_v32 = vpop.f32.mrb[24].mxu1 }
0x3a9e   :  { %v2722_v2 = vadd.f32 %v2718_v32, %v5568_v54  ;;  %v4484_v3 = vpop.f32.mrb[25].mxu1 }
0x3aa0   :  { %4991 = vtanh.f32 %v2722_v2  ;;  %v3984_v57 = vmul.f32 -1.442695, %v2722_v2 }
0x3aa2   :  { %4993 = vpow2.f32 %v3984_v57 }
0x3aa5   :  { %v5652_v4 = vpop.f32.mrb[28].mxu1 }
0x3aa6   :  { %v2935_v5 = vpop.f32.mrb[29].mxu1 }
0x3aa7   :  { %v5654_v6 = vpop.f32.mrb[30].mxu1  ;;  %v2936_v23 = vadd.f32 %v5703_v56, %v2935_v5 }
0x3aa8   :  { %v5656_v7 = vpop.f32.mrb[31].mxu1 }
0x3aa9   :  { %v2939_v2 = vadd.f32 %v5703_v56, %v5656_v7 }
0x3aaa   :  { %v4992_v8 = vpop.eup %4991 }
0x3aab   :  { %2732 = vrot.lane.b32.xlu0 %v4992_v8, %s5099_s0 }
0x3aac   :  { %v4994_v11 = vpop.eup %4993 }
0x3aad   :  { %v2726_v34 = vadd.f32 1.0, %v4994_v11 }
0x3aaf   :  { %4995 = vrcp.f32 %v2726_v34 }
0x3ab9   :  { %v4996_v60 = vpop.eup %4995 }
0x3aba   :  { %v2730_v12 = vmul.f32 %v4996_v60, %v2638_v44 }
0x3b1d   :  { %v2733_v9 = vpop.permute.xlu0 %2732 }
0x3b1e   :  { %v2735_v10 = vmul.f32 %v4996_v60, %v2733_v9 }
0x3b20   :  { %2737 = vrot.lane.b32.xlu1 %v2735_v10, %s5100_s2 }
0x3b92   :  { %v2738_v13 = vpop.permute.xlu1 %2737 }
0x3b93   :  { %v5660_v39 = vadd.f32 %v2738_v13, %v2730_v12 }
0x3b95   :  { %4997 = vtanh.f32 %v5660_v39 }
0x3b9f   :  { %v4998_v19 = vpop.eup %4997 }
0x3ba0   :  { %2743 = vrot.lane.b32.xlu0 %v4998_v19, %s5099_s0 }
0x3c12   :  { %v2744_v20 = vpop.permute.xlu0 %2743 }
0x3c13   :  { %v2746_v21 = vmul.f32 %v4996_v60, %v2744_v20 }
0x3c15   :  { %2748 = vrot.lane.b32.xlu1 %v2746_v21, %s5100_s2 }
0x3c87   :  { %v2749_v22 = vpop.permute.xlu1 %2748 }
0x3c88   :  { %2751 = vst.msk [vmem:[#allocation3 + $0x30] sm:$0xff] %vm181_vm2, %v2749_v22  ;;  %4494 = vmatmul.mubr.msk.f32.vlgmr.msra.gmra.mrb[40].mxu0 %vm181_vm2, %v2749_v22 }
0x3c89   :  { %4754 = vmatpush3.bf16.msra.mxu0 %v5670_v36  ;;  %4516 = vmatprep.mubr.msk.f32.mxu0 %vm5097_vm0, %v5098_v1 }
0x3c8a   :  { %4755 = vmatprep.subr.bf16.mxu0 %v5096_v0 }
0x3c8d   :  { %4757 = vmatpush3.bf16.msra.mxu0 %v5680_v18 }
0x3c8e   :  { %4758 = vmatprep.subr.bf16.mxu0 %v5096_v0 }
0x3c8f   :  { %v2860_v17 = vld [vmem:[#allocation3 + $0x30] sm:$0xff] }
0x3c90   :  { %4517 = vmatmul.mubr.f32.vlgmr.msra.gmra.mrb[42].mxu0 %v5098_v1 }
0x3c91   :  { %4760 = vmatpush3.bf16.msra.mxu0 %v5670_v36  ;;  %4527 = vmatprep.mubr.msk.f32.mxu0 %vm5097_vm0, %v5098_v1 }
0x3c92   :  { %4761 = vmatprep.subr.bf16.mxu0 %v5096_v0 }
0x3c95   :  { %4763 = vmatpush3.bf16.msra.mxu0 %v5680_v18 }
0x3c96   :  { %4770 = vmatprep.subr.bf16.mxu0 %v5096_v0 }
0x3d5b   :  { %v2820_v24 = vpop.f32.mrb[40].mxu0 }
0x3d5c   :  { %v4495_v25 = vpop.f32.mrb[41].mxu0  ;;  %v2824_v44 = vadd.f32 %v2820_v24, %v5568_v54 }
0x3d5e   :  { %v3986_v26 = vmul.f32 -1.442695, %v2824_v44 }
0x3d63   :  { %v3045_v27 = vpop.f32.mrb[42].mxu0 }
0x3d64   :  { %v3049_v28 = vadd.f32 %v3045_v27, %v2936_v23  ;;  %v4518_v29 = vpop.f32.mrb[43].mxu0 }
0x3d66   :  { %4999 = vtanh.f32 %v3049_v28  ;;  %v3994_v41 = vmul.f32 -1.442695, %v3049_v28  ;;  %v2944_v28 = vadd.f32 %v5652_v4, %v5703_v56 }
0x3d68   :  { %5001 = vpow2.f32 %v3994_v41 }
0x3d70   :  { %v5000_v31 = vpop.eup %4999 }
0x3d71   :  { %3059 = vrot.lane.b32.xlu0 %v5000_v31, %s5099_s0 }
0x3d72   :  { %v5002_v33 = vpop.eup %5001 }
0x3d73   :  { %v3053_v48 = vadd.f32 1.0, %v5002_v33 }
0x3d75   :  { %5003 = vrcp.f32 %v3053_v48 }
0x3d7f   :  { %v5004_v35 = vpop.eup %5003 }
0x3d80   :  { %v3057_v40 = vmul.f32 0.0, %v5004_v35 }
0x3de3   :  { %v3060_v37 = vpop.permute.xlu0 %3059 }
0x3de4   :  { %v3062_v38 = vmul.f32 %v5004_v35, %v3060_v37 }
0x3de6   :  { %3064 = vrot.lane.b32.xlu1 %v3062_v38, %s5100_s2 }
0x3e58   :  { %v3065_v52 = vpop.permute.xlu1 %3064 }
0x3e59   :  { %v3067_v43 = vadd.f32 %v3065_v52, %v3057_v40 }
0x3e5b   :  { %5005 = vtanh.f32 %v3067_v43 }
0x3e5c   :  { %5007 = vtanh.f32 %v2824_v44 }
0x3e5d   :  { %5009 = vpow2.f32 %v3986_v26 }
0x3e65   :  { %v5006_v45 = vpop.eup %5005 }
0x3e66   :  { %3070 = vrot.lane.b32.xlu0 %v5006_v45, %s5099_s0  ;;  %v5008_v46 = vpop.eup %5007 }
0x3e67   :  { %v5010_v47 = vpop.eup %5009 }
0x3e68   :  { %v2828_v63 = vadd.f32 1.0, %v5010_v47 }
0x3e6a   :  { %2834 = vrot.lane.b32.xlu0 %v5008_v46, %s5099_s0  ;;  %5011 = vrcp.f32 %v2828_v63  ;;  %v2947_v63 = vadd.f32 %v5654_v6, %v5703_v56 }
0x3e74   :  { %v5012_v30 = vpop.eup %5011 }
0x3e75   :  { %v2832_v51 = vmul.f32 %v5012_v30, %v5660_v39 }
0x3ed8   :  { %v3071_v59 = vpop.permute.xlu0 %3070 }
0x3ed9   :  { %v3073_v42 = vmul.f32 %v5004_v35, %v3071_v59 }
0x3edb   :  { %3075 = vrot.lane.b32.xlu1 %v3073_v42, %s5100_s2 }
0x3edc   :  { %v2835_v49 = vpop.permute.xlu0 %2834 }
0x3edd   :  { %v2837_v54 = vmul.f32 %v5012_v30, %v2835_v49 }
0x3edf   :  { %2839 = vrot.lane.b32.xlu0 %v2837_v54, %s5100_s2 }
0x3f4d   :  { %v3076_v50 = vpop.permute.xlu1 %3075 }
0x3f4e   :  { %3078 = vst.msk [vmem:[#allocation3] sm:$0xff] %vm181_vm2, %v3076_v50  ;;  %4528 = vmatmul.mubr.msk.f32.vlgmr.msra.gmra.mrb[44].mxu0 %vm181_vm2, %v3076_v50 }
0x3f4f   :  { %4772 = vmatpush3.bf16.msra.mxu0 %v5670_v36  ;;  %4549 = vmatprep.mubr.msk.f32.mxu0 %vm5097_vm0, %v5098_v1 }
0x3f50   :  { %4773 = vmatprep.subr.bf16.mxu0 %v5096_v0 }
0x3f51   :  { %v2840_v53 = vpop.permute.xlu0 %2839 }
0x3f52   :  { %v2842_v55 = vadd.f32 %v2840_v53, %v2832_v51 }
0x3f53   :  { %4775 = vmatpush3.bf16.msra.mxu0 %v5680_v18 }
0x3f54   :  { %5013 = vtanh.f32 %v2842_v55  ;;  %4782 = vmatprep.subr.bf16.mxu0 %v5096_v0 }
0x3f5e   :  { %v5014_v61 = vpop.eup %5013 }
0x3f5f   :  { %2845 = vrot.lane.b32.xlu0 %v5014_v61, %s5099_s0 }
0x3f63   :  { %1962 = vrot.lane.b32.xlu0 %v5553_v58, %s5100_s2 }
0x3fd1   :  { %v2846_v62 = vpop.permute.xlu0 %2845 }
0x3fd2   :  { %v2848_v19 = vmul.f32 %v5012_v30, %v2846_v62 }
0x3fd5   :  { %v1963_v32 = vpop.permute.xlu0 %1962 }
0x3fd6   :  { %1965 = vst.msk [vmem:[#allocation3 + $0x38] sm:$0xff] %vm181_vm2, %v1963_v32 }
0x4021   :  { %v3148_v3 = vpop.f32.mrb[44].mxu0 }
0x4022   :  { %v3152_v5 = vadd.f32 %v3148_v3, %v2939_v2  ;;  %v4529_v8 = vpop.f32.mrb[45].mxu0 }
0x4024   :  { %5015 = vtanh.f32 %v3152_v5  ;;  %v3996_v11 = vmul.f32 -1.442695, %v3152_v5 }
0x4026   :  { %5017 = vpow2.f32 %v3996_v11 }
0x402e   :  { %v5016_v57 = vpop.eup %5015 }
0x402f   :  { %3162 = vrot.lane.b32.xlu1 %v5016_v57, %s5099_s0 }
0x4030   :  { %v5018_v34 = vpop.eup %5017 }
0x4031   :  { %v3156_v60 = vadd.f32 1.0, %v5018_v34 }
0x4033   :  { %5019 = vrcp.f32 %v3156_v60 }
0x403d   :  { %v5020_v58 = vpop.eup %5019 }
0x403e   :  { %v3160_v12 = vmul.f32 %v5020_v58, %v3067_v43 }
0x40a1   :  { %v3163_v9 = vpop.permute.xlu1 %3162 }
0x40a2   :  { %v3165_v10 = vmul.f32 %v5020_v58, %v3163_v9 }
0x40a4   :  { %3167 = vrot.lane.b32.xlu1 %v3165_v10, %s5100_s2 }
0x4116   :  { %v3168_v13 = vpop.permute.xlu1 %3167 }
0x4117   :  { %v3170_v7 = vadd.f32 %v3168_v13, %v3160_v12 }
0x4119   :  { %5021 = vtanh.f32 %v3170_v7 }
0x4123   :  { %v5022_v39 = vpop.eup %5021 }
0x4124   :  { %3173 = vrot.lane.b32.xlu1 %v5022_v39, %s5099_s0 }
0x4128   :  { %2850 = vrot.lane.b32.xlu1 %v2848_v19, %s5100_s2 }
0x4196   :  { %v3174_v14 = vpop.permute.xlu1 %3173 }
0x4197   :  { %v3176_v15 = vmul.f32 %v5020_v58, %v3174_v14 }
0x4199   :  { %3178 = vrot.lane.b32.xlu0 %v3176_v15, %s5100_s2 }
0x419a   :  { %v2851_v16 = vpop.permute.xlu1 %2850 }
0x419b   :  { %2853 = vst.msk [vmem:[#allocation3 + $0x38] sm:$0xff] %vm181_vm2, %v2851_v16 }
0x41a2   :  { %v2861_v20 = vld [vmem:[#allocation3 + $0x38] sm:$0xff] }
0x41a3   :  { %v2865_v21 = vpack.c.bf16 %v2861_v20, %v2860_v17 }
0x41a5   :  { %4505 = vmatmul.mubr.msk.bf16.gmra.mrb[32].mxu1 %vm181_vm2, %v2865_v21 }
0x41a6   :  { %4538 = vmatprep.mubr.msk.f32.mxu1 %vm5097_vm0, %v5098_v1 }
0x420b   :  { %v3179_v22 = vpop.permute.xlu0 %3178 }
0x420c   :  { %3181 = vst.msk [vmem:[#allocation3 + $0x8] sm:$0xff] %vm181_vm2, %v3179_v22  ;;  %4539 = vmatmul.mubr.msk.f32.vlgmr.msra.gmra.mrb[26].mxu1 %vm181_vm2, %v3179_v22 }
0x420d   :  { %4778 = vmatpush3.bf16.msra.mxu1 %v5670_v36  ;;  %4560 = vmatprep.mubr.msk.f32.mxu1 %vm5097_vm0, %v5098_v1 }
0x420e   :  { %4779 = vmatprep.subr.bf16.mxu1 %v5096_v0 }
0x4211   :  { %4781 = vmatpush3.bf16.msra.mxu1 %v5680_v18 }
0x4212   :  { %4788 = vmatprep.subr.bf16.mxu1 %v5096_v0 }
0x4278   :  { %v5745_v24 = vpop.f32.mrb[32].mxu1 }
0x4279   :  { %v5747_v25 = vpop.f32.mrb[33].mxu1 }
0x427a   :  { %v5749_v23 = vpop.f32.mrb[34].mxu1  ;;  %v2952_v57 = vadd.f32 %v5703_v56, %v5747_v25 }
0x427b   :  { %v5751_v27 = vpop.f32.mrb[35].mxu1 }
0x427c   :  { %v2955_v22 = vadd.f32 %v5703_v56, %v5751_v27 }
0x42df   :  { %v3251_v29 = vpop.f32.mrb[26].mxu1 }
0x42e0   :  { %v3255_v31 = vadd.f32 %v3251_v29, %v2944_v28  ;;  %v4540_v41 = vpop.f32.mrb[27].mxu1 }
0x42e2   :  { %5023 = vtanh.f32 %v3255_v31  ;;  %v3998_v48 = vmul.f32 -1.442695, %v3255_v31 }
0x42e4   :  { %5025 = vpow2.f32 %v3998_v48 }
0x42ec   :  { %v5024_v33 = vpop.eup %5023 }
0x42ed   :  { %3265 = vrot.lane.b32.xlu1 %v5024_v33, %s5099_s0 }
0x42ee   :  { %v5026_v35 = vpop.eup %5025 }
0x42ef   :  { %v3259_v37 = vadd.f32 1.0, %v5026_v35 }
0x42f1   :  { %5027 = vrcp.f32 %v3259_v37  ;;  %v4813_v37 = vld [vmem:[%s5876_s13] sm:$0xff]  }
0x42fb   :  { %v5028_v38 = vpop.eup %5027 }
0x42fc   :  { %v3263_v43 = vmul.f32 %v5028_v38, %v3170_v7 }
0x435f   :  { %v3266_v40 = vpop.permute.xlu1 %3265 }
0x4360   :  { %v3268_v52 = vmul.f32 %v5028_v38, %v3266_v40 }
0x4362   :  { %3270 = vrot.lane.b32.xlu0 %v3268_v52, %s5100_s2 }
0x43d4   :  { %v3271_v44 = vpop.permute.xlu0 %3270 }
0x43d5   :  { %v3273_v4 = vadd.f32 %v3271_v44, %v3263_v43  ;;  %v3801_v43 = vld [vmem:[#allocation3 + $0x8] sm:$0xff]  ;;  %v3800_v44 = vld [vmem:[#allocation3] sm:$0xff] }
0x43d7   :  { %5029 = vtanh.f32 %v3273_v4 }
0x43e1   :  { %v5030_v45 = vpop.eup %5029 }
0x43e2   :  { %3276 = vrot.lane.b32.xlu1 %v5030_v45, %s5099_s0 }
0x4454   :  { %v3277_v46 = vpop.permute.xlu1 %3276 }
0x4455   :  { %v3279_v26 = vmul.f32 %v5028_v38, %v3277_v46  ;;  %v3808_v46 = vpack.c.bf16 %v3801_v43, %v3800_v44 }
0x4457   :  { %3281 = vrot.lane.b32.xlu0 %v3279_v26, %s5100_s2 }
0x44c9   :  { %v3282_v47 = vpop.permute.xlu0 %3281 }
0x44ca   :  { %3284 = vst.msk [vmem:[#allocation3 + $0x10] sm:$0xff] %vm181_vm2, %v3282_v47  ;;  %4550 = vmatmul.mubr.msk.f32.vlgmr.msra.gmra.mrb[46].mxu0 %vm181_vm2, %v3282_v47 }
0x44cb   :  { %4784 = vmatpush3.bf16.msra.mxu0 %v5670_v36  ;;  %4571 = vmatprep.mubr.msk.f32.mxu0 %vm5097_vm0, %v5098_v1 }
0x44cc   :  { %4785 = vmatprep.subr.bf16.mxu0 %v5096_v0 }
0x44cf   :  { %4787 = vmatpush3.bf16.msra.mxu0 %v5680_v18 }
0x44d0   :  { %4794 = vmatprep.subr.bf16.mxu0 %v5096_v0 }
0x44d1   :  { %v3802_v47 = vld [vmem:[#allocation3 + $0x10] sm:$0xff] }
0x459d   :  { %v3354_v59 = vpop.f32.mrb[46].mxu0 }
0x459e   :  { %v3358_v42 = vadd.f32 %v3354_v59, %v2947_v63  ;;  %v4551_v30 = vpop.f32.mrb[47].mxu0 }
0x45a0   :  { %5031 = vtanh.f32 %v3358_v42  ;;  %v4000_v54 = vmul.f32 -1.442695, %v3358_v42 }
0x45a2   :  { %5033 = vpow2.f32 %v4000_v54 }
0x45aa   :  { %v5032_v49 = vpop.eup %5031 }
0x45ab   :  { %3368 = vrot.lane.b32.xlu1 %v5032_v49, %s5099_s0  ;;  %v2960_v49 = vadd.f32 %v5745_v24, %v5703_v56 }
0x45ac   :  { %v5034_v50 = vpop.eup %5033 }
0x45ad   :  { %v3362_v51 = vadd.f32 1.0, %v5034_v50 }
0x45af   :  { %5035 = vrcp.f32 %v3362_v51 }
0x45b9   :  { %v5036_v53 = vpop.eup %5035 }
0x45ba   :  { %v3366_v62 = vmul.f32 %v5036_v53, %v3273_v4  ;;  %v4814_v4 = vld [vmem:[%s5876_s13 + $0x8] sm:$0xff]  }
0x461d   :  { %v3369_v55 = vpop.permute.xlu1 %3368 }
0x461e   :  { %v3371_v61 = vmul.f32 %v5036_v53, %v3369_v55 }
0x4620   :  { %3373 = vrot.lane.b32.xlu0 %v3371_v61, %s5100_s2 }
0x4692   :  { %v3374_v32 = vpop.permute.xlu0 %3373 }
0x4693   :  { %v3376_v6 = vadd.f32 %v3374_v32, %v3366_v62 }
0x4695   :  { %5037 = vtanh.f32 %v3376_v6 }
0x469f   :  { %v5038_v2 = vpop.eup %5037 }
0x46a0   :  { %3379 = vrot.lane.b32.xlu1 %v5038_v2, %s5099_s0 }
0x4712   :  { %v3380_v3 = vpop.permute.xlu1 %3379 }
0x4713   :  { %v3382_v5 = vmul.f32 %v5036_v53, %v3380_v3  ;;  %v5815_v53 = vld [vmem:[%s5877_s14] ss:$0 sm:$0xff] }
0x4715   :  { %3384 = vrot.lane.b32.xlu0 %v3382_v5, %s5100_s2 }
0x4787   :  { %v3385_v8 = vpop.permute.xlu0 %3384 }
0x4788   :  { %3387 = vst.msk [vmem:[#allocation3 + $0x18] sm:$0xff] %vm181_vm2, %v3385_v8  ;;  %4561 = vmatmul.mubr.msk.f32.vlgmr.msra.gmra.mrb[36].mxu1 %vm181_vm2, %v3385_v8 }
0x4789   :  { %4790 = vmatpush3.bf16.msra.mxu1 %v5670_v36  ;;  %4582 = vmatprep.mubr.msk.f32.mxu1 %vm5097_vm0, %v5098_v1 }
0x478a   :  { %4791 = vmatprep.subr.bf16.mxu1 %v5096_v0 }
0x478d   :  { %4793 = vmatpush3.bf16.msra.mxu1 %v5680_v18 }
0x478e   :  { %4596 = vmatprep.subr.bf16.mxu1 %v4813_v37 }
0x478f   :  { %v3803_v26 = vld [vmem:[#allocation3 + $0x18] sm:$0xff] }
0x4790   :  { %v3809_v63 = vpack.c.bf16 %v3803_v26, %v3802_v47 }
0x485b   :  { %v3457_v11 = vpop.f32.mrb[36].mxu1 }
0x485c   :  { %v3461_v34 = vadd.f32 %v3457_v11, %v2952_v57  ;;  %v4562_v60 = vpop.f32.mrb[37].mxu1 }
0x485e   :  { %5039 = vtanh.f32 %v3461_v34  ;;  %v4002_v9 = vmul.f32 -1.442695, %v3461_v34 }
0x4860   :  { %5041 = vpow2.f32 %v4002_v9 }
0x4868   :  { %v5040_v58 = vpop.eup %5039 }
0x4869   :  { %3471 = vrot.lane.b32.xlu1 %v5040_v58, %s5099_s0 }
0x486a   :  { %v5042_v10 = vpop.eup %5041 }
0x486b   :  { %v3465_v12 = vadd.f32 1.0, %v5042_v10 }
0x486d   :  { %5043 = vrcp.f32 %v3465_v12 }
0x4877   :  { %v5044_v13 = vpop.eup %5043 }
0x4878   :  { %v3469_v19 = vmul.f32 %v5044_v13, %v3376_v6 }
0x48db   :  { %v3472_v7 = vpop.permute.xlu1 %3471 }
0x48dc   :  { %v3474_v39 = vmul.f32 %v5044_v13, %v3472_v7 }
0x48de   :  { %3476 = vrot.lane.b32.xlu0 %v3474_v39, %s5100_s2 }
0x4950   :  { %v3477_v14 = vpop.permute.xlu0 %3476 }
0x4951   :  { %v3479_v15 = vadd.f32 %v3477_v14, %v3469_v19  ;;  %v2963_v14 = vadd.f32 %v5749_v23, %v5703_v56 }
0x4953   :  { %5045 = vtanh.f32 %v3479_v15 }
0x495d   :  { %v5046_v16 = vpop.eup %5045 }
0x495e   :  { %3482 = vrot.lane.b32.xlu1 %v5046_v16, %s5099_s0 }
0x49d0   :  { %v3483_v17 = vpop.permute.xlu1 %3482 }
0x49d1   :  { %v3485_v20 = vmul.f32 %v5044_v13, %v3483_v17 }
0x49d3   :  { %3487 = vrot.lane.b32.xlu0 %v3485_v20, %s5100_s2 }
0x4a45   :  { %v3488_v21 = vpop.permute.xlu0 %3487 }
0x4a46   :  { %3490 = vst.msk [vmem:[#allocation3 + $0x20] sm:$0xff] %vm181_vm2, %v3488_v21  ;;  %4572 = vmatmul.mubr.msk.f32.vlgmr.msra.gmra.mrb[48].mxu0 %vm181_vm2, %v3488_v21 }
0x4a47   :  { %4796 = vmatpush3.bf16.msra.mxu0 %v5670_v36  ;;  %4593 = vmatprep.mubr.msk.f32.mxu0 %vm5097_vm0, %v5098_v1 }
0x4a48   :  { %4797 = vmatprep.subr.bf16.mxu0 %v5096_v0 }
0x4a4b   :  { %4799 = vmatpush3.bf16.msra.mxu0 %v5680_v18 }
0x4a4d   :  { %v3804_v59 = vld [vmem:[#allocation3 + $0x20] sm:$0xff] }
0x4b19   :  { %v3560_v25 = vpop.f32.mrb[48].mxu0 }
0x4b1a   :  { %v3564_v28 = vadd.f32 %v3560_v25, %v2955_v22  ;;  %v4573_v29 = vpop.f32.mrb[49].mxu0 }
0x4b1c   :  { %5047 = vtanh.f32 %v3564_v28  ;;  %v4004_v41 = vmul.f32 -1.442695, %v3564_v28 }
0x4b1e   :  { %5049 = vpow2.f32 %v4004_v41 }
0x4b26   :  { %v5048_v31 = vpop.eup %5047 }
0x4b27   :  { %3574 = vrot.lane.b32.xlu1 %v5048_v31, %s5099_s0 }
0x4b28   :  { %v5050_v36 = vpop.eup %5049 }
0x4b29   :  { %v3568_v33 = vadd.f32 1.0, %v5050_v36 }
0x4b2b   :  { %5051 = vrcp.f32 %v3568_v33 }
0x4b35   :  { %v5052_v1 = vpop.eup %5051 }
0x4b36   :  { %v3572_v18 = vmul.f32 %v5052_v1, %v3479_v15 }
0x4b99   :  { %v3575_v48 = vpop.permute.xlu1 %3574 }
0x4b9a   :  { %v3577_v0 = vmul.f32 %v5052_v1, %v3575_v48 }
0x4b9c   :  { %3579 = vrot.lane.b32.xlu0 %v3577_v0, %s5100_s2 }
0x4c0e   :  { %v3580_v35 = vpop.permute.xlu0 %3579 }
0x4c0f   :  { %v3582_v27 = vadd.f32 %v3580_v35, %v3572_v18 }
0x4c11   :  { %5053 = vtanh.f32 %v3582_v27 }
0x4c1b   :  { %v5054_v38 = vpop.eup %5053 }
0x4c1c   :  { %3585 = vrot.lane.b32.xlu1 %v5054_v38, %s5099_s0 }
0x4c8e   :  { %v3586_v40 = vpop.permute.xlu1 %3585 }
0x4c8f   :  { %v3588_v52 = vmul.f32 %v5052_v1, %v3586_v40 }
0x4c91   :  { %3590 = vrot.lane.b32.xlu0 %v3588_v52, %s5100_s2 }
0x4d03   :  { %v3591_v45 = vpop.permute.xlu0 %3590 }
0x4d04   :  { %3593 = vst.msk [vmem:[#allocation3 + $0x28] sm:$0xff] %vm181_vm2, %v3591_v45  ;;  %4583 = vmatmul.mubr.msk.f32.vlgmr.msra.gmra.mrb[38].mxu1 %vm181_vm2, %v3591_v45 }
0x4d05   :  { %4597 = vmatpush3.bf16.msra.mxu1 %v4813_v37  ;;  %4600 = vmatprep.mubr.msk.bf16.mxu1 %vm181_vm2, %v3808_v46 }
0x4d06   :  { %4598 = vmatprep.subr.bf16.mxu1 %v4814_v4 }
0x4d09   :  { %4599 = vmatpush3.bf16.msra.mxu1 %v4814_v4 }
0x4d0b   :  { %v3805_v42 = vld [vmem:[#allocation3 + $0x28] sm:$0xff] }
0x4d0c   :  { %4601 = vmatmul.mubr.msk.bf16.vlgmr.msra.gmra.mrb[40].mxu1 %vm181_vm2, %v3809_v63  ;;  %v3810_v30 = vpack.c.bf16 %v3805_v42, %v3804_v59 }
0x4d0e   :  { %4604 = vmatprep.mubr.msk.bf16.mxu1 %vm181_vm2, %v3810_v30 }
0x4dd7   :  { %v3663_v54 = vpop.f32.mrb[38].mxu1 }
0x4dd8   :  { %v3667_v50 = vadd.f32 %v3663_v54, %v2960_v49  ;;  %v4584_v51 = vpop.f32.mrb[39].mxu1 }
0x4dda   :  { %5055 = vtanh.f32 %v3667_v50  ;;  %v4006_v8 = vmul.f32 -1.442695, %v3667_v50 }
0x4ddc   :  { %5057 = vpow2.f32 %v4006_v8 }
0x4ddf   :  { %v4602_v55 = vpop.f32.mrb[40].mxu1 }
0x4de0   :  { %v3890_v61 = vadd.f32 %v4602_v55, %v5815_v53  ;;  %v3881_v62 = vpop.f32.mrb[41].mxu1 }
0x4de1   :  { %v3882_v32 = vadd.f32 %v5815_v53, %v3881_v62  ;;  %v4603_v6 = vpop.f32.mrb[42].mxu1 }
0x4de2   :  { %3914 = vst [vmem:[%s5878_s15 + $0x10] sm:$0xff] %v3890_v61  ;;  %v3893_v24 = vadd.f32 %v4603_v6, %v5815_v53  ;;  %v3884_v2 = vpop.f32.mrb[43].mxu1 }
0x4de3   :  { %3912 = vst [vmem:[%s5878_s15] sm:$0xff] %v3882_v32  ;;  %v3885_v3 = vadd.f32 %v5815_v53, %v3884_v2 }
0x4de4   :  { %v5056_v5 = vpop.eup %5055  ;;  %3915 = vst [vmem:[%s5878_s15 + $0x18] sm:$0xff] %v3893_v24 }
0x4de5   :  { %3913 = vst [vmem:[%s5878_s15 + $0x8] sm:$0xff] %v3885_v3  ;;  %3677 = vrot.lane.b32.xlu1 %v5056_v5, %s5099_s0 }
0x4de6   :  { %v5058_v57 = vpop.eup %5057 }
0x4de7   :  { %v3671_v11 = vadd.f32 1.0, %v5058_v57 }
0x4de9   :  { %5059 = vrcp.f32 %v3671_v11 }
0x4df3   :  { %v5060_v34 = vpop.eup %5059 }
0x4df4   :  { %v3675_v9 = vmul.f32 %v5060_v34, %v3582_v27 }
0x4e57   :  { %v3678_v60 = vpop.permute.xlu1 %3677 }
0x4e58   :  { %v3680_v58 = vmul.f32 %v5060_v34, %v3678_v60 }
0x4e5a   :  { %3682 = vrot.lane.b32.xlu0 %v3680_v58, %s5100_s2 }
0x4ecc   :  { %v3683_v10 = vpop.permute.xlu0 %3682 }
0x4ecd   :  { %v3685_v12 = vadd.f32 %v3683_v10, %v3675_v9 }
0x4ecf   :  { %5061 = vtanh.f32 %v3685_v12 }
0x4ed9   :  { %v5062_v13 = vpop.eup %5061 }
0x4eda   :  { %3688 = vrot.lane.b32.xlu1 %v5062_v13, %s5099_s0 }
0x4f4c   :  { %v3689_v7 = vpop.permute.xlu1 %3688 }
0x4f4d   :  { %v3691_v39 = vmul.f32 %v5060_v34, %v3689_v7 }
0x4f4f   :  { %3693 = vrot.lane.b32.xlu0 %v3691_v39, %s5100_s2 }
0x4fc1   :  { %v3694_v19 = vpop.permute.xlu0 %3693 }
0x4fc2   :  { %3696 = vst.msk [vmem:[#allocation3 + $0x30] sm:$0xff] %vm181_vm2, %v3694_v19  ;;  %4594 = vmatmul.mubr.msk.f32.vlgmr.msra.gmra.mrb[50].mxu0 %vm181_vm2, %v3694_v19 }
0x4fc9   :  { %v3806_v0 = vld [vmem:[#allocation3 + $0x30] sm:$0xff] }
0x5095   :  { %v3766_v15 = vpop.f32.mrb[50].mxu0 }
0x5096   :  { %v3770_v16 = vadd.f32 %v3766_v15, %v2963_v14  ;;  %v4595_v17 = vpop.f32.mrb[51].mxu0 }
0x5098   :  { %5063 = vtanh.f32 %v3770_v16  ;;  %v4008_v21 = vmul.f32 -1.442695, %v3770_v16 }
0x509a   :  { %5065 = vpow2.f32 %v4008_v21 }
0x50a2   :  { %v5064_v20 = vpop.eup %5063 }
0x50a3   :  { %3780 = vrot.lane.b32.xlu1 %v5064_v20, %s5099_s0 }
0x50a4   :  { %v5066_v22 = vpop.eup %5065 }
0x50a5   :  { %v3774_v25 = vadd.f32 1.0, %v5066_v22 }
0x50a7   :  { %5067 = vrcp.f32 %v3774_v25 }
0x50b1   :  { %v5068_v28 = vpop.eup %5067 }
0x50b2   :  { %v3778_v41 = vmul.f32 %v5068_v28, %v3685_v12 }
0x5115   :  { %v3781_v29 = vpop.permute.xlu1 %3780 }
0x5116   :  { %v3783_v31 = vmul.f32 %v5068_v28, %v3781_v29 }
0x5118   :  { %3785 = vrot.lane.b32.xlu0 %v3783_v31, %s5100_s2 }
0x518a   :  { %v3786_v36 = vpop.permute.xlu0 %3785 }
0x518b   :  { %v3788_v56 = vadd.f32 %v3786_v36, %v3778_v41 }
0x518d   :  { %5069 = vtanh.f32 %v3788_v56 }
0x5197   :  { %v5070_v23 = vpop.eup %5069 }
0x5198   :  { %3791 = vrot.lane.b32.xlu1 %v5070_v23, %s5099_s0 }
0x520a   :  { %v3792_v33 = vpop.permute.xlu1 %3791 }
0x520b   :  { %v3794_v1 = vmul.f32 %v5068_v28, %v3792_v33 }
0x520d   :  { %3796 = vrot.lane.b32.xlu0 %v3794_v1, %s5100_s2 }
0x527f   :  { %v3797_v48 = vpop.permute.xlu0 %3796 }
0x5280   :  { %3799 = vst.msk [vmem:[#allocation3 + $0x38] sm:$0xff] %vm181_vm2, %v3797_v48 }
0x5287   :  { %v3807_v18 = vld [vmem:[#allocation3 + $0x38] sm:$0xff] }
0x5288   :  { %v3811_v35 = vpack.c.bf16 %v3807_v18, %v3806_v0 }
0x528a   :  { %4605 = vmatmul.mubr.msk.bf16.gmra.mrb[44].mxu1 %vm181_vm2, %v3811_v35 }
0x535d   :  { %v4606_v27 = vpop.f32.mrb[44].mxu1 }
0x535e   :  { %v3906_v37 = vadd.f32 %v4606_v27, %v5815_v53  ;;  %v3897_v38 = vpop.f32.mrb[45].mxu1 }
0x535f   :  { %v3898_v40 = vadd.f32 %v5815_v53, %v3897_v38  ;;  %v4607_v52 = vpop.f32.mrb[46].mxu1 }
0x5360   :  { %3918 = vst [vmem:[%s5878_s15 + $0x30] sm:$0xff] %v3906_v37  ;;  %v3909_v43 = vadd.f32 %v4607_v52, %v5815_v53  ;;  %v3900_v44 = vpop.f32.mrb[47].mxu1 }
0x5361   :  { %3916 = vst [vmem:[%s5878_s15 + $0x20] sm:$0xff] %v3898_v40  ;;  %v3901_v4 = vadd.f32 %v5815_v53, %v3900_v44 }
0x5362   :  { %3919 = vst [vmem:[%s5878_s15 + $0x38] sm:$0xff] %v3909_v43 }
0x5363   :  { %3917 = vst [vmem:[%s5878_s15 + $0x28] sm:$0xff] %v3901_v4 }
0x5364   :  { %3924 = vsyncpa [#allocation5], 1 }

</bundles_post_ra>
